<compile_context>
chip_gen: v5e
topology: v5e:2x2
jax: 0.10.0
libtpu: 0.0.40
codegen_flags: <defaults>
</compile_context>

<pallas_src>
import jax
import jax.numpy as jnp
from jax.experimental import pallas as pl
from jax.experimental.pallas import tpu as pltpu


def _downsample_kernel(xt_ref, w_ref, b_ref, o_ref):
    # xt_ref: (1, 1, 4, th+2, Wd, Cp)  parity planes p = 2*(r%2) + (s%2), bf16
    # w_ref : (25, Cp, cb)             folded 5x5 weights, tap-major, bf16
    # b_ref : (1, cb)                  combined bias (b1 + b2), f32
    # o_ref : (1, th, OW, cb)          output tile, bf16
    _, th, OW, cb = o_ref.shape
    Cp = xt_ref.shape[-1]
    M = th * OW

    acc = jnp.zeros((M, cb), jnp.float32)
    for s in range(5):                       # kernel column
        s0 = s // 2
        for r_par in range(2):               # kernel-row parity
            p = 2 * r_par + (s % 2)
            # One column-window slice per (s, r_par); reused for every kernel
            # row of this parity -> fewer sublane-shift re-layouts.
            colwin = xt_ref[0, 0, p, :, s0:s0 + OW, :]      # (th+2, OW, Cp)
            for r in range(r_par, 5, 2):     # kernel rows with this parity
                r0 = r // 2
                patch = colwin[r0:r0 + th].reshape(M, Cp)   # cheap row slice
                acc = acc + jnp.dot(patch, w_ref[r * 5 + s],
                                    preferred_element_type=jnp.float32)
    acc = acc + b_ref[...]
    o_ref[0] = acc.reshape(th, OW, cb).astype(o_ref.dtype)


def _vmem_capacity_bytes():
    try:
        cap = int(pltpu.get_tpu_info().vmem_capacity_bytes)
    except Exception:
        cap = 64 * 1024 * 1024          # conservative (v7x per-TC) fallback
    return max(32 * 1024 * 1024, min(cap, 128 * 1024 * 1024))


def _choose_row_tile(OH, OW, Wd, Cp, cb, budget_bytes, single_buf_consts):
    """Largest divisor of OH whose *full* per-step VMEM footprint fits."""
    bpe = 2  # bf16
    for th in range(OH, 0, -1):
        if OH % th:
            continue
        M = th * OW
        in_tile = 4 * (th + 2) * Wd * Cp * bpe * 2       # double-buffered input
        out_tile = M * cb * bpe * 2                      # double-buffered output
        acc = M * cb * 4                                 # f32 accumulator
        colwin = (th + 2) * OW * Cp * bpe                # live column window
        w_bytes = 25 * Cp * cb * bpe * (1 if single_buf_consts else 2)
        b_bytes = cb * 4 * (1 if single_buf_consts else 2)
        if in_tile + out_tile + acc + colwin + w_bytes + b_bytes <= budget_bytes:
            return th
    return 1


def downsample(x_nchw, w1, b1, w2, b2, temb=None, cemb=None, *,
               row_tile=None, compute_dtype=jnp.bfloat16):
    """DownSample forward: conv3x3(stride2,pad1)(x) + conv5x5(stride2,pad2)(x).

    x_nchw: (B, C, H, W); w1: (3,3,C,C) HWIO; w2: (5,5,C,C) HWIO; b*: (C,).
    temb / cemb are accepted (module signature) but unused, as in the module.
    Returns (B, C, H//2, W//2) in x_nchw.dtype.
    """
    del temb, cemb
    B, C, H, W = x_nchw.shape
    # TODO(synk): odd H/W would need a different output-shape/halo derivation;
    # the DDPM UNet only downsamples even spatial extents.
    assert H % 2 == 0 and W % 2 == 0, "even H, W required"
    OH, OW = H // 2, W // 2
    Hd, Wd = OH + 2, OW + 2                               # decimated padded dims
    Cp = ((C + 127) // 128) * 128                         # lane-dense channels
    cb = Cp if Cp <= 256 else (256 if Cp % 256 == 0 else 128)
    NC = Cp // cb
    single_buf_consts = Cp >= 256

    cap = _vmem_capacity_bytes()
    if row_tile is None:
        row_tile = _choose_row_tile(OH, OW, Wd, Cp, cb, int(0.60 * cap),
                                    single_buf_consts)
    th = row_tile
    assert OH % th == 0, "row_tile must divide OH"
    NT = OH // th

    # ---- fold conv3x3(pad=1) into conv5x5(pad=2): one conv, 25 taps ---------
    w1p = jnp.zeros((3, 3, Cp, Cp), jnp.float32).at[:, :, :C, :C].set(
        w1.astype(jnp.float32))
    w2p = jnp.zeros((5, 5, Cp, Cp), jnp.float32).at[:, :, :C, :C].set(
        w2.astype(jnp.float32))
    wc = w2p.at[1:4, 1:4].add(w1p)                        # (5, 5, Cp, Cp) HWIO
    w_taps = wc.reshape(25, Cp, Cp).astype(compute_dtype)
    b_comb = jnp.zeros((1, Cp), jnp.float32).at[0, :C].set(
        (b1 + b2).astype(jnp.float32))

    # ---- activations: cast+pad (one fused pass) + one space-to-depth pass ----
    # (B, Cp, H+4, W+4) -> (B, 4, Hd, Wd, Cp), plane p = 2*(row%2) + (col%2)
    xp = jnp.pad(x_nchw.astype(compute_dtype),
                 ((0, 0), (0, Cp - C), (2, 2), (2, 2)))
    xd = xp.reshape(B, Cp, Hd, 2, Wd, 2).transpose(0, 3, 5, 2, 4, 1)
    xd = xd.reshape(B, 4, Hd, Wd, Cp)

    if NT == 1:
        xt = xd.reshape(B, 1, 4, Hd, Wd, Cp)              # no halo, no extra pass
    else:
        # TODO(synk): for images too large for a single tile, replace this halo
        # materialization with in-kernel DMA from a memory_space=pl.ANY ref.
        xt = jnp.stack(
            [xd[:, :, j * th: j * th + th + 2] for j in range(NT)], axis=1)

    w_idx = lambda c, b, j: (0, 0, c)
    b_idx = lambda c, b, j: (0, c)
    if single_buf_consts:
        # Constant-index operands: single-buffer (default double-buffering of
        # 25*Cp*cb bf16 weights is pure VMEM waste at Cp >= 256).
        w_spec = pl.BlockSpec((25, Cp, cb), w_idx, pipeline_mode=pl.Buffered(1))
        b_spec = pl.BlockSpec((1, cb), b_idx, pipeline_mode=pl.Buffered(1))
    else:
        w_spec = pl.BlockSpec((25, Cp, cb), w_idx)
        b_spec = pl.BlockSpec((1, cb), b_idx)

    out = pl.pallas_call(
        _downsample_kernel,
        out_shape=jax.ShapeDtypeStruct((B, OH, OW, Cp), jnp.bfloat16),
        grid_spec=pltpu.PrefetchScalarGridSpec(
            num_scalar_prefetch=0,
            grid=(NC, B, NT),
            in_specs=[
                pl.BlockSpec((1, 1, 4, th + 2, Wd, Cp),
                             lambda c, b, j: (b, j, 0, 0, 0, 0)),
                w_spec,
                b_spec,
            ],
            out_specs=pl.BlockSpec((1, th, OW, cb),
                                   lambda c, b, j: (b, j, 0, c)),
        ),
        compiler_params=pltpu.CompilerParams(
            dimension_semantics=("parallel", "parallel", "parallel"),
            vmem_limit_bytes=int(0.85 * cap),
        ),
    )(xt, w_taps, b_comb)

    out = out[..., :C]                                    # drop channel padding
    return jnp.transpose(out, (0, 3, 1, 2)).astype(x_nchw.dtype)


def _reference(x_nchw, w1, b1, w2, b2):
    x = jnp.transpose(x_nchw, (0, 2, 3, 1))
    dn = jax.lax.conv_dimension_numbers(x.shape, w1.shape, ("NHWC", "HWIO", "NHWC"))
    y1 = jax.lax.conv_general_dilated(x, w1, (2, 2), ((1, 1), (1, 1)),
                                      dimension_numbers=dn) + b1.reshape(1, 1, 1, -1)
    y2 = jax.lax.conv_general_dilated(x, w2, (2, 2), ((2, 2), (2, 2)),
                                      dimension_numbers=dn) + b2.reshape(1, 1, 1, -1)
    return jnp.transpose(y1 + y2, (0, 3, 1, 2))


if __name__ == "__main__":
    B, C, H, W = 2, 4, 16, 16
    key = jax.random.PRNGKey(0)
    kx, kw1, kb1, kw2, kb2 = jax.random.split(key, 5)

    x = jax.random.normal(kx, (B, C, H, W), dtype=jnp.float32)

    # Deterministic synthetic parameters (HWIO layout), roughly matching the
    # scale of PyTorch's default conv init (fan_in based).
    fan_in1 = C * 3 * 3
    fan_in2 = C * 5 * 5
    w1 = jax.random.uniform(kw1, (3, 3, C, C), jnp.float32, -1.0, 1.0) / (fan_in1 ** 0.5)
    b1 = jax.random.uniform(kb1, (C,), jnp.float32, -1.0, 1.0) / (fan_in1 ** 0.5)
    w2 = jax.random.uniform(kw2, (5, 5, C, C), jnp.float32, -1.0, 1.0) / (fan_in2 ** 0.5)
    b2 = jax.random.uniform(kb2, (C,), jnp.float32, -1.0, 1.0) / (fan_in2 ** 0.5)

    ref = _reference(x, w1, b1, w2, b2)

    # Auto-tiled path: whole image per batch element (NT=1, no halo pass).
    out = downsample(x, w1, b1, w2, b2)
    jax.block_until_ready(out)
    assert out.shape == (B, C, H // 2, W // 2), out.shape
    # bf16 activations/weights/output with f32 accumulation vs. f32 reference.
    assert jnp.allclose(out, ref, atol=5e-2, rtol=5e-2), (
        float(jnp.max(jnp.abs(out - ref))))

    # Row-tiled fallback path (exercises the halo handling; OH=8 -> 2 tiles).
    out_tiled = downsample(x, w1, b1, w2, b2, row_tile=4)
    jax.block_until_ready(out_tiled)
    assert jnp.allclose(out_tiled, ref, atol=5e-2, rtol=5e-2), (
        float(jnp.max(jnp.abs(out_tiled - ref))))

    print("KERNEL_OK")
</pallas_src>

<mosaic_0001>
module attributes {stable_mosaic.version = 11 : i64} {
  func.func @_downsample_kernel(%arg0: i32, %arg1: i32, %arg2: i32, %arg3: memref<1x1x4x10x10x128xbf16, #tpu.memory_space<vmem>>, %arg4: memref<25x128x128xbf16, #tpu.memory_space<vmem>>, %arg5: memref<1x128xf32, #tpu.memory_space<vmem>>, %arg6: memref<1x8x8x128xbf16, #tpu.memory_space<vmem>>) attributes {dimension_semantics = [#tpu.dimension_semantics<parallel>, #tpu.dimension_semantics<parallel>, #tpu.dimension_semantics<parallel>], iteration_bounds = array<i64: 1, 2, 1>, scalar_prefetch = 0 : i64, scratch_operands = 0 : i64, tpu.core_type = #tpu.core_type<tc>, window_params = [{transform_indices = @transform_0, window_bounds = array<i64: 1, 1, 4, 10, 10, 128>}, {transform_indices = @transform_1, window_bounds = array<i64: 25, 128, 128>}, {transform_indices = @transform_2, window_bounds = array<i64: 1, 128>}, {transform_indices = @transform_3, window_bounds = array<i64: 1, 8, 8, 128>}]} {
    %cst = arith.constant 0.000000e+00 : f32
    %0 = vector.broadcast %cst : f32 to vector<64x128xf32>
    %c0 = arith.constant 0 : index
    %c0_0 = arith.constant 0 : index
    %c0_1 = arith.constant 0 : index
    %c0_2 = arith.constant 0 : index
    %c0_3 = arith.constant 0 : index
    %c0_4 = arith.constant 0 : index
    %1 = vector.load %arg3[%c0, %c0_0, %c0_1, %c0_2, %c0_3, %c0_4] : memref<1x1x4x10x10x128xbf16, #tpu.memory_space<vmem>>, vector<1x1x1x10x8x128xbf16>
    %2 = vector.shape_cast %1 : vector<1x1x1x10x8x128xbf16> to vector<10x8x128xbf16>
    %3 = vector.extract_strided_slice %2 {offsets = [0, 0, 0], sizes = [8, 8, 128], strides = [1, 1, 1]} : vector<10x8x128xbf16> to vector<8x8x128xbf16>
    %4 = vector.shape_cast %3 : vector<8x8x128xbf16> to vector<64x128xbf16>
    %c0_5 = arith.constant 0 : index
    %c0_6 = arith.constant 0 : index
    %c0_7 = arith.constant 0 : index
    %5 = vector.load %arg4[%c0_5, %c0_6, %c0_7] : memref<25x128x128xbf16, #tpu.memory_space<vmem>>, vector<1x128x128xbf16>
    %6 = vector.shape_cast %5 : vector<1x128x128xbf16> to vector<128x128xbf16>
    %cst_8 = arith.constant dense<0.000000e+00> : vector<64x128xf32>
    %7 = tpu.matmul %4, %6, %cst_8 {dimension_numbers = #tpu.dot_dimension_numbers<[1], [0], [0], [1], [0, 0, 1, 1], [], []>} : vector<64x128xbf16>, vector<128x128xbf16>, vector<64x128xf32> -> vector<64x128xf32>
    %8 = arith.addf %0, %7 : vector<64x128xf32>
    %9 = vector.extract_strided_slice %2 {offsets = [1, 0, 0], sizes = [8, 8, 128], strides = [1, 1, 1]} : vector<10x8x128xbf16> to vector<8x8x128xbf16>
    %10 = vector.shape_cast %9 : vector<8x8x128xbf16> to vector<64x128xbf16>
    %c10 = arith.constant 10 : index
    %c0_9 = arith.constant 0 : index
    %c0_10 = arith.constant 0 : index
    %11 = vector.load %arg4[%c10, %c0_9, %c0_10] : memref<25x128x128xbf16, #tpu.memory_space<vmem>>, vector<1x128x128xbf16>
    %12 = vector.shape_cast %11 : vector<1x128x128xbf16> to vector<128x128xbf16>
    %cst_11 = arith.constant dense<0.000000e+00> : vector<64x128xf32>
    %13 = tpu.matmul %10, %12, %cst_11 {dimension_numbers = #tpu.dot_dimension_numbers<[1], [0], [0], [1], [0, 0, 1, 1], [], []>} : vector<64x128xbf16>, vector<128x128xbf16>, vector<64x128xf32> -> vector<64x128xf32>
    %14 = arith.addf %8, %13 : vector<64x128xf32>
    %15 = vector.extract_strided_slice %2 {offsets = [2, 0, 0], sizes = [8, 8, 128], strides = [1, 1, 1]} : vector<10x8x128xbf16> to vector<8x8x128xbf16>
    %16 = vector.shape_cast %15 : vector<8x8x128xbf16> to vector<64x128xbf16>
    %c20 = arith.constant 20 : index
    %c0_12 = arith.constant 0 : index
    %c0_13 = arith.constant 0 : index
    %17 = vector.load %arg4[%c20, %c0_12, %c0_13] : memref<25x128x128xbf16, #tpu.memory_space<vmem>>, vector<1x128x128xbf16>
    %18 = vector.shape_cast %17 : vector<1x128x128xbf16> to vector<128x128xbf16>
    %cst_14 = arith.constant dense<0.000000e+00> : vector<64x128xf32>
    %19 = tpu.matmul %16, %18, %cst_14 {dimension_numbers = #tpu.dot_dimension_numbers<[1], [0], [0], [1], [0, 0, 1, 1], [], []>} : vector<64x128xbf16>, vector<128x128xbf16>, vector<64x128xf32> -> vector<64x128xf32>
    %20 = arith.addf %14, %19 : vector<64x128xf32>
    %c0_15 = arith.constant 0 : index
    %c0_16 = arith.constant 0 : index
    %c2 = arith.constant 2 : index
    %c0_17 = arith.constant 0 : index
    %c0_18 = arith.constant 0 : index
    %c0_19 = arith.constant 0 : index
    %21 = vector.load %arg3[%c0_15, %c0_16, %c2, %c0_17, %c0_18, %c0_19] : memref<1x1x4x10x10x128xbf16, #tpu.memory_space<vmem>>, vector<1x1x1x10x8x128xbf16>
    %22 = vector.shape_cast %21 : vector<1x1x1x10x8x128xbf16> to vector<10x8x128xbf16>
    %23 = vector.extract_strided_slice %22 {offsets = [0, 0, 0], sizes = [8, 8, 128], strides = [1, 1, 1]} : vector<10x8x128xbf16> to vector<8x8x128xbf16>
    %24 = vector.shape_cast %23 : vector<8x8x128xbf16> to vector<64x128xbf16>
    %c5 = arith.constant 5 : index
    %c0_20 = arith.constant 0 : index
    %c0_21 = arith.constant 0 : index
    %25 = vector.load %arg4[%c5, %c0_20, %c0_21] : memref<25x128x128xbf16, #tpu.memory_space<vmem>>, vector<1x128x128xbf16>
    %26 = vector.shape_cast %25 : vector<1x128x128xbf16> to vector<128x128xbf16>
    %cst_22 = arith.constant dense<0.000000e+00> : vector<64x128xf32>
    %27 = tpu.matmul %24, %26, %cst_22 {dimension_numbers = #tpu.dot_dimension_numbers<[1], [0], [0], [1], [0, 0, 1, 1], [], []>} : vector<64x128xbf16>, vector<128x128xbf16>, vector<64x128xf32> -> vector<64x128xf32>
    %28 = arith.addf %20, %27 : vector<64x128xf32>
    %29 = vector.extract_strided_slice %22 {offsets = [1, 0, 0], sizes = [8, 8, 128], strides = [1, 1, 1]} : vector<10x8x128xbf16> to vector<8x8x128xbf16>
    %30 = vector.shape_cast %29 : vector<8x8x128xbf16> to vector<64x128xbf16>
    %c15 = arith.constant 15 : index
    %c0_23 = arith.constant 0 : index
    %c0_24 = arith.constant 0 : index
    %31 = vector.load %arg4[%c15, %c0_23, %c0_24] : memref<25x128x128xbf16, #tpu.memory_space<vmem>>, vector<1x128x128xbf16>
    %32 = vector.shape_cast %31 : vector<1x128x128xbf16> to vector<128x128xbf16>
    %cst_25 = arith.constant dense<0.000000e+00> : vector<64x128xf32>
    %33 = tpu.matmul %30, %32, %cst_25 {dimension_numbers = #tpu.dot_dimension_numbers<[1], [0], [0], [1], [0, 0, 1, 1], [], []>} : vector<64x128xbf16>, vector<128x128xbf16>, vector<64x128xf32> -> vector<64x128xf32>
    %34 = arith.addf %28, %33 : vector<64x128xf32>
    %c0_26 = arith.constant 0 : index
    %c0_27 = arith.constant 0 : index
    %c1 = arith.constant 1 : index
    %c0_28 = arith.constant 0 : index
    %c0_29 = arith.constant 0 : index
    %c0_30 = arith.constant 0 : index
    %35 = vector.load %arg3[%c0_26, %c0_27, %c1, %c0_28, %c0_29, %c0_30] : memref<1x1x4x10x10x128xbf16, #tpu.memory_space<vmem>>, vector<1x1x1x10x8x128xbf16>
    %36 = vector.shape_cast %35 : vector<1x1x1x10x8x128xbf16> to vector<10x8x128xbf16>
    %37 = vector.extract_strided_slice %36 {offsets = [0, 0, 0], sizes = [8, 8, 128], strides = [1, 1, 1]} : vector<10x8x128xbf16> to vector<8x8x128xbf16>
    %38 = vector.shape_cast %37 : vector<8x8x128xbf16> to vector<64x128xbf16>
    %c1_31 = arith.constant 1 : index
    %c0_32 = arith.constant 0 : index
    %c0_33 = arith.constant 0 : index
    %39 = vector.load %arg4[%c1_31, %c0_32, %c0_33] : memref<25x128x128xbf16, #tpu.memory_space<vmem>>, vector<1x128x128xbf16>
    %40 = vector.shape_cast %39 : vector<1x128x128xbf16> to vector<128x128xbf16>
    %cst_34 = arith.constant dense<0.000000e+00> : vector<64x128xf32>
    %41 = tpu.matmul %38, %40, %cst_34 {dimension_numbers = #tpu.dot_dimension_numbers<[1], [0], [0], [1], [0, 0, 1, 1], [], []>} : vector<64x128xbf16>, vector<128x128xbf16>, vector<64x128xf32> -> vector<64x128xf32>
    %42 = arith.addf %34, %41 : vector<64x128xf32>
    %43 = vector.extract_strided_slice %36 {offsets = [1, 0, 0], sizes = [8, 8, 128], strides = [1, 1, 1]} : vector<10x8x128xbf16> to vector<8x8x128xbf16>
    %44 = vector.shape_cast %43 : vector<8x8x128xbf16> to vector<64x128xbf16>
    %c11 = arith.constant 11 : index
    %c0_35 = arith.constant 0 : index
    %c0_36 = arith.constant 0 : index
    %45 = vector.load %arg4[%c11, %c0_35, %c0_36] : memref<25x128x128xbf16, #tpu.memory_space<vmem>>, vector<1x128x128xbf16>
    %46 = vector.shape_cast %45 : vector<1x128x128xbf16> to vector<128x128xbf16>
    %cst_37 = arith.constant dense<0.000000e+00> : vector<64x128xf32>
    %47 = tpu.matmul %44, %46, %cst_37 {dimension_numbers = #tpu.dot_dimension_numbers<[1], [0], [0], [1], [0, 0, 1, 1], [], []>} : vector<64x128xbf16>, vector<128x128xbf16>, vector<64x128xf32> -> vector<64x128xf32>
    %48 = arith.addf %42, %47 : vector<64x128xf32>
    %49 = vector.extract_strided_slice %36 {offsets = [2, 0, 0], sizes = [8, 8, 128], strides = [1, 1, 1]} : vector<10x8x128xbf16> to vector<8x8x128xbf16>
    %50 = vector.shape_cast %49 : vector<8x8x128xbf16> to vector<64x128xbf16>
    %c21 = arith.constant 21 : index
    %c0_38 = arith.constant 0 : index
    %c0_39 = arith.constant 0 : index
    %51 = vector.load %arg4[%c21, %c0_38, %c0_39] : memref<25x128x128xbf16, #tpu.memory_space<vmem>>, vector<1x128x128xbf16>
    %52 = vector.shape_cast %51 : vector<1x128x128xbf16> to vector<128x128xbf16>
    %cst_40 = arith.constant dense<0.000000e+00> : vector<64x128xf32>
    %53 = tpu.matmul %50, %52, %cst_40 {dimension_numbers = #tpu.dot_dimension_numbers<[1], [0], [0], [1], [0, 0, 1, 1], [], []>} : vector<64x128xbf16>, vector<128x128xbf16>, vector<64x128xf32> -> vector<64x128xf32>
    %54 = arith.addf %48, %53 : vector<64x128xf32>
    %c0_41 = arith.constant 0 : index
    %c0_42 = arith.constant 0 : index
    %c3 = arith.constant 3 : index
    %c0_43 = arith.constant 0 : index
    %c0_44 = arith.constant 0 : index
    %c0_45 = arith.constant 0 : index
    %55 = vector.load %arg3[%c0_41, %c0_42, %c3, %c0_43, %c0_44, %c0_45] : memref<1x1x4x10x10x128xbf16, #tpu.memory_space<vmem>>, vector<1x1x1x10x8x128xbf16>
    %56 = vector.shape_cast %55 : vector<1x1x1x10x8x128xbf16> to vector<10x8x128xbf16>
    %57 = vector.extract_strided_slice %56 {offsets = [0, 0, 0], sizes = [8, 8, 128], strides = [1, 1, 1]} : vector<10x8x128xbf16> to vector<8x8x128xbf16>
    %58 = vector.shape_cast %57 : vector<8x8x128xbf16> to vector<64x128xbf16>
    %c6 = arith.constant 6 : index
    %c0_46 = arith.constant 0 : index
    %c0_47 = arith.constant 0 : index
    %59 = vector.load %arg4[%c6, %c0_46, %c0_47] : memref<25x128x128xbf16, #tpu.memory_space<vmem>>, vector<1x128x128xbf16>
    %60 = vector.shape_cast %59 : vector<1x128x128xbf16> to vector<128x128xbf16>
    %cst_48 = arith.constant dense<0.000000e+00> : vector<64x128xf32>
    %61 = tpu.matmul %58, %60, %cst_48 {dimension_numbers = #tpu.dot_dimension_numbers<[1], [0], [0], [1], [0, 0, 1, 1], [], []>} : vector<64x128xbf16>, vector<128x128xbf16>, vector<64x128xf32> -> vector<64x128xf32>
    %62 = arith.addf %54, %61 : vector<64x128xf32>
    %63 = vector.extract_strided_slice %56 {offsets = [1, 0, 0], sizes = [8, 8, 128], strides = [1, 1, 1]} : vector<10x8x128xbf16> to vector<8x8x128xbf16>
    %64 = vector.shape_cast %63 : vector<8x8x128xbf16> to vector<64x128xbf16>
    %c16 = arith.constant 16 : index
    %c0_49 = arith.constant 0 : index
    %c0_50 = arith.constant 0 : index
    %65 = vector.load %arg4[%c16, %c0_49, %c0_50] : memref<25x128x128xbf16, #tpu.memory_space<vmem>>, vector<1x128x128xbf16>
    %66 = vector.shape_cast %65 : vector<1x128x128xbf16> to vector<128x128xbf16>
    %cst_51 = arith.constant dense<0.000000e+00> : vector<64x128xf32>
    %67 = tpu.matmul %64, %66, %cst_51 {dimension_numbers = #tpu.dot_dimension_numbers<[1], [0], [0], [1], [0, 0, 1, 1], [], []>} : vector<64x128xbf16>, vector<128x128xbf16>, vector<64x128xf32> -> vector<64x128xf32>
    %68 = arith.addf %62, %67 : vector<64x128xf32>
    %c0_52 = arith.constant 0 : index
    %c0_53 = arith.constant 0 : index
    %c0_54 = arith.constant 0 : index
    %c0_55 = arith.constant 0 : index
    %c1_56 = arith.constant 1 : index
    %c0_57 = arith.constant 0 : index
    %69 = vector.load %arg3[%c0_52, %c0_53, %c0_54, %c0_55, %c1_56, %c0_57] : memref<1x1x4x10x10x128xbf16, #tpu.memory_space<vmem>>, vector<1x1x1x10x8x128xbf16>
    %70 = vector.shape_cast %69 : vector<1x1x1x10x8x128xbf16> to vector<10x8x128xbf16>
    %71 = vector.extract_strided_slice %70 {offsets = [0, 0, 0], sizes = [8, 8, 128], strides = [1, 1, 1]} : vector<10x8x128xbf16> to vector<8x8x128xbf16>
    %72 = vector.shape_cast %71 : vector<8x8x128xbf16> to vector<64x128xbf16>
    %c2_58 = arith.constant 2 : index
    %c0_59 = arith.constant 0 : index
    %c0_60 = arith.constant 0 : index
    %73 = vector.load %arg4[%c2_58, %c0_59, %c0_60] : memref<25x128x128xbf16, #tpu.memory_space<vmem>>, vector<1x128x128xbf16>
    %74 = vector.shape_cast %73 : vector<1x128x128xbf16> to vector<128x128xbf16>
    %cst_61 = arith.constant dense<0.000000e+00> : vector<64x128xf32>
    %75 = tpu.matmul %72, %74, %cst_61 {dimension_numbers = #tpu.dot_dimension_numbers<[1], [0], [0], [1], [0, 0, 1, 1], [], []>} : vector<64x128xbf16>, vector<128x128xbf16>, vector<64x128xf32> -> vector<64x128xf32>
    %76 = arith.addf %68, %75 : vector<64x128xf32>
    %77 = vector.extract_strided_slice %70 {offsets = [1, 0, 0], sizes = [8, 8, 128], strides = [1, 1, 1]} : vector<10x8x128xbf16> to vector<8x8x128xbf16>
    %78 = vector.shape_cast %77 : vector<8x8x128xbf16> to vector<64x128xbf16>
    %c12 = arith.constant 12 : index
    %c0_62 = arith.constant 0 : index
    %c0_63 = arith.constant 0 : index
    %79 = vector.load %arg4[%c12, %c0_62, %c0_63] : memref<25x128x128xbf16, #tpu.memory_space<vmem>>, vector<1x128x128xbf16>
    %80 = vector.shape_cast %79 : vector<1x128x128xbf16> to vector<128x128xbf16>
    %cst_64 = arith.constant dense<0.000000e+00> : vector<64x128xf32>
    %81 = tpu.matmul %78, %80, %cst_64 {dimension_numbers = #tpu.dot_dimension_numbers<[1], [0], [0], [1], [0, 0, 1, 1], [], []>} : vector<64x128xbf16>, vector<128x128xbf16>, vector<64x128xf32> -> vector<64x128xf32>
    %82 = arith.addf %76, %81 : vector<64x128xf32>
    %83 = vector.extract_strided_slice %70 {offsets = [2, 0, 0], sizes = [8, 8, 128], strides = [1, 1, 1]} : vector<10x8x128xbf16> to vector<8x8x128xbf16>
    %84 = vector.shape_cast %83 : vector<8x8x128xbf16> to vector<64x128xbf16>
    %c22 = arith.constant 22 : index
    %c0_65 = arith.constant 0 : index
    %c0_66 = arith.constant 0 : index
    %85 = vector.load %arg4[%c22, %c0_65, %c0_66] : memref<25x128x128xbf16, #tpu.memory_space<vmem>>, vector<1x128x128xbf16>
    %86 = vector.shape_cast %85 : vector<1x128x128xbf16> to vector<128x128xbf16>
    %cst_67 = arith.constant dense<0.000000e+00> : vector<64x128xf32>
    %87 = tpu.matmul %84, %86, %cst_67 {dimension_numbers = #tpu.dot_dimension_numbers<[1], [0], [0], [1], [0, 0, 1, 1], [], []>} : vector<64x128xbf16>, vector<128x128xbf16>, vector<64x128xf32> -> vector<64x128xf32>
    %88 = arith.addf %82, %87 : vector<64x128xf32>
    %c0_68 = arith.constant 0 : index
    %c0_69 = arith.constant 0 : index
    %c2_70 = arith.constant 2 : index
    %c0_71 = arith.constant 0 : index
    %c1_72 = arith.constant 1 : index
    %c0_73 = arith.constant 0 : index
    %89 = vector.load %arg3[%c0_68, %c0_69, %c2_70, %c0_71, %c1_72, %c0_73] : memref<1x1x4x10x10x128xbf16, #tpu.memory_space<vmem>>, vector<1x1x1x10x8x128xbf16>
    %90 = vector.shape_cast %89 : vector<1x1x1x10x8x128xbf16> to vector<10x8x128xbf16>
    %91 = vector.extract_strided_slice %90 {offsets = [0, 0, 0], sizes = [8, 8, 128], strides = [1, 1, 1]} : vector<10x8x128xbf16> to vector<8x8x128xbf16>
    %92 = vector.shape_cast %91 : vector<8x8x128xbf16> to vector<64x128xbf16>
    %c7 = arith.constant 7 : index
    %c0_74 = arith.constant 0 : index
    %c0_75 = arith.constant 0 : index
    %93 = vector.load %arg4[%c7, %c0_74, %c0_75] : memref<25x128x128xbf16, #tpu.memory_space<vmem>>, vector<1x128x128xbf16>
    %94 = vector.shape_cast %93 : vector<1x128x128xbf16> to vector<128x128xbf16>
    %cst_76 = arith.constant dense<0.000000e+00> : vector<64x128xf32>
    %95 = tpu.matmul %92, %94, %cst_76 {dimension_numbers = #tpu.dot_dimension_numbers<[1], [0], [0], [1], [0, 0, 1, 1], [], []>} : vector<64x128xbf16>, vector<128x128xbf16>, vector<64x128xf32> -> vector<64x128xf32>
    %96 = arith.addf %88, %95 : vector<64x128xf32>
    %97 = vector.extract_strided_slice %90 {offsets = [1, 0, 0], sizes = [8, 8, 128], strides = [1, 1, 1]} : vector<10x8x128xbf16> to vector<8x8x128xbf16>
    %98 = vector.shape_cast %97 : vector<8x8x128xbf16> to vector<64x128xbf16>
    %c17 = arith.constant 17 : index
    %c0_77 = arith.constant 0 : index
    %c0_78 = arith.constant 0 : index
    %99 = vector.load %arg4[%c17, %c0_77, %c0_78] : memref<25x128x128xbf16, #tpu.memory_space<vmem>>, vector<1x128x128xbf16>
    %100 = vector.shape_cast %99 : vector<1x128x128xbf16> to vector<128x128xbf16>
    %cst_79 = arith.constant dense<0.000000e+00> : vector<64x128xf32>
    %101 = tpu.matmul %98, %100, %cst_79 {dimension_numbers = #tpu.dot_dimension_numbers<[1], [0], [0], [1], [0, 0, 1, 1], [], []>} : vector<64x128xbf16>, vector<128x128xbf16>, vector<64x128xf32> -> vector<64x128xf32>
    %102 = arith.addf %96, %101 : vector<64x128xf32>
    %c0_80 = arith.constant 0 : index
    %c0_81 = arith.constant 0 : index
    %c1_82 = arith.constant 1 : index
    %c0_83 = arith.constant 0 : index
    %c1_84 = arith.constant 1 : index
    %c0_85 = arith.constant 0 : index
    %103 = vector.load %arg3[%c0_80, %c0_81, %c1_82, %c0_83, %c1_84, %c0_85] : memref<1x1x4x10x10x128xbf16, #tpu.memory_space<vmem>>, vector<1x1x1x10x8x128xbf16>
    %104 = vector.shape_cast %103 : vector<1x1x1x10x8x128xbf16> to vector<10x8x128xbf16>
    %105 = vector.extract_strided_slice %104 {offsets = [0, 0, 0], sizes = [8, 8, 128], strides = [1, 1, 1]} : vector<10x8x128xbf16> to vector<8x8x128xbf16>
    %106 = vector.shape_cast %105 : vector<8x8x128xbf16> to vector<64x128xbf16>
    %c3_86 = arith.constant 3 : index
    %c0_87 = arith.constant 0 : index
    %c0_88 = arith.constant 0 : index
    %107 = vector.load %arg4[%c3_86, %c0_87, %c0_88] : memref<25x128x128xbf16, #tpu.memory_space<vmem>>, vector<1x128x128xbf16>
    %108 = vector.shape_cast %107 : vector<1x128x128xbf16> to vector<128x128xbf16>
    %cst_89 = arith.constant dense<0.000000e+00> : vector<64x128xf32>
    %109 = tpu.matmul %106, %108, %cst_89 {dimension_numbers = #tpu.dot_dimension_numbers<[1], [0], [0], [1], [0, 0, 1, 1], [], []>} : vector<64x128xbf16>, vector<128x128xbf16>, vector<64x128xf32> -> vector<64x128xf32>
    %110 = arith.addf %102, %109 : vector<64x128xf32>
    %111 = vector.extract_strided_slice %104 {offsets = [1, 0, 0], sizes = [8, 8, 128], strides = [1, 1, 1]} : vector<10x8x128xbf16> to vector<8x8x128xbf16>
    %112 = vector.shape_cast %111 : vector<8x8x128xbf16> to vector<64x128xbf16>
    %c13 = arith.constant 13 : index
    %c0_90 = arith.constant 0 : index
    %c0_91 = arith.constant 0 : index
    %113 = vector.load %arg4[%c13, %c0_90, %c0_91] : memref<25x128x128xbf16, #tpu.memory_space<vmem>>, vector<1x128x128xbf16>
    %114 = vector.shape_cast %113 : vector<1x128x128xbf16> to vector<128x128xbf16>
    %cst_92 = arith.constant dense<0.000000e+00> : vector<64x128xf32>
    %115 = tpu.matmul %112, %114, %cst_92 {dimension_numbers = #tpu.dot_dimension_numbers<[1], [0], [0], [1], [0, 0, 1, 1], [], []>} : vector<64x128xbf16>, vector<128x128xbf16>, vector<64x128xf32> -> vector<64x128xf32>
    %116 = arith.addf %110, %115 : vector<64x128xf32>
    %117 = vector.extract_strided_slice %104 {offsets = [2, 0, 0], sizes = [8, 8, 128], strides = [1, 1, 1]} : vector<10x8x128xbf16> to vector<8x8x128xbf16>
    %118 = vector.shape_cast %117 : vector<8x8x128xbf16> to vector<64x128xbf16>
    %c23 = arith.constant 23 : index
    %c0_93 = arith.constant 0 : index
    %c0_94 = arith.constant 0 : index
    %119 = vector.load %arg4[%c23, %c0_93, %c0_94] : memref<25x128x128xbf16, #tpu.memory_space<vmem>>, vector<1x128x128xbf16>
    %120 = vector.shape_cast %119 : vector<1x128x128xbf16> to vector<128x128xbf16>
    %cst_95 = arith.constant dense<0.000000e+00> : vector<64x128xf32>
    %121 = tpu.matmul %118, %120, %cst_95 {dimension_numbers = #tpu.dot_dimension_numbers<[1], [0], [0], [1], [0, 0, 1, 1], [], []>} : vector<64x128xbf16>, vector<128x128xbf16>, vector<64x128xf32> -> vector<64x128xf32>
    %122 = arith.addf %116, %121 : vector<64x128xf32>
    %c0_96 = arith.constant 0 : index
    %c0_97 = arith.constant 0 : index
    %c3_98 = arith.constant 3 : index
    %c0_99 = arith.constant 0 : index
    %c1_100 = arith.constant 1 : index
    %c0_101 = arith.constant 0 : index
    %123 = vector.load %arg3[%c0_96, %c0_97, %c3_98, %c0_99, %c1_100, %c0_101] : memref<1x1x4x10x10x128xbf16, #tpu.memory_space<vmem>>, vector<1x1x1x10x8x128xbf16>
    %124 = vector.shape_cast %123 : vector<1x1x1x10x8x128xbf16> to vector<10x8x128xbf16>
    %125 = vector.extract_strided_slice %124 {offsets = [0, 0, 0], sizes = [8, 8, 128], strides = [1, 1, 1]} : vector<10x8x128xbf16> to vector<8x8x128xbf16>
    %126 = vector.shape_cast %125 : vector<8x8x128xbf16> to vector<64x128xbf16>
    %c8 = arith.constant 8 : index
    %c0_102 = arith.constant 0 : index
    %c0_103 = arith.constant 0 : index
    %127 = vector.load %arg4[%c8, %c0_102, %c0_103] : memref<25x128x128xbf16, #tpu.memory_space<vmem>>, vector<1x128x128xbf16>
    %128 = vector.shape_cast %127 : vector<1x128x128xbf16> to vector<128x128xbf16>
    %cst_104 = arith.constant dense<0.000000e+00> : vector<64x128xf32>
    %129 = tpu.matmul %126, %128, %cst_104 {dimension_numbers = #tpu.dot_dimension_numbers<[1], [0], [0], [1], [0, 0, 1, 1], [], []>} : vector<64x128xbf16>, vector<128x128xbf16>, vector<64x128xf32> -> vector<64x128xf32>
    %130 = arith.addf %122, %129 : vector<64x128xf32>
    %131 = vector.extract_strided_slice %124 {offsets = [1, 0, 0], sizes = [8, 8, 128], strides = [1, 1, 1]} : vector<10x8x128xbf16> to vector<8x8x128xbf16>
    %132 = vector.shape_cast %131 : vector<8x8x128xbf16> to vector<64x128xbf16>
    %c18 = arith.constant 18 : index
    %c0_105 = arith.constant 0 : index
    %c0_106 = arith.constant 0 : index
    %133 = vector.load %arg4[%c18, %c0_105, %c0_106] : memref<25x128x128xbf16, #tpu.memory_space<vmem>>, vector<1x128x128xbf16>
    %134 = vector.shape_cast %133 : vector<1x128x128xbf16> to vector<128x128xbf16>
    %cst_107 = arith.constant dense<0.000000e+00> : vector<64x128xf32>
    %135 = tpu.matmul %132, %134, %cst_107 {dimension_numbers = #tpu.dot_dimension_numbers<[1], [0], [0], [1], [0, 0, 1, 1], [], []>} : vector<64x128xbf16>, vector<128x128xbf16>, vector<64x128xf32> -> vector<64x128xf32>
    %136 = arith.addf %130, %135 : vector<64x128xf32>
    %c0_108 = arith.constant 0 : index
    %c0_109 = arith.constant 0 : index
    %c0_110 = arith.constant 0 : index
    %c0_111 = arith.constant 0 : index
    %c2_112 = arith.constant 2 : index
    %c0_113 = arith.constant 0 : index
    %137 = vector.load %arg3[%c0_108, %c0_109, %c0_110, %c0_111, %c2_112, %c0_113] : memref<1x1x4x10x10x128xbf16, #tpu.memory_space<vmem>>, vector<1x1x1x10x8x128xbf16>
    %138 = vector.shape_cast %137 : vector<1x1x1x10x8x128xbf16> to vector<10x8x128xbf16>
    %139 = vector.extract_strided_slice %138 {offsets = [0, 0, 0], sizes = [8, 8, 128], strides = [1, 1, 1]} : vector<10x8x128xbf16> to vector<8x8x128xbf16>
    %140 = vector.shape_cast %139 : vector<8x8x128xbf16> to vector<64x128xbf16>
    %c4 = arith.constant 4 : index
    %c0_114 = arith.constant 0 : index
    %c0_115 = arith.constant 0 : index
    %141 = vector.load %arg4[%c4, %c0_114, %c0_115] : memref<25x128x128xbf16, #tpu.memory_space<vmem>>, vector<1x128x128xbf16>
    %142 = vector.shape_cast %141 : vector<1x128x128xbf16> to vector<128x128xbf16>
    %cst_116 = arith.constant dense<0.000000e+00> : vector<64x128xf32>
    %143 = tpu.matmul %140, %142, %cst_116 {dimension_numbers = #tpu.dot_dimension_numbers<[1], [0], [0], [1], [0, 0, 1, 1], [], []>} : vector<64x128xbf16>, vector<128x128xbf16>, vector<64x128xf32> -> vector<64x128xf32>
    %144 = arith.addf %136, %143 : vector<64x128xf32>
    %145 = vector.extract_strided_slice %138 {offsets = [1, 0, 0], sizes = [8, 8, 128], strides = [1, 1, 1]} : vector<10x8x128xbf16> to vector<8x8x128xbf16>
    %146 = vector.shape_cast %145 : vector<8x8x128xbf16> to vector<64x128xbf16>
    %c14 = arith.constant 14 : index
    %c0_117 = arith.constant 0 : index
    %c0_118 = arith.constant 0 : index
    %147 = vector.load %arg4[%c14, %c0_117, %c0_118] : memref<25x128x128xbf16, #tpu.memory_space<vmem>>, vector<1x128x128xbf16>
    %148 = vector.shape_cast %147 : vector<1x128x128xbf16> to vector<128x128xbf16>
    %cst_119 = arith.constant dense<0.000000e+00> : vector<64x128xf32>
    %149 = tpu.matmul %146, %148, %cst_119 {dimension_numbers = #tpu.dot_dimension_numbers<[1], [0], [0], [1], [0, 0, 1, 1], [], []>} : vector<64x128xbf16>, vector<128x128xbf16>, vector<64x128xf32> -> vector<64x128xf32>
    %150 = arith.addf %144, %149 : vector<64x128xf32>
    %151 = vector.extract_strided_slice %138 {offsets = [2, 0, 0], sizes = [8, 8, 128], strides = [1, 1, 1]} : vector<10x8x128xbf16> to vector<8x8x128xbf16>
    %152 = vector.shape_cast %151 : vector<8x8x128xbf16> to vector<64x128xbf16>
    %c24 = arith.constant 24 : index
    %c0_120 = arith.constant 0 : index
    %c0_121 = arith.constant 0 : index
    %153 = vector.load %arg4[%c24, %c0_120, %c0_121] : memref<25x128x128xbf16, #tpu.memory_space<vmem>>, vector<1x128x128xbf16>
    %154 = vector.shape_cast %153 : vector<1x128x128xbf16> to vector<128x128xbf16>
    %cst_122 = arith.constant dense<0.000000e+00> : vector<64x128xf32>
    %155 = tpu.matmul %152, %154, %cst_122 {dimension_numbers = #tpu.dot_dimension_numbers<[1], [0], [0], [1], [0, 0, 1, 1], [], []>} : vector<64x128xbf16>, vector<128x128xbf16>, vector<64x128xf32> -> vector<64x128xf32>
    %156 = arith.addf %150, %155 : vector<64x128xf32>
    %c0_123 = arith.constant 0 : index
    %c0_124 = arith.constant 0 : index
    %c2_125 = arith.constant 2 : index
    %c0_126 = arith.constant 0 : index
    %c2_127 = arith.constant 2 : index
    %c0_128 = arith.constant 0 : index
    %157 = vector.load %arg3[%c0_123, %c0_124, %c2_125, %c0_126, %c2_127, %c0_128] : memref<1x1x4x10x10x128xbf16, #tpu.memory_space<vmem>>, vector<1x1x1x10x8x128xbf16>
    %158 = vector.shape_cast %157 : vector<1x1x1x10x8x128xbf16> to vector<10x8x128xbf16>
    %159 = vector.extract_strided_slice %158 {offsets = [0, 0, 0], sizes = [8, 8, 128], strides = [1, 1, 1]} : vector<10x8x128xbf16> to vector<8x8x128xbf16>
    %160 = vector.shape_cast %159 : vector<8x8x128xbf16> to vector<64x128xbf16>
    %c9 = arith.constant 9 : index
    %c0_129 = arith.constant 0 : index
    %c0_130 = arith.constant 0 : index
    %161 = vector.load %arg4[%c9, %c0_129, %c0_130] : memref<25x128x128xbf16, #tpu.memory_space<vmem>>, vector<1x128x128xbf16>
    %162 = vector.shape_cast %161 : vector<1x128x128xbf16> to vector<128x128xbf16>
    %cst_131 = arith.constant dense<0.000000e+00> : vector<64x128xf32>
    %163 = tpu.matmul %160, %162, %cst_131 {dimension_numbers = #tpu.dot_dimension_numbers<[1], [0], [0], [1], [0, 0, 1, 1], [], []>} : vector<64x128xbf16>, vector<128x128xbf16>, vector<64x128xf32> -> vector<64x128xf32>
    %164 = arith.addf %156, %163 : vector<64x128xf32>
    %165 = vector.extract_strided_slice %158 {offsets = [1, 0, 0], sizes = [8, 8, 128], strides = [1, 1, 1]} : vector<10x8x128xbf16> to vector<8x8x128xbf16>
    %166 = vector.shape_cast %165 : vector<8x8x128xbf16> to vector<64x128xbf16>
    %c19 = arith.constant 19 : index
    %c0_132 = arith.constant 0 : index
    %c0_133 = arith.constant 0 : index
    %167 = vector.load %arg4[%c19, %c0_132, %c0_133] : memref<25x128x128xbf16, #tpu.memory_space<vmem>>, vector<1x128x128xbf16>
    %168 = vector.shape_cast %167 : vector<1x128x128xbf16> to vector<128x128xbf16>
    %cst_134 = arith.constant dense<0.000000e+00> : vector<64x128xf32>
    %169 = tpu.matmul %166, %168, %cst_134 {dimension_numbers = #tpu.dot_dimension_numbers<[1], [0], [0], [1], [0, 0, 1, 1], [], []>} : vector<64x128xbf16>, vector<128x128xbf16>, vector<64x128xf32> -> vector<64x128xf32>
    %170 = arith.addf %164, %169 : vector<64x128xf32>
    %c0_135 = arith.constant 0 : index
    %c0_136 = arith.constant 0 : index
    %171 = vector.load %arg5[%c0_135, %c0_136] : memref<1x128xf32, #tpu.memory_space<vmem>>, vector<1x128xf32>
    %172 = vector.broadcast %171 : vector<1x128xf32> to vector<64x128xf32>
    %173 = arith.addf %170, %172 : vector<64x128xf32>
    %174 = vector.shape_cast %173 : vector<64x128xf32> to vector<8x8x128xf32>
    %175 = arith.truncf %174 : vector<8x8x128xf32> to vector<8x8x128xbf16>
    %c0_137 = arith.constant 0 : index
    %c0_138 = arith.constant 0 : index
    %c0_139 = arith.constant 0 : index
    %c0_140 = arith.constant 0 : index
    %176 = vector.load %arg6[%c0_137, %c0_138, %c0_139, %c0_140] : memref<1x8x8x128xbf16, #tpu.memory_space<vmem>>, vector<1x8x8x128xbf16>
    %177 = vector.shape_cast %176 : vector<1x8x8x128xbf16> to vector<8x8x128xbf16>
    %178 = vector.shape_cast %175 : vector<8x8x128xbf16> to vector<1x8x8x128xbf16>
    tpu.vector_store %arg6[%c0_137, %c0_138, %c0_139, %c0_140], %178 {strides = array<i32>} : memref<1x8x8x128xbf16, #tpu.memory_space<vmem>>, vector<1x8x8x128xbf16>,
    return
  }
  func.func @transform_0(%arg0: i32, %arg1: i32, %arg2: i32) -> (i32, i32, i32, i32, i32, i32) {
    %c0_i32 = arith.constant 0 : i32
    %c0_i32_0 = arith.constant 0 : i32
    %c0_i32_1 = arith.constant 0 : i32
    %c0_i32_2 = arith.constant 0 : i32
    %c0_i32_3 = arith.constant 0 : i32
    return %arg1, %arg2, %c0_i32, %c0_i32_0, %c0_i32_1, %c0_i32_2 : i32, i32, i32, i32, i32, i32
  }
  func.func @transform_1(%arg0: i32, %arg1: i32, %arg2: i32) -> (i32, i32, i32) {
    %c0_i32 = arith.constant 0 : i32
    %c0_i32_0 = arith.constant 0 : i32
    %c0_i32_1 = arith.constant 0 : i32
    return %c0_i32, %c0_i32_0, %arg0 : i32, i32, i32
  }
  func.func @transform_2(%arg0: i32, %arg1: i32, %arg2: i32) -> (i32, i32) {
    %c0_i32 = arith.constant 0 : i32
    %c0_i32_0 = arith.constant 0 : i32
    return %c0_i32, %arg0 : i32, i32
  }
  func.func @transform_3(%arg0: i32, %arg1: i32, %arg2: i32) -> (i32, i32, i32, i32) {
    %c0_i32 = arith.constant 0 : i32
    %c0_i32_0 = arith.constant 0 : i32
    return %arg1, %arg2, %c0_i32, %arg0 : i32, i32, i32, i32
  }
}

</mosaic_0001>

<bundles_post_ra>
// kernel: tpu_custom_call.1
= control target key start
LH: loop header
LB: loop body
LE: loop exit
PB: predicated region body
PF: predicated region fallthrough
CT: control target
= control target key end

     0   :  { %8 = vsyncpa [#allocation3], 0  ;;  %s6495_s0 = inlined_call_operand.vmem [shape: bf16[2,1,4,10,10,128], index: 0, kind: input, shape index: {}]   ;;  %s6496_s1 = inlined_call_operand.hbm [shape: bf16[25,128,128], index: 1, kind: input, shape index: {}]   ;;  %s6497_s2 = inlined_call_operand.vmem [shape: f32[1,128], index: 2, kind: input, shape index: {}]   ;;  %s6498_s3 = inlined_call_operand.hbm [shape: bf16[2,8,8,128], index: 3, kind: output, shape index: {}]  }
   0x1   :  { %9 = vsyncpa [#allocation4], 0 }
   0x2   :  { %11 = vsyncpa [#allocation4 + $0x1], 0  ;;  %s5425_s12 = smov 0   ;;  %s5427_s13 = smov 0  }
   0x3   :  { %s5429_s14 = smov 0   ;;  %s5431_s15 = smov 0  }
   0x4   :  { %s5433_s16 = smov 0   ;;  %s5435_s17 = smov 0  }
   0x5 LB: > { %s4028_s18 = sadd.s32 4294967295, %s5398_s17   ;;  %s4029_s19 = sadd.s32 4294967294, %s5398_s17   ;;  %s5398_s17 = sphi %s5435_s17, %s17_s17   ;;  %s5394_s16 = sphi %s5433_s16, %s6509_s16   ;;  %s5390_s15 = sphi %s5431_s15, %s6508_s15   ;;  %s5386_s14 = sphi %s5429_s14, %s6507_s14   ;;  %s5382_s13 = sphi %s5427_s13, %s6506_s13   ;;  %s5378_s12 = sphi %s5425_s12, %s6505_s12  }
   0x6   : > { %s32_s20 = sadd.s32 1, %s5394_s16  ;;  %s127_s21 = sadd.s32 1, %s5386_s14 }
   0x7   : > { %p34_p0 = scmp.ge.s32.totalorder %s32_s20, 2  ;;  %p137_p1 = scmp.ne.s32.totalorder %s5386_s14, %s5382_s13 }
   0x8   : > { %p138_p2 = scmp.eq.s32.totalorder %s4028_s18, 1  ;;  %p143_p3 = scmp.ne.s32.totalorder %s5382_s13, %s5378_s12 }
   0x9   : > { %s6511_s20 = smov (%p34_p0, %s32_s20), 0  ;;  %p144_p5 = scmp.eq.s32.totalorder %s4029_s19, 1 }
   0xa   : > { %p5465_p4 = por %p138_p2, %p137_p1  ;;  %s120_s23 = ssub.s32 %s5394_s16, %s6511_s20 }
   0xb   : > { %p4030_p6 = scmp.ge.s32.totalorder %s5398_s17, 1  ;;  %p125_p7 = scmp.eq.s32.totalorder %s120_s23, 0 }
   0xc   : > { %p5472_p8 = por %p144_p5, %p143_p3  ;;  %p151_p9 = scmp.lt.s32.totalorder %s5398_s17, 3 }
   0xd   : > { %s5478_s25 = scalar_select %p125_p7, %s5386_s14, %s127_s21  }
   0xe   : > { %p152_p10 = pnand %p4030_p6, %p151_p9  ;;  %p5210_p11 = scmp.eq.s32.totalorder %s4028_s18, 0 }
   0xf   : > { %s164_s28 = sshll.u32 %s6496_s1, 4  ;;  %s5400_s29 = smov [#allocation2]   ;;  %s165_s28 = int_to_ptr.hbm [resolvable:$true] %s164_s28 }
  0x10   : > { %p5202_p12 = pneg %p152_p10  ;;  %s166_s30 = sshll.u32 %s5400_s29, 4  ;;  %s167_s30 = int_to_ptr.vmem [resolvable:$true] %s166_s30 }
  0x11   : > { %s5401_s4 = smov 64   ;;  %s5402_s5 = smov 4  }
  0x12   : > { %p5203_p13 = pnand %p5210_p11, %p5202_p12  ;;  %200 = sbr.rel (%p152_p10) target bundleno = 606 (0x25e), region = 32 }
  0x14   : > { %5205 = dma.hbm_to_vmem [thread:$0]  (!%p5203_p13), %s165_s28, 25600, %s167_s30, [#allocation3], %s5401_s4, %s5401_s4, %s5402_s5  }
  0x17   : > { %5369 = dma.done.wait (%p5210_p11), [#allocation3], 25600  }
  0x18   : > { %5371 = vsyncadd (%p5210_p11), [#allocation3], 4294941696  ;;  %v4970_v0 = vld [vmem:[#allocation2 + $0x2b8] sm:$0xff]  ;;  %v4969_v2 = vld [vmem:[#allocation2 + $0x2b0] sm:$0xff]  ;;  %p232_p0 = scmp.lt.s32.totalorder %s5390_s15, 1  ;;  %vm3196_vm3 = vcmask 1042432  }
  0x19   : > { %v4978_v1 = vld [vmem:[#allocation2 + $0x538] sm:$0xff]  ;;  %5179 = vmatpush.bf16.msra.mxu1 %v4970_v0  ;;  %360 = vmatpush.bf16.msra.mxu0 %v4970_v0  ;;  %v4977_v3 = vld [vmem:[#allocation2 + $0x530] sm:$0xff]  ;;  %v4968_v6 = vld [vmem:[#allocation2 + $0x2a8] sm:$0xff]  ;;  %vm1453_vm0 = vsmask.f32 3328  ;;  %vm3197_vm4 = vcmask 1046532  }
  0x1a   : > { %545 = vmatpush.bf16.msra.mxu2 %v4978_v1  ;;  %v4986_v4 = vld [vmem:[#allocation2 + $0x178] sm:$0xff]  ;;  %v4985_v5 = vld [vmem:[#allocation2 + $0x170] sm:$0xff]  ;;  %v4976_v7 = vld [vmem:[#allocation2 + $0x528] sm:$0xff]  ;;  %s233_s6 = scalar_select %p232_p0, %s5390_s15, 1  ;;  %vm1454_vm1 = vsmask.f32 7440 }
  0x1b   : > { %681 = vmatpush.bf16.msra.mxu3 %v4986_v4  ;;  %v4984_v8 = vld [vmem:[#allocation2 + $0x168] sm:$0xff]  ;;  %v4967_v9 = vld [vmem:[#allocation2 + $0x2a0] sm:$0xff]  ;;  %v4966_v12 = vld [vmem:[#allocation2 + $0x298] sm:$0xff]  ;;  %s229_s11 = sand.u32 1, %s5382_s13   ;;  %s5155_s26 = sshll.u32 %s5390_s15, 5 }
  0x1c   : > { %v4975_v10 = vld [vmem:[#allocation2 + $0x520] sm:$0xff]  ;;  %s5195_s7 = smul.u32 320, %s233_s6  ;;  %v4974_v13 = vld [vmem:[#allocation2 + $0x518] sm:$0xff]  ;;  %v4965_v15 = vld [vmem:[#allocation2 + $0x290] sm:$0xff]  ;;  %s4036_s21 = sshll.u32 %s229_s11, 5 }
  0x1d   : > { %5180 = vmatpush.bf16.msra.mxu1 %v4969_v2  ;;  %361 = vmatpush.bf16.msra.mxu0 %v4969_v2  ;;  %v4983_v11 = vld [vmem:[#allocation2 + $0x160] sm:$0xff]  ;;  %v4982_v14 = vld [vmem:[#allocation2 + $0x158] sm:$0xff]  ;;  %v4973_v16 = vld [vmem:[#allocation2 + $0x510] sm:$0xff]  ;;  %s6435_s23 = scalar_lea.vmem [#allocation5], %s4036_s21  ;;  %s3912_s29 = scalar_lea.hbm %s6498_s3, %s5155_s26 }
  0x1e   : > { %546 = vmatpush.bf16.msra.mxu2 %v4977_v3  ;;  %s5488_s10 = scalar_lea.vmem %s6495_s0, %s5195_s7  ;;  %v4964_v17 = vld [vmem:[#allocation2 + $0x288] sm:$0xff]  ;;  %v4981_v19 = vld [vmem:[#allocation2 + $0x150] sm:$0xff]  ;;  %v4963_v30 = vld [vmem:[#allocation2 + $0x280] sm:$0xff]  ;;  %s3913_s30 = sshll.u32 %s6435_s23, 4  ;;  %s3914_s30 = int_to_ptr.vmem [resolvable:$true] %s3913_s30 }
  0x1f   : > { %682 = vmatpush.bf16.msra.mxu3 %v4985_v5  ;;  %v5491_v18 = vld [vmem:[%s5488_s10 + $0x28] sm:$0xf]  ;;  %v5494_v20 = vld [vmem:[%s5488_s10 + $0x30] sm:$0xf]  ;;  %v5501_v24 = vld [vmem:[%s5488_s10 + $0x18] sm:$0xf] }
  0x20   : > { %v5497_v21 = vld [vmem:[%s5488_s10 + $0x8] sm:$0xf]  ;;  %v247_v22 = vld [vmem:[%s5488_s10 + $0x10] sm:$0xf]  ;;  %v300_v25 = vunpack.c.l.b16 %v5491_v18  ;;  %v301_v26 = vunpack.c.l.b16 %v5494_v20  ;;  %v298_v31 = vunpack.c.l.b16 %v5501_v24  ;;  %v4134_v32 = vld [vmem:[%s5488_s10 + $0xa0] sm:$0xf] }
  0x21   : > { %5181 = vmatpush.bf16.msra.mxu1 %v4968_v6  ;;  %362 = vmatpush.bf16.msra.mxu0 %v4968_v6  ;;  %v4972_v23 = vld [vmem:[#allocation2 + $0x508] sm:$0xff]  ;;  %v296_v27 = vunpack.c.l.b16 %v5497_v21  ;;  %v297_v28 = vunpack.c.l.b16 %v247_v22  ;;  %v4962_v34 = vld [vmem:[#allocation2 + $0x38] sm:$0xff]  ;;  %v4971_v35 = vld [vmem:[#allocation2 + $0x500] sm:$0xff]  ;;  %v617_v40 = vunpack.c.l.b16 %v4134_v32  ;;  %s3915_s4 = sshll.u32 %s3912_s29, 4  ;;  %s3898_s15 = scalar_lea.sflag [#allocation4], %s229_s11  ;;  %s3916_s4 = int_to_ptr.hbm [resolvable:$true] %s3915_s4 }
  0x22   : > { %547 = vmatpush.bf16.msra.mxu2 %v4976_v7  ;;  %v4980_v29 = vld [vmem:[#allocation2 + $0x148] sm:$0xff]  ;;  %v4994_v36 = vld [vmem:[#allocation2 + $0x3f8] sm:$0xff]  ;;  %v306_v38 = vpack.c.b16 %v301_v26, %v300_v25  ;;  %v4979_v43 = vld [vmem:[#allocation2 + $0x140] sm:$0xff]  ;;  %s5330_s5 = sshra.s32 %s3916_s4, 4  ;;  %s5336_s9 = scalar_lea.hbm %s6498_s3, 64  ;;  %s5331_s5 = int_to_ptr.hbm [resolvable:$true] %s5330_s5 }
  0x23   : > { %683 = vmatpush.bf16.msra.mxu3 %v4984_v8  ;;  %v5509_v33 = vld [vmem:[%s5488_s10 + $0xa8] sm:$0xf]  ;;  %v5010_v37 = vld [vmem:[#allocation2 + $0x2f8] sm:$0xff]  ;;  %v304_v39 = vpack.c.b16 %v297_v28, %v296_v27  ;;  %v5518_v42 = vpack.c.b16 %v298_v31, %v297_v28  ;;  %v4961_v44 = vld [vmem:[#allocation2 + $0x30] sm:$0xff]  ;;  %s5332_s6 = scalar_lea.hbm %s5331_s5, 32  ;;  %p5337_p5 = scmp.lt.s32.totalorder %s5331_s5, %s6498_s3 }
  0x24   : > { %v618_v41 = vunpack.c.l.b16 %v5509_v33  ;;  %v5018_v45 = vld [vmem:[#allocation2 + $0x578] sm:$0xff]  ;;  %v4993_v46 = vld [vmem:[#allocation2 + $0x3f0] sm:$0xff]  ;;  %v4960_v49 = vld [vmem:[#allocation2 + $0x28] sm:$0xff]  ;;  %p5333_p1 = scmp.ne.s32.totalorder %s5331_s5, %s5332_s6  ;;  %p5338_p6 = scmp.lt.s32.totalorder %s5336_s9, %s5332_s6 }
  0x25   : > { %5182 = vmatpush.bf16.msra.mxu1 %v4967_v9  ;;  %363 = vmatpush.bf16.msra.mxu0 %v4967_v9  ;;  %v5009_v47 = vld [vmem:[#allocation2 + $0x2f0] sm:$0xff]  ;;  %v4992_v51 = vld [vmem:[#allocation2 + $0x3e8] sm:$0xff]  ;;  %v5524_v53 = vld [vmem:[%s5488_s10 + $0x38] sm:$0xf] }
  0x26   : > { %548 = vmatpush.bf16.msra.mxu2 %v4975_v10  ;;  %v625_v48 = vpack.c.b16 %v618_v41, %v617_v40  ;;  %v5017_v50 = vld [vmem:[#allocation2 + $0x570] sm:$0xff]  ;;  %v5008_v52 = vld [vmem:[#allocation2 + $0x2e8] sm:$0xff]  ;;  %v5527_v54 = vld [vmem:[%s5488_s10 + $0x40] sm:$0xf]  ;;  %v302_v60 = vunpack.c.l.b16 %v5524_v53  ;;  %p5334_p2 = pnand %p5333_p1, %p5465_p4  ;;  %p5339_p7 = por %p5338_p6, %p5337_p5 }
  0x27   : > { %684 = vmatpush.bf16.msra.mxu3 %v4983_v11  ;;  %v249_v55 = vld [vmem:[%s5488_s10 + $0x20] sm:$0xf]  ;;  %v5016_v57 = vld [vmem:[#allocation2 + $0x568] sm:$0xff]  ;;  %v303_v61 = vunpack.c.l.b16 %v5527_v54  ;;  %v4136_v63 = vld [vmem:[%s5488_s10 + $0xb0] sm:$0xf] }
  0x28   : > { %v4959_v56 = vld [vmem:[#allocation2 + $0x20] sm:$0xff]  ;;  %v299_v62 = vunpack.c.l.b16 %v249_v55  ;;  %v5534_v0 = vld [vmem:[%s5488_s10 + $0xb8] sm:$0xf]  ;;  %v619_v5 = vunpack.c.l.b16 %v4136_v63  ;;  %v4957_v8 = vld [vmem:[#allocation2 + $0x10] sm:$0xff]  ;;  %p5335_p3 = pneg %p5334_p2 }
  0x29   : > { %5183 = vmatpush.bf16.msra.mxu1 %v4966_v12  ;;  %364 = vmatpush.bf16.msra.mxu0 %v4966_v12  ;;  %v4991_v58 = vld [vmem:[#allocation2 + $0x3e0] sm:$0xff]  ;;  %v4958_v1 = vld [vmem:[#allocation2 + $0x18] sm:$0xff]  ;;  %v307_v3 = vpack.c.b16 %v303_v61, %v302_v60  ;;  %v620_v6 = vunpack.c.l.b16 %v5534_v0  ;;  %v4989_v9 = vld [vmem:[#allocation2 + $0x3d0] sm:$0xff] }
  0x2a   : > { %549 = vmatpush.bf16.msra.mxu2 %v4974_v13  ;;  %v5007_v59 = vld [vmem:[#allocation2 + $0x2e0] sm:$0xff]  ;;  %v4990_v2 = vld [vmem:[#allocation2 + $0x3d8] sm:$0xff]  ;;  %v305_v4 = vpack.c.b16 %v299_v62, %v298_v31  ;;  %v5541_v7 = vpack.c.b16 %v300_v25, %v299_v62  ;;  %v4956_v13 = vld [vmem:[#allocation2 + $0x8] sm:$0xff]  ;;  %v737_v31 = vpack.c.b16 %v619_v5, %v618_v41  ;;  %p5340_p9 = pnand %p5339_p7, %p5335_p3 }
  0x2b   : > { %685 = vmatpush.bf16.msra.mxu3 %v4982_v14  ;;  %v626_v10 = vpack.c.b16 %v620_v6, %v619_v5  ;;  %v5006_v11 = vld [vmem:[#allocation2 + $0x2d8] sm:$0xff]  ;;  %v5015_v12 = vld [vmem:[#allocation2 + $0x560] sm:$0xff]  ;;  %v5005_v14 = vld [vmem:[#allocation2 + $0x2d0] sm:$0xff] }
  0x2c   : > { %v4955_v18 = vld [vmem:[#allocation2] sm:$0xff]  ;;  %v5026_v24 = vld [vmem:[#allocation2 + $0x1b8] sm:$0xff]  ;;  %v5549_v28 = vld [vmem:[%s5488_s10 + $0xc8] sm:$0xf] }
  0x2d   : > { %5184 = vmatpush.bf16.msra.mxu1 %v4965_v15  ;;  %365 = vmatpush.bf16.msra.mxu0 %v4965_v15  ;;  %v4988_v15 = vld [vmem:[#allocation2 + $0x3c8] sm:$0xff]  ;;  %v4987_v22 = vld [vmem:[#allocation2 + $0x3c0] sm:$0xff]  ;;  %v5042_v55 = vld [vmem:[#allocation2 + $0xb8] sm:$0xff] }
  0x2e   : > { %550 = vmatpush.bf16.msra.mxu2 %v4973_v16  ;;  %v5014_v16 = vld [vmem:[#allocation2 + $0x558] sm:$0xff]  ;;  %v4138_v25 = vld [vmem:[%s5488_s10 + $0xc0] sm:$0xf]  ;;  %v5024_v33 = vld [vmem:[#allocation2 + $0x1a8] sm:$0xff] }
  0x2f   : > { %686 = vmatpush.bf16.msra.mxu3 %v4981_v19  ;;  %v5002_v19 = vld [vmem:[#allocation2 + $0x78] sm:$0xff]  ;;  %v621_v32 = vunpack.c.l.b16 %v4138_v25  ;;  %v5003_v20 = vld [vmem:[#allocation2 + $0x2c0] sm:$0xff]  ;;  %v254_v41 = vld [vmem:[%s5488_s10 + $0x48] sm:$0xf] }
  0x30   : > { %v5023_v40 = vld [vmem:[#allocation2 + $0x1a0] sm:$0xff]  ;;  %v4996_v53 = vld [vmem:[#allocation2 + $0x48] sm:$0xff]  ;;  %v5038_v25 = vld [vmem:[#allocation2 + $0x98] sm:$0xff] }
  0x31   : > { %5185 = vmatpush.bf16.msra.mxu1 %v4964_v17  ;;  %366 = vmatpush.bf16.msra.mxu0 %v4964_v17  ;;  %v245_v17 = vld [vmem:[%s5488_s10] sm:$0xf]  ;;  %v5020_v62 = vld [vmem:[#allocation2 + $0x188] sm:$0xff]  ;;  %vm5628_vm2 = vmor %vm1453_vm0, %vm1454_vm1 }
  0x32   : > { %551 = vmatpush.bf16.msra.mxu2 %v4972_v23  ;;  %v390_v23 = vunpack.c.l.b16 %v245_v17  ;;  %v4995_v54 = vld [vmem:[#allocation2 + $0x40] sm:$0xff]  ;;  %v4212_v17 = vld [vmem:[%s5488_s10 + $0x78] sm:$0xf]  ;;  %vm6058_vm5 = vmor %vm3196_vm3, %vm3197_vm4 }
  0x33   : > { %687 = vmatpush.bf16.msra.mxu3 %v4980_v29  ;;  %v5001_v29 = vld [vmem:[#allocation2 + $0x70] sm:$0xff] }
  0x35   : > { %5186 = vmatpush.bf16.msra.mxu1 %v4963_v30  ;;  %367 = vmatpush.bf16.msra.mxu0 %v4963_v30  ;;  %v391_v30 = vpack.c.b16 %v296_v27, %v390_v23  ;;  %v5013_v27 = vld [vmem:[#allocation2 + $0x550] sm:$0xff] }
  0x36   : > { %552 = vmatpush.bf16.msra.mxu2 %v4971_v35  ;;  %v5558_v35 = vpack.c.b16 %v302_v60, %v301_v26  ;;  %v4999_v26 = vld [vmem:[#allocation2 + $0x60] sm:$0xff]  ;;  %v5050_v60 = vld [vmem:[#allocation2 + $0x338] sm:$0xff] }
  0x37   : > { %688 = vmatpush.bf16.msra.mxu3 %v4979_v43  ;;  %v4998_v43 = vld [vmem:[#allocation2 + $0x58] sm:$0xff] }
  0x38   : > { %378 = vmatmul.bf16.vlgmr.msra.gmra.mxu1 %v306_v38  ;;  %368 = vmatmul.bf16.vlgmr.msra.gmra.mxu0 %v304_v39  ;;  %v5004_v38 = vld [vmem:[#allocation2 + $0x2c8] sm:$0xff] }
  0x39   : > { %447 = vmatpush.bf16.msrb.mxu1 %v4962_v34  ;;  %793 = vmatpush.bf16.msrb.mxu0 %v4994_v36  ;;  %v622_v34 = vunpack.c.l.b16 %v5549_v28  ;;  %v5025_v36 = vld [vmem:[#allocation2 + $0x1b0] sm:$0xff]  ;;  %v5012_v39 = vld [vmem:[#allocation2 + $0x548] sm:$0xff]  ;;  %v5047_v28 = vld [vmem:[#allocation2 + $0x320] sm:$0xff] }
  0x3a   : > { %1042 = vmatpush.bf16.msrb.mxu2 %v5010_v37  ;;  %689 = vmatmul.bf16.vlgmr.msra.gmra.mxu3 %v625_v48  ;;  %v5000_v37 = vld [vmem:[#allocation2 + $0x68] sm:$0xff]  ;;  %v738_v48 = vpack.c.b16 %v621_v32, %v620_v6  ;;  %v5034_v6 = vld [vmem:[#allocation2 + $0x438] sm:$0xff] }
  0x3b   : > { %553 = vmatmul.bf16.vlgmr.msra.gmra.mxu2 %v5518_v42  ;;  %1148 = vmatpush.bf16.msrb.mxu3 %v5018_v45  ;;  %v627_v21 = vpack.c.b16 %v622_v34, %v621_v32  ;;  %v4140_v45 = vld [vmem:[%s5488_s10 + $0xd0] sm:$0xf] }
  0x3c   : > { %v4207_v32 = vld [vmem:[%s5488_s10 + $0x50] sm:$0xf] }
  0x3d   : > { %448 = vmatpush.bf16.msrb.mxu1 %v4961_v44  ;;  %794 = vmatpush.bf16.msrb.mxu0 %v4993_v46  ;;  %v494_v44 = vunpack.c.l.b16 %v254_v41  ;;  %v5566_v46 = vld [vmem:[%s5488_s10 + $0xd8] sm:$0xf] }
  0x3e   : > { %1043 = vmatpush.bf16.msrb.mxu2 %v5009_v47  ;;  %v4997_v47 = vld [vmem:[#allocation2 + $0x50] sm:$0xff]  ;;  %v5046_v41 = vld [vmem:[#allocation2 + $0x318] sm:$0xff] }
  0x3f   : > { %1149 = vmatpush.bf16.msrb.mxu3 %v5017_v50  ;;  %v624_v50 = vunpack.c.l.b16 %v5566_v46  ;;  %v5030_v46 = vld [vmem:[#allocation2 + $0x418] sm:$0xff] }
  0x41   : > { %449 = vmatpush.bf16.msrb.mxu1 %v4960_v49  ;;  %795 = vmatpush.bf16.msrb.mxu0 %v4992_v51  ;;  %v623_v49 = vunpack.c.l.b16 %v4140_v45  ;;  %v495_v51 = vpack.c.b16 %v494_v44, %v303_v61  ;;  %v4209_v61 = vld [vmem:[%s5488_s10 + $0x60] sm:$0xf]  ;;  %v5036_v44 = vld [vmem:[#allocation2 + $0x88] sm:$0xff] }
  0x42   : > { %1044 = vmatpush.bf16.msrb.mxu2 %v5008_v52  ;;  %v868_v0 = vunpack.c.l.b16 %v4209_v61 }
  0x43   : > { %1150 = vmatpush.bf16.msrb.mxu3 %v5016_v57  ;;  %v628_v52 = vpack.c.b16 %v624_v50, %v623_v49  ;;  %v5022_v57 = vld [vmem:[#allocation2 + $0x198] sm:$0xff] }
  0x45   : > { %450 = vmatpush.bf16.msrb.mxu1 %v4959_v56  ;;  %796 = vmatpush.bf16.msrb.mxu0 %v4991_v58  ;;  %v5011_v56 = vld [vmem:[#allocation2 + $0x540] sm:$0xff]  ;;  %v5041_v58 = vld [vmem:[#allocation2 + $0xb0] sm:$0xff] }
  0x46   : > { %1045 = vmatpush.bf16.msrb.mxu2 %v5007_v59  ;;  %v5021_v59 = vld [vmem:[#allocation2 + $0x190] sm:$0xff] }
  0x47   : > { %1151 = vmatpush.bf16.msrb.mxu3 %v5015_v12  ;;  %v5039_v12 = vld [vmem:[#allocation2 + $0xa0] sm:$0xff] }
  0x48   : > { %383 = vmatmul.bf16.gmra.mxu1 %v307_v3  ;;  %373 = vmatmul.bf16.gmra.mxu0 %v305_v4 }
  0x49   : > { %451 = vmatpush.bf16.msrb.mxu1 %v4958_v1  ;;  %797 = vmatpush.bf16.msrb.mxu0 %v4990_v2  ;;  %v4210_v1 = vld [vmem:[%s5488_s10 + $0x68] sm:$0xf]  ;;  %v739_v2 = vpack.c.b16 %v623_v49, %v622_v34  ;;  %v4313_v34 = vld [vmem:[%s5488_s10 + $0xf0] sm:$0xf] }
  0x4a   : > { %1046 = vmatpush.bf16.msrb.mxu2 %v5006_v11  ;;  %694 = vmatmul.bf16.gmra.mxu3 %v626_v10  ;;  %v869_v3 = vunpack.c.l.b16 %v4210_v1  ;;  %v5049_v10 = vld [vmem:[#allocation2 + $0x330] sm:$0xff]  ;;  %v1435_v49 = vld [vmem:[%s5488_s10 + $0x8] sm:$0xf] }
  0x4b   : > { %558 = vmatmul.bf16.gmra.mxu2 %v5541_v7  ;;  %1152 = vmatpush.bf16.msrb.mxu3 %v5014_v16  ;;  %v5033_v11 = vld [vmem:[#allocation2 + $0x430] sm:$0xff] }
  0x4c   : > { %v5583_v5 = vpack.c.b16 %v869_v3, %v868_v0 }
  0x4d   : > { %452 = vmatpush.bf16.msrb.mxu1 %v4957_v8  ;;  %798 = vmatpush.bf16.msrb.mxu0 %v4989_v9  ;;  %v5040_v8 = vld [vmem:[#allocation2 + $0xa8] sm:$0xff]  ;;  %v5019_v9 = vld [vmem:[#allocation2 + $0x180] sm:$0xff] }
  0x4e   : > { %1047 = vmatpush.bf16.msrb.mxu2 %v5005_v14  ;;  %v4211_v14 = vld [vmem:[%s5488_s10 + $0x70] sm:$0xf] }
  0x4f   : > { %1153 = vmatpush.bf16.msrb.mxu3 %v5013_v27  ;;  %v870_v16 = vunpack.c.l.b16 %v4211_v14  ;;  %v5044_v14 = vld [vmem:[#allocation2 + $0x308] sm:$0xff] }
  0x51   : > { %453 = vmatpush.bf16.msrb.mxu1 %v4956_v13  ;;  %799 = vmatpush.bf16.msrb.mxu0 %v4988_v15  ;;  %v4142_v13 = vld [vmem:[%s5488_s10 + $0xe0] sm:$0xf] }
  0x52   : > { %1048 = vmatpush.bf16.msrb.mxu2 %v5004_v38  ;;  %v736_v15 = vunpack.c.l.b16 %v4142_v13  ;;  %v1220_v38 = vunpack.c.l.b16 %v4313_v34 }
  0x53   : > { %1154 = vmatpush.bf16.msrb.mxu3 %v5012_v39 }
  0x55   : > { %454 = vmatpush.bf16.msrb.mxu1 %v4955_v18  ;;  %800 = vmatpush.bf16.msrb.mxu0 %v4987_v22  ;;  %v740_v18 = vpack.c.b16 %v736_v15, %v624_v50  ;;  %v987_v22 = vpack.c.b16 %v870_v16, %v869_v3  ;;  %v5609_v50 = vld [vmem:[%s5488_s10 + $0x100] sm:$0xf] }
  0x56   : > { %1049 = vmatpush.bf16.msrb.mxu2 %v5003_v20  ;;  %v5055_v15 = vld [vmem:[#allocation2 + $0x5a0] sm:$0xff] }
  0x57   : > { %1155 = vmatpush.bf16.msrb.mxu3 %v5011_v56  ;;  %v5029_v56 = vld [vmem:[#allocation2 + $0x410] sm:$0xff] }
  0x58   : > { %455 = vmatmul.bf16.vlgmr.msrb.gmra.mxu1 %v391_v30  ;;  %801 = vmatmul.bf16.vlgmr.msrb.gmra.mxu0 %v737_v31  ;;  %v5031_v30 = vld [vmem:[#allocation2 + $0x420] sm:$0xff]  ;;  %v5037_v31 = vld [vmem:[#allocation2 + $0x90] sm:$0xff] }
  0x59   : > { %930 = vmatpush.bf16.msra.mxu1 %v5002_v19  ;;  %1284 = vmatpush.bf16.msra.mxu0 %v5026_v24  ;;  %v871_v19 = vunpack.c.l.b16 %v4212_v17  ;;  %v5032_v24 = vld [vmem:[#allocation2 + $0x428] sm:$0xff] }
  0x5a   : > { %699 = vmatmul.bf16.gmra.mxu3 %v627_v21  ;;  %1649 = vmatpush.bf16.msra.mxu2 %v5042_v55  ;;  %v5056_v55 = vld [vmem:[#allocation2 + $0x5a8] sm:$0xff] }
  0x5b   : > { %563 = vmatmul.bf16.gmra.mxu2 %v5558_v35  ;;  %1774 = vmatpush.bf16.msra.mxu3 %v5050_v60  ;;  %v5590_v23 = vpack.c.b16 %v871_v19, %v870_v16  ;;  %v1222_v60 = vunpack.c.l.b16 %v5609_v50  ;;  %v5068_v50 = vld [vmem:[#allocation2 + $0x448] sm:$0xff] }
  0x5d   : > { %931 = vmatpush.bf16.msra.mxu1 %v5001_v29  ;;  %1285 = vmatpush.bf16.msra.mxu0 %v5025_v36  ;;  %v5058_v29 = vld [vmem:[#allocation2 + $0x5b8] sm:$0xff]  ;;  %v4213_v36 = vld [vmem:[%s5488_s10 + $0x80] sm:$0xf] }
  0x5e   : > { %1650 = vmatpush.bf16.msra.mxu2 %v5041_v58  ;;  %v872_v27 = vunpack.c.l.b16 %v4213_v36 }
  0x5f   : > { %1775 = vmatpush.bf16.msra.mxu3 %v5049_v10 }
  0x61   : > { %932 = vmatpush.bf16.msra.mxu1 %v5000_v37  ;;  %1286 = vmatpush.bf16.msra.mxu0 %v5024_v33  ;;  %v866_v37 = vunpack.c.l.b16 %v4207_v32  ;;  %v4214_v33 = vld [vmem:[%s5488_s10 + $0x88] sm:$0xf] }
  0x62   : > { %1651 = vmatpush.bf16.msra.mxu2 %v5040_v8  ;;  %v873_v39 = vunpack.c.l.b16 %v4214_v33  ;;  %v5637_v33 = vld [vmem:[%s5488_s10 + $0x118] sm:$0xf] }
  0x64   : > { %v5603_v45 = vpack.c.b16 %v873_v39, %v872_v27 }
  0x65   : > { %933 = vmatpush.bf16.msra.mxu1 %v4999_v26  ;;  %1287 = vmatpush.bf16.msra.mxu0 %v5023_v40  ;;  %v988_v40 = vpack.c.b16 %v872_v27, %v871_v19  ;;  %v5634_v27 = vld [vmem:[%s5488_s10 + $0x110] sm:$0xf] }
  0x66   : > { %1652 = vmatpush.bf16.msra.mxu2 %v5039_v12 }
  0x68   : > { %460 = vmatmul.bf16.gmra.mxu1 %v5518_v42  ;;  %806 = vmatmul.bf16.gmra.mxu0 %v738_v48  ;;  %v5575_v42 = vld [vmem:[%s5488_s10 + $0x58] sm:$0xf]  ;;  %v5035_v48 = vld [vmem:[#allocation2 + $0x80] sm:$0xff] }
  0x69   : > { %934 = vmatpush.bf16.msra.mxu1 %v4998_v43  ;;  %1288 = vmatpush.bf16.msra.mxu0 %v5022_v57  ;;  %v867_v63 = vunpack.c.l.b16 %v5575_v42  ;;  %v5057_v43 = vld [vmem:[#allocation2 + $0x5b0] sm:$0xff] }
  0x6a   : > { %704 = vmatmul.bf16.gmra.mxu3 %v628_v52  ;;  %1653 = vmatpush.bf16.msra.mxu2 %v5038_v25  ;;  %v4215_v52 = vld [vmem:[%s5488_s10 + $0x90] sm:$0xf]  ;;  %v5028_v25 = vld [vmem:[#allocation2 + $0x408] sm:$0xff] }
  0x6b   : > { %568 = vmatmul.bf16.gmra.mxu2 %v495_v51  ;;  %v986_v4 = vpack.c.b16 %v868_v0, %v867_v63  ;;  %v874_v20 = vpack.c.b16 %v867_v63, %v866_v37  ;;  %v5612_v51 = vld [vmem:[%s5488_s10 + $0x108] sm:$0xf]  ;;  %v985_v61 = vunpack.c.l.b16 %v4215_v52  ;;  %v4216_v63 = vld [vmem:[%s5488_s10 + $0x98] sm:$0xf]  ;;  %v1225_v52 = vunpack.c.l.b16 %v5637_v33 }
  0x6c   : > { %v1223_v42 = vunpack.c.l.b16 %v5612_v51  ;;  %v1097_v12 = vunpack.c.l.b16 %v4216_v63 }
  0x6d   : > { %935 = vmatpush.bf16.msra.mxu1 %v4997_v47  ;;  %1289 = vmatpush.bf16.msra.mxu0 %v5021_v59  ;;  %v1433_v47 = vld [vmem:[%s5488_s10] sm:$0xf]  ;;  %v1474_v59 = vshll.u32 %v1435_v49, 16 }
  0x6e   : > { %1654 = vmatpush.bf16.msra.mxu2 %v5037_v31  ;;  %v1457_v57 = vshrl.u32 %v1433_v47, 16  ;;  %v1460_v58 = vshll.u32 %v1433_v47, 16  ;;  %v1229_v10 = vpack.c.b16 %v1223_v42, %v1222_v60 }
  0x6f   : > { %v1476_v8 = vrot.slane %v1474_v59, 5 }
  0x70   : > { %v1459_v0 = vrot.slane %v1457_v57, 4  ;;  %v1462_v1 = vrot.slane %v1460_v58, 5 }
  0x71   : > { %936 = vmatpush.bf16.msra.mxu1 %v4996_v53  ;;  %1290 = vmatpush.bf16.msra.mxu0 %v5020_v62  ;;  %v5045_v53 = vld [vmem:[#allocation2 + $0x310] sm:$0xff] }
  0x72   : > { %1655 = vmatpush.bf16.msra.mxu2 %v5036_v44  ;;  %v1437_v62 = vld [vmem:[%s5488_s10 + $0x10] sm:$0xf]  ;;  %v1463_v13 = vor.u32 %v1462_v1, %v1459_v0 }
  0x73   : > { %v1488_v3 = vshll.u32 %v1437_v62, 16 }
  0x75   : > { %937 = vmatpush.bf16.msra.mxu1 %v4995_v54  ;;  %1291 = vmatpush.bf16.msra.mxu0 %v5019_v9  ;;  %v1471_v54 = vshrl.u32 %v1435_v49, 16  ;;  %v1436_v9 = vld [vmem:[%s5488_s10 + $0xc] sm:$0x1]  ;;  %v1490_v17 = vrot.slane %v1488_v3, 5  ;;  %v1224_v49 = vunpack.c.l.b16 %v5634_v27 }
  0x76   : > { %1656 = vmatpush.bf16.msra.mxu2 %v5035_v48  ;;  %v1480_v19 = vshll.u32 %v1436_v9, 16  ;;  %v5053_v48 = vld [vmem:[#allocation2 + $0x590] sm:$0xff] }
  0x77   : > { %v1230_v63 = vpack.c.b16 %v1225_v52, %v1224_v49 }
  0x78   : > { %465 = vmatmul.bf16.gmra.mxu1 %v5541_v7  ;;  %811 = vmatmul.bf16.gmra.mxu0 %v739_v2  ;;  %v5048_v7 = vld [vmem:[#allocation2 + $0x328] sm:$0xff]  ;;  %v1485_v2 = vshrl.u32 %v1437_v62, 16  ;;  %v1440_v62 = vld [vmem:[%s5488_s10 + $0x1c] sm:$0x1] }
  0x79   : > { %1396 = vmatpush.bf16.msrb.mxu1 %v5034_v6  ;;  %1776 = vmatpush.bf16.msra.mxu3 %v5048_v7  ;;  %v1473_v6 = vrot.slane %v1471_v54, 4 }
  0x7a   : > { %1156 = vmatmul.bf16.vlgmr.msrb.gmra.mxu3 %v5583_v5  ;;  %1893 = vmatpush.bf16.msrb.mxu0 %v5058_v29  ;;  %v1487_v16 = vrot.slane %v1485_v2, 4  ;;  %v5043_v29 = vld [vmem:[#allocation2 + $0x300] sm:$0xff] }
  0x7b   : > { %1050 = vmatmul.bf16.vlgmr.msrb.gmra.mxu2 %v986_v4  ;;  %v1434_v4 = vld [vmem:[%s5488_s10 + $0x4] sm:$0x1] }
  0x7c   : > { %v1466_v7 = vshll.u32 %v1434_v4, 16  ;;  %v1491_v32 = vor.u32 %v1490_v17, %v1487_v16  ;;  %v5052_v4 = vld [vmem:[#allocation2 + $0x588] sm:$0xff] }
  0x7d   : > { %1397 = vmatpush.bf16.msrb.mxu1 %v5033_v11  ;;  %1777 = vmatpush.bf16.msra.mxu3 %v5047_v28  ;;  %v989_v11 = vpack.c.b16 %v985_v61, %v873_v39  ;;  %v5074_v28 = vld [vmem:[#allocation2 + $0x478] sm:$0xff] }
  0x7e   : > { %1894 = vmatpush.bf16.msrb.mxu0 %v5057_v43  ;;  %v1468_v31 = vrot.slane %v1466_v7, 5  ;;  %2266 = vmatpush.bf16.msrb.mxu2 %v5074_v28  ;;  %v5073_v43 = vld [vmem:[#allocation2 + $0x470] sm:$0xff]  ;;  %v5066_v7 = vld [vmem:[#allocation2 + $0x1f8] sm:$0xff] }
  0x81   : > { %1398 = vmatpush.bf16.msrb.mxu1 %v5032_v24  ;;  %1778 = vmatpush.bf16.msra.mxu3 %v5046_v41  ;;  %v1098_v24 = vpack.c.b16 %v1097_v12, %v985_v61  ;;  %v5027_v41 = vld [vmem:[#allocation2 + $0x400] sm:$0xff] }
  0x82   : > { %1895 = vmatpush.bf16.msrb.mxu0 %v5056_v55  ;;  %2267 = vmatpush.bf16.msrb.mxu2 %v5073_v43  ;;  %v1441_v55 = vld [vmem:[%s5488_s10 + $0x20] sm:$0xf] }
  0x83   : > { %v1513_v58 = vshrl.u32 %v1441_v55, 16  ;;  %v1516_v54 = vshll.u32 %v1441_v55, 16  ;;  %v5071_v43 = vld [vmem:[#allocation2 + $0x460] sm:$0xff] }
  0x85   : > { %1399 = vmatpush.bf16.msrb.mxu1 %v5031_v30  ;;  %1779 = vmatpush.bf16.msra.mxu3 %v5045_v53  ;;  %v1464_v30 = vrot.slane %v1463_v13, 4  ;;  %v5082_v13 = vld [vmem:[#allocation2 + $0xf8] sm:$0xff] }
  0x86   : > { %1896 = vmatpush.bf16.msrb.mxu0 %v5055_v15  ;;  %v5051_v15 = vld [vmem:[#allocation2 + $0x580] sm:$0xff] }
  0x88   : > { %470 = vmatmul.bf16.gmra.mxu1 %v5558_v35  ;;  %816 = vmatmul.bf16.gmra.mxu0 %v740_v18  ;;  %v5596_v35 = vld [vmem:[%s5488_s10 + $0xf8] sm:$0xf]  ;;  %v1477_v18 = vor.u32 %v1476_v8, %v1473_v6  ;;  %v1515_v6 = vrot.slane %v1513_v58, 4  ;;  %v1518_v8 = vrot.slane %v1516_v54, 5 }
  0x89   : > { %v1221_v21 = vunpack.c.l.b16 %v5596_v35  ;;  %1400 = vmatpush.bf16.msrb.mxu1 %v5030_v46  ;;  %1780 = vmatpush.bf16.msra.mxu3 %v5044_v14  ;;  %v5072_v14 = vld [vmem:[#allocation2 + $0x468] sm:$0xff] }
  0x8a   : > { %1161 = vmatmul.bf16.gmra.mxu3 %v5590_v23  ;;  %v1478_v37 = vrot.slane %v1477_v18, 4  ;;  %v1519_v16 = vor.u32 %v1518_v8, %v1515_v6  ;;  %v1443_v18 = vld [vmem:[%s5488_s10 + $0x28] sm:$0xf]  ;;  %2268 = vmatpush.bf16.msrb.mxu2 %v5072_v14  ;;  %v1446_v6 = vld [vmem:[%s5488_s10 + $0x34] sm:$0x1] }
  0x8b   : > { %1055 = vmatmul.bf16.gmra.mxu2 %v987_v22  ;;  %v1228_v26 = vpack.c.b16 %v1221_v21, %v1220_v38  ;;  %v1438_v22 = vld [vmem:[%s5488_s10 + $0x14] sm:$0x1]  ;;  %v1439_v38 = vld [vmem:[%s5488_s10 + $0x18] sm:$0xf] }
  0x8c   : > { %v1494_v34 = vshll.u32 %v1438_v22, 16  ;;  %v1499_v46 = vshrl.u32 %v1439_v38, 16  ;;  %v1502_v47 = vshll.u32 %v1439_v38, 16 }
  0x8d   : > { %1401 = vmatpush.bf16.msrb.mxu1 %v5029_v56  ;;  %1781 = vmatpush.bf16.msra.mxu3 %v5043_v29 }
  0x8e   : > { %v1496_v39 = vrot.slane %v1494_v34, 5  ;;  %v1501_v59 = vrot.slane %v1499_v46, 4  ;;  %v1504_v61 = vrot.slane %v1502_v47, 5  ;;  %v1444_v47 = vld [vmem:[%s5488_s10 + $0x2c] sm:$0x1]  ;;  %2269 = vmatpush.bf16.msrb.mxu2 %v5071_v43 }
  0x90   : > { %v1505_v9 = vor.u32 %v1504_v61, %v1501_v59  ;;  %v1536_v59 = vshll.u32 %v1444_v47, 16  ;;  %v1448_v47 = vld [vmem:[%s5488_s10 + $0x3c] sm:$0x1] }
  0x91   : > { %1402 = vmatpush.bf16.msrb.mxu1 %v5028_v25  ;;  %2516 = vmatpush.bf16.msrb.mxu3 %v5082_v13  ;;  %v1530_v25 = vshll.u32 %v1443_v18, 16  ;;  %v5064_v13 = vld [vmem:[#allocation2 + $0x1e8] sm:$0xff] }
  0x95   : > { %1403 = vmatpush.bf16.msrb.mxu1 %v5027_v41  ;;  %v5065_v41 = vld [vmem:[#allocation2 + $0x1f0] sm:$0xff] }
  0x98   : > { %938 = vmatmul.bf16.vlgmr.msra.gmra.mxu1 %v874_v20  ;;  %1292 = vmatmul.bf16.vlgmr.msra.gmra.mxu0 %v1228_v26  ;;  %v1469_v20 = vsel %vm5628_vm2, %v1464_v30, %v1468_v31  ;;  %v1492_v26 = vrot.slane %v1491_v32, 4  ;;  %v5670_v30 = vld [vmem:[%s5488_s10 + $0x120] sm:$0xf]  ;;  %v5673_v31 = vld [vmem:[%s5488_s10 + $0x128] sm:$0xf]  ;;  %v1520_v32 = vrot.slane %v1519_v16, 4 }
  0x99   : > { %v1585_v53 = vunpack.c.l.b16 %v1469_v20  ;;  %2141 = vmatpush.bf16.msra.mxu1 %v5066_v7  ;;  %v1226_v38 = vunpack.c.l.b16 %v5670_v30  ;;  %v1227_v20 = vunpack.c.l.b16 %v5673_v31  ;;  %v5070_v7 = vld [vmem:[#allocation2 + $0x458] sm:$0xff] }
  0x9a   : > { %1166 = vmatmul.bf16.gmra.mxu3 %v5603_v45  ;;  %v1497_v57 = vsel %vm5628_vm2, %v1492_v26, %v1496_v39  ;;  %v5081_v26 = vld [vmem:[#allocation2 + $0xf0] sm:$0xff]  ;;  %2270 = vmatpush.bf16.msrb.mxu2 %v5070_v7  ;;  %v5078_v7 = vld [vmem:[#allocation2 + $0xd8] sm:$0xff] }
  0x9b   : > { %1060 = vmatmul.bf16.gmra.mxu2 %v988_v40  ;;  %v5054_v40 = vld [vmem:[#allocation2 + $0x598] sm:$0xff]  ;;  %v5653_v0 = vunpack.c.l.b16 %v1497_v57  ;;  %2517 = vmatpush.bf16.msrb.mxu3 %v5081_v26  ;;  %v1231_v57 = vpack.c.b16 %v1227_v20, %v1226_v38 }
  0x9c   : > { %1897 = vmatpush.bf16.msrb.mxu0 %v5054_v40  ;;  %v1532_v40 = vrot.slane %v1530_v25, 5  ;;  %v5090_v26 = vld [vmem:[#allocation2 + $0x378] sm:$0xff] }
  0x9d   : > { %2142 = vmatpush.bf16.msra.mxu1 %v5065_v41 }
  0xa0   : > { %1898 = vmatpush.bf16.msrb.mxu0 %v5053_v48  ;;  %v1445_v48 = vld [vmem:[%s5488_s10 + $0x30] sm:$0xf] }
  0xa1   : > { %v1544_v55 = vshll.u32 %v1445_v48, 16  ;;  %2143 = vmatpush.bf16.msra.mxu1 %v5064_v13  ;;  %v1450_v13 = vld [vmem:[%s5488_s10 + $0x44] sm:$0x1] }
  0xa4   : > { %1899 = vmatpush.bf16.msrb.mxu0 %v5052_v4  ;;  %v1546_v4 = vrot.slane %v1544_v55, 5  ;;  %v1340_v55 = vpack.c.b16 %v1222_v60, %v1221_v21  ;;  %v4484_v21 = vld [vmem:[%s5488_s10 + $0xa8] sm:$0xf] }
  0xa8   : > { %943 = vmatmul.bf16.gmra.mxu1 %v5583_v5  ;;  %1297 = vmatmul.bf16.gmra.mxu0 %v1229_v10  ;;  %v1482_v5 = vrot.slane %v1480_v19, 5  ;;  %v1508_v10 = vshll.u32 %v1440_v62, 16  ;;  %v1506_v19 = vrot.slane %v1505_v9, 4 }
  0xa9   : > { %1900 = vmatpush.bf16.msrb.mxu0 %v5051_v15  ;;  %v1550_v15 = vshll.u32 %v1446_v6, 16 }
  0xaa   : > { %1171 = vmatmul.bf16.gmra.mxu3 %v1098_v24  ;;  %v1483_v44 = vsel %vm5628_vm2, %v1478_v37, %v1482_v5  ;;  %v1510_v22 = vrot.slane %v1508_v10, 5  ;;  %v1527_v24 = vshrl.u32 %v1443_v18, 16 }
  0xab   : > { %1065 = vmatmul.bf16.gmra.mxu2 %v989_v11  ;;  %v1586_v56 = vunpack.c.l.b16 %v1483_v44  ;;  %v1442_v11 = vld [vmem:[%s5488_s10 + $0x24] sm:$0x1] }
  0xac   : > { %v1522_v17 = vshll.u32 %v1442_v11, 16  ;;  %v1511_v37 = vsel %vm5628_vm2, %v1506_v19, %v1510_v22  ;;  %v1529_v39 = vrot.slane %v1527_v24, 4  ;;  %v1538_v11 = vrot.slane %v1536_v59, 5 }
  0xad   : > { %v1593_v3 = vpack.c.b16 %v1586_v56, %v1585_v53  ;;  %v1718_v12 = vpack.c.b16 %v5653_v0, %v1586_v56  ;;  %v1588_v44 = vunpack.c.l.b16 %v1511_v37  ;;  %v1541_v53 = vshrl.u32 %v1445_v48, 16  ;;  %v5079_v37 = vld [vmem:[#allocation2 + $0xe0] sm:$0xff]  ;;  %2641 = vmatpush.bf16.msra.mxu0 %v5090_v26 }
  0xae   : > { %v1524_v34 = vrot.slane %v1522_v17, 5  ;;  %v1533_v54 = vor.u32 %v1532_v40, %v1529_v39  ;;  %v1552_v22 = vrot.slane %v1550_v15, 5  ;;  %v5063_v39 = vld [vmem:[#allocation2 + $0x1e0] sm:$0xff]  ;;  %v5062_v15 = vld [vmem:[#allocation2 + $0x1d8] sm:$0xff] }
  0xaf   : > { %2144 = vmatpush.bf16.msra.mxu1 %v5063_v39 }
  0xb0   : > { %v1525_v46 = vsel %vm5628_vm2, %v1520_v32, %v1524_v34  ;;  %v1534_v10 = vrot.slane %v1533_v54, 4 }
  0xb1   : > { %v1589_v58 = vunpack.c.l.b16 %v1525_v46  ;;  %v1449_v46 = vld [vmem:[%s5488_s10 + $0x40] sm:$0xf] }
  0xb2   : > { %v1687_v48 = vshrl.u32 %v1449_v46, 16 }
  0xb3   : > { %v1719_v9 = vpack.c.b16 %v1589_v58, %v1588_v44  ;;  %2145 = vmatpush.bf16.msra.mxu1 %v5062_v15 }
  0xb5   : > { %v5655_v1 = vpop.f32.mrf.mxu1  ;;  %v5657_v2 = vpop.f32.mrf.mxu0 }
  0xb8   : > { %948 = vmatmul.bf16.gmra.mxu1 %v5590_v23  ;;  %1302 = vmatmul.bf16.gmra.mxu0 %v1230_v63  ;;  %v1594_v63 = vpack.c.b16 %v1588_v44, %v5653_v0  ;;  %v1447_v0 = vld [vmem:[%s5488_s10 + $0x38] sm:$0xf]  ;;  %v5069_v44 = vld [vmem:[#allocation2 + $0x450] sm:$0xff] }
  0xb9   : > { %v1555_v24 = vshrl.u32 %v1447_v0, 16  ;;  %v1558_v25 = vshll.u32 %v1447_v0, 16  ;;  %2271 = vmatpush.bf16.msrb.mxu2 %v5069_v44 }
  0xba   : > { %1782 = vmatmul.bf16.vlgmr.msra.gmra.mxu3 %v1718_v12  ;;  %v5080_v12 = vld [vmem:[#allocation2 + $0xe8] sm:$0xff] }
  0xbb   : > { %1657 = vmatmul.bf16.vlgmr.msra.gmra.mxu2 %v1593_v3  ;;  %v1543_v3 = vrot.slane %v1541_v53, 4  ;;  %2518 = vmatpush.bf16.msrb.mxu3 %v5080_v12  ;;  %v1557_v41 = vrot.slane %v1555_v24, 4  ;;  %v1560_v43 = vrot.slane %v1558_v25, 5  ;;  %v1690_v53 = vshll.u32 %v1449_v46, 16 }
  0xbc   : > { %v1963_v25 = vshrl.u32 %v4484_v21, 16 }
  0xbd   : > { %v5665_v28 = vpop.f32.mrf.mxu1  ;;  %v5667_v29 = vpop.f32.mrf.mxu0  ;;  %v1547_v14 = vor.u32 %v1546_v4, %v1543_v3  ;;  %v1561_v6 = vor.u32 %v1560_v43, %v1557_v41  ;;  %2272 = vmatpush.bf16.msrb.mxu2 %v5068_v50 }
  0xbe   : > { %v5663_v23 = vpop.f32.mrf.mxu2  ;;  %v5677_v5 = vpop.f32.mrf.mxu3 }
  0xbf   : > { %v1548_v19 = vrot.slane %v1547_v14, 4  ;;  %2519 = vmatpush.bf16.msrb.mxu3 %v5079_v37  ;;  %v5089_v14 = vld [vmem:[#allocation2 + $0x370] sm:$0xff]  ;;  %v1562_v0 = vrot.slane %v1561_v6, 4 }
  0xc0   : > { %2642 = vmatpush.bf16.msra.mxu0 %v5089_v14 }
  0xc1   : > { %v1553_v40 = vsel %vm5628_vm2, %v1548_v19, %v1552_v22  ;;  %v1696_v19 = vshll.u32 %v1450_v13, 16  ;;  %v4486_v22 = vld [vmem:[%s5488_s10 + $0xb0] sm:$0xf] }
  0xc2   : > { %v5723_v59 = vunpack.c.l.b16 %v1553_v40  ;;  %v1977_v26 = vshrl.u32 %v4486_v22, 16  ;;  %v1980_v39 = vshll.u32 %v4486_v22, 16  ;;  %v4565_v22 = vld [vmem:[%s5488_s10 + $0x54] sm:$0x1] }
  0xc3   : > { %2520 = vmatpush.bf16.msrb.mxu3 %v5078_v7  ;;  %v1698_v44 = vrot.slane %v1696_v19, 5 }
  0xc4   : > { %v1982_v13 = vrot.slane %v1980_v39, 5 }
  0xc5   : > { %v5691_v61 = vpop.f32.mrf.mxu1  ;;  %v5693_v62 = vpop.f32.mrf.mxu0 }
  0xc6   : > { %v5685_v56 = vpop.f32.mrf.mxu2  ;;  %v5697_v8 = vpop.f32.mrf.mxu3 }
  0xc8   : > { %953 = vmatmul.bf16.gmra.mxu1 %v5603_v45  ;;  %1307 = vmatmul.bf16.gmra.mxu0 %v1231_v57  ;;  %v1539_v45 = vsel %vm5628_vm2, %v1534_v10, %v1538_v11  ;;  %v1689_v10 = vrot.slane %v1687_v48, 4  ;;  %v1692_v11 = vrot.slane %v1690_v53, 5 }
  0xc9   : > { %v1590_v34 = vunpack.c.l.b16 %v1539_v45 }
  0xca   : > { %1787 = vmatmul.bf16.gmra.mxu3 %v1719_v9  ;;  %v1564_v9 = vshll.u32 %v1448_v47, 16  ;;  %v1965_v47 = vrot.slane %v1963_v25, 4 }
  0xcb   : > { %1662 = vmatmul.bf16.gmra.mxu2 %v1594_v63  ;;  %v5721_v54 = vpack.c.b16 %v1590_v34, %v1589_v58  ;;  %v1720_v58 = vpack.c.b16 %v5723_v59, %v1590_v34 }
  0xcc   : > { %v1566_v45 = vrot.slane %v1564_v9, 5  ;;  %v5077_v9 = vld [vmem:[#allocation2 + $0xd0] sm:$0xff] }
  0xcd   : > { %v5705_v17 = vpop.f32.mrf.mxu1  ;;  %v5707_v18 = vpop.f32.mrf.mxu0  ;;  %2521 = vmatpush.bf16.msrb.mxu3 %v5077_v9 }
  0xce   : > { %v5701_v16 = vpop.f32.mrf.mxu2  ;;  %v5709_v32 = vpop.f32.mrf.mxu3 }
  0xd5   : > { %v456_v3 = vpop.f32.mrf.mxu1  ;;  %v802_v4 = vpop.f32.mrf.mxu0 }
  0xd6   : > { %v5719_v57 = vpop.f32.mrf.mxu2  ;;  %v457_v12 = vadd.f32 %v456_v3, %v5657_v2  ;;  %v5727_v35 = vpop.f32.mrf.mxu3  ;;  %v1693_v2 = vor.u32 %v1692_v11, %v1689_v10  ;;  %v4487_v3 = vld [vmem:[%s5488_s10 + $0xb4] sm:$0x1]  ;;  %v5088_v10 = vld [vmem:[#allocation2 + $0x368] sm:$0xff] }
  0xd7   : > { %v5061_v11 = vld [vmem:[#allocation2 + $0x1d0] sm:$0xff]  ;;  %2643 = vmatpush.bf16.msra.mxu0 %v5088_v10  ;;  %v1986_v51 = vshll.u32 %v4487_v3, 16  ;;  %v5087_v10 = vld [vmem:[#allocation2 + $0x360] sm:$0xff] }
  0xd8   : > { %v574_v60 = vadd.f32 %v5663_v23, %v457_v12  ;;  %1404 = vmatmul.bf16.vlgmr.msrb.gmra.mxu1 %v1340_v55  ;;  %1901 = vmatmul.bf16.vlgmr.msrb.gmra.mxu0 %v1594_v63  ;;  %v1966_v23 = vshll.u32 %v4484_v21, 16  ;;  %v5067_v63 = vld [vmem:[#allocation2 + $0x440] sm:$0xff]  ;;  %v1694_v43 = vrot.slane %v1693_v2, 4  ;;  %v4485_v55 = vld [vmem:[%s5488_s10 + $0xac] sm:$0x1]  ;;  %v1979_v12 = vrot.slane %v1977_v26, 4 }
  0xd9   : > { %2273 = vmatpush.bf16.msrb.mxu2 %v5067_v63  ;;  %v1451_v21 = vld [vmem:[%s5488_s10 + $0x48] sm:$0xf]  ;;  %v1972_v14 = vshll.u32 %v4485_v55, 16  ;;  %2146 = vmatpush.bf16.msra.mxu1 %v5061_v11 }
  0xda   : > { %v710_v24 = vadd.f32 %v5677_v5, %v574_v60  ;;  %1792 = vmatmul.bf16.gmra.mxu3 %v1720_v58  ;;  %v1567_v5 = vsel %vm5628_vm2, %v1562_v0, %v1566_v45  ;;  %v1968_v48 = vrot.slane %v1966_v23, 5  ;;  %v1699_v50 = vsel %vm5628_vm2, %v1694_v43, %v1698_v44  ;;  %v4564_v60 = vld [vmem:[%s5488_s10 + $0x50] sm:$0xf]  ;;  %v4566_v58 = vld [vmem:[%s5488_s10 + $0x58] sm:$0xf]  ;;  %v5076_v26 = vld [vmem:[#allocation2 + $0xc8] sm:$0xff] }
  0xdb   : > { %1667 = vmatmul.bf16.gmra.mxu2 %v5721_v54  ;;  %v5747_v6 = vunpack.c.l.b16 %v1567_v5  ;;  %v2324_v15 = vshrl.u32 %v4564_v60, 16  ;;  %v2327_v27 = vshll.u32 %v4564_v60, 16  ;;  %v5767_v2 = vunpack.c.l.b16 %v1699_v50  ;;  %2522 = vmatpush.bf16.msrb.mxu3 %v5076_v26  ;;  %v5060_v11 = vld [vmem:[#allocation2 + $0x1c8] sm:$0xff] }
  0xdc   : > { %v5735_v34 = vadd.f32 %v802_v4, %v710_v24  ;;  %v1969_v7 = vor.u32 %v1968_v48, %v1965_v47  ;;  %v1812_v19 = vshrl.u32 %v1451_v21, 16  ;;  %v4488_v24 = vld [vmem:[%s5488_s10 + $0xb8] sm:$0xf]  ;;  %v1983_v63 = vor.u32 %v1982_v13, %v1979_v12  ;;  %2644 = vmatpush.bf16.msra.mxu0 %v5087_v10  ;;  %v5059_v10 = vld [vmem:[#allocation2 + $0x1c0] sm:$0xff] }
  0xdd   : > { %v458_v40 = vpop.f32.mrf.mxu1  ;;  %v804_v41 = vpop.f32.mrf.mxu0  ;;  %v1815_v39 = vshll.u32 %v1451_v21, 16  ;;  %v2326_v5 = vrot.slane %v2324_v15, 4  ;;  %v2333_v47 = vshll.u32 %v4565_v22, 16  ;;  %v5775_v48 = vrot.slane %v1986_v51, 5  ;;  %v5106_v12 = vld [vmem:[#allocation2 + $0x238] sm:$0xff]  ;;  %v5075_v21 = vld [vmem:[#allocation2 + $0xc0] sm:$0xff]  ;;  %2147 = vmatpush.bf16.msra.mxu1 %v5060_v11 }
  0xde   : > { %v5737_v37 = vpop.f32.mrf.mxu2  ;;  %v459_v46 = vadd.f32 %v458_v40, %v5667_v29  ;;  %v5742_v53 = vpop.f32.mrf.mxu3  ;;  %v1341_v29 = vpack.c.b16 %v1224_v49, %v1223_v42  ;;  %v2338_v42 = vshrl.u32 %v4566_v58, 16  ;;  %v2341_v49 = vshll.u32 %v4566_v58, 16  ;;  %v4567_v40 = vld [vmem:[%s5488_s10 + $0x5c] sm:$0x1]  ;;  %3008 = vmatpush.bf16.msra.mxu2 %v5106_v12  ;;  %v5105_v12 = vld [vmem:[#allocation2 + $0x230] sm:$0xff] }
  0xdf   : > { %v1970_v44 = vrot.slane %v1969_v7, 4  ;;  %v2347_v13 = vshll.u32 %v4567_v40, 16  ;;  %v1991_v50 = vshrl.u32 %v4488_v24, 16  ;;  %v1814_v60 = vrot.slane %v1812_v19, 4  ;;  %2523 = vmatpush.bf16.msrb.mxu3 %v5075_v21 }
  0xe0   : > { %v575_v4 = vadd.f32 %v5685_v56, %v459_v46  ;;  %v1974_v46 = vrot.slane %v1972_v14, 5  ;;  %v2340_v3 = vrot.slane %v2338_v42, 4  ;;  %v1817_v58 = vrot.slane %v1815_v39, 5  ;;  %v4489_v42 = vld [vmem:[%s5488_s10 + $0xbc] sm:$0x1] }
  0xe1   : > { %v1984_v7 = vrot.slane %v1983_v63, 4  ;;  %v2335_v15 = vrot.slane %v2333_v47, 5  ;;  %v1993_v22 = vrot.slane %v1991_v50, 4  ;;  %2148 = vmatpush.bf16.msra.mxu1 %v5059_v10  ;;  %v4494_v10 = vld [vmem:[%s5488_s10 + $0xd0] sm:$0xf] }
  0xe2   : > { %v711_v56 = vadd.f32 %v5697_v8, %v575_v4  ;;  %v5765_v8 = vpack.c.b16 %v5747_v6, %v5723_v59  ;;  %v2343_v4 = vrot.slane %v2341_v49, 5  ;;  %v1975_v26 = vsel %vm5628_vm2, %v1970_v44, %v1974_v46  ;;  %v4491_v46 = vld [vmem:[%s5488_s10 + $0xc4] sm:$0x1]  ;;  %3009 = vmatpush.bf16.msra.mxu2 %v5105_v12  ;;  %v5098_v12 = vld [vmem:[#allocation2 + $0x5f8] sm:$0xff] }
  0xe3   : > { %v1818_v39 = vor.u32 %v1817_v58, %v1814_v60 }
  0xe4   : > { %v5759_v0 = vadd.f32 %v804_v41, %v711_v56  ;;  %v2329_v41 = vrot.slane %v2327_v27, 5  ;;  %v2344_v56 = vor.u32 %v2343_v4, %v2340_v3  ;;  %v2349_v27 = vrot.slane %v2347_v13, 5  ;;  %v4568_v13 = vld [vmem:[%s5488_s10 + $0x60] sm:$0xf] }
  0xe5   : > { %v461_v25 = vpop.f32.mrf.mxu1  ;;  %v807_v23 = vpop.f32.mrf.mxu0  ;;  %v1819_v21 = vrot.slane %v1818_v39, 4  ;;  %v4569_v39 = vld [vmem:[%s5488_s10 + $0x64] sm:$0x1]  ;;  %2760 = vmatpush.bf16.msrb.mxu1 %v5098_v12 }
  0xe6   : > { %v5761_v45 = vpop.f32.mrf.mxu2  ;;  %v462_v43 = vadd.f32 %v461_v25, %v5693_v62  ;;  %v5773_v59 = vpop.f32.mrf.mxu3  ;;  %v2330_v55 = vor.u32 %v2329_v41, %v2326_v5  ;;  %v1721_v62 = vpack.c.b16 %v5767_v2, %v5747_v6  ;;  %v1452_v6 = vld [vmem:[%s5488_s10 + $0x4c] sm:$0x1]  ;;  %v2345_v51 = vrot.slane %v2344_v56, 4  ;;  %v5086_v5 = vld [vmem:[#allocation2 + $0x358] sm:$0xff]  ;;  %v5085_v56 = vld [vmem:[#allocation2 + $0x350] sm:$0xff] }
  0xe7   : > { %v1821_v40 = vshll.u32 %v1452_v6, 16  ;;  %2645 = vmatpush.bf16.msra.mxu0 %v5086_v5 }
  0xe8   : > { %v576_v9 = vadd.f32 %v5701_v16, %v462_v43  ;;  %1409 = vmatmul.bf16.gmra.mxu1 %v1341_v29  ;;  %1906 = vmatmul.bf16.gmra.mxu0 %v5721_v54  ;;  %v4490_v16 = vld [vmem:[%s5488_s10 + $0xc0] sm:$0xf]  ;;  %v1994_v29 = vshll.u32 %v4488_v24, 16  ;;  %v2331_v14 = vrot.slane %v2330_v55, 4  ;;  %v2000_v55 = vshll.u32 %v4489_v42, 16 }
  0xe9   : > { %v2008_v41 = vshll.u32 %v4490_v16, 16  ;;  %v2350_v44 = vsel %vm5628_vm2, %v2345_v51, %v2349_v27  ;;  %v1823_v60 = vrot.slane %v1821_v40, 5  ;;  %v4571_v40 = vld [vmem:[%s5488_s10 + $0x6c] sm:$0x1] }
  0xea   : > { %v712_v54 = vadd.f32 %v5709_v32, %v576_v9  ;;  %1797 = vmatmul.bf16.gmra.mxu3 %v1721_v62  ;;  %v1996_v24 = vrot.slane %v1994_v29, 5  ;;  %v2005_v32 = vshrl.u32 %v4490_v16, 16  ;;  %v2336_v47 = vsel %vm5628_vm2, %v2331_v14, %v2335_v15 }
  0xeb   : > { %1672 = vmatmul.bf16.gmra.mxu2 %v5765_v8  ;;  %v2010_v9 = vrot.slane %v2008_v41, 5  ;;  %v5808_v62 = vunpack.c.l.b16 %v1975_v26  ;;  %v5813_v58 = vunpack.c.l.b16 %v2336_v47  ;;  %v5817_v30 = vunpack.c.l.b16 %v2350_v44  ;;  %2646 = vmatpush.bf16.msra.mxu0 %v5085_v56  ;;  %v5084_v26 = vld [vmem:[#allocation2 + $0x348] sm:$0xff] }
  0xec   : > { %v5786_v49 = vadd.f32 %v807_v23, %v712_v54  ;;  %v1989_v23 = vsel %vm5628_vm2, %v1984_v7, %v5775_v48  ;;  %v2007_v4 = vrot.slane %v2005_v32, 4  ;;  %v1342_v48 = vpack.c.b16 %v1226_v38, %v1225_v52  ;;  %v4482_v54 = vld [vmem:[%s5488_s10 + $0xa0] sm:$0xf] }
  0xed   : > { %v463_v25 = vpop.f32.mrf.mxu1  ;;  %v809_v63 = vpop.f32.mrf.mxu0  ;;  %v1997_v11 = vor.u32 %v1996_v24, %v1993_v22  ;;  %v5811_v50 = vunpack.c.l.b16 %v1989_v23  ;;  %v5819_v52 = vrot.slane %v2000_v55, 5  ;;  %v2352_v38 = vshrl.u32 %v4568_v13, 16  ;;  %v4492_v55 = vld [vmem:[%s5488_s10 + $0xc8] sm:$0xf] }
  0xee   : > { %v5788_v19 = vpop.f32.mrf.mxu2  ;;  %v464_v43 = vadd.f32 %v463_v25, %v5707_v18  ;;  %v5798_v3 = vpop.f32.mrf.mxu3  ;;  %v2011_v16 = vor.u32 %v2010_v9, %v2007_v4  ;;  %v2014_v29 = vshll.u32 %v4491_v46, 16  ;;  %v2355_v7 = vshll.u32 %v4568_v13, 16  ;;  %v5104_v13 = vld [vmem:[#allocation2 + $0x228] sm:$0xff] }
  0xef   : > { %v5829_v51 = vrot.slane %v1997_v11, 4  ;;  %v2354_v27 = vrot.slane %v2352_v38, 4  ;;  %v2210_v32 = vpack.c.b16 %v5811_v50, %v5808_v62  ;;  %v1824_v25 = vsel %vm5628_vm2, %v1819_v21, %v1823_v60  ;;  %2647 = vmatpush.bf16.msra.mxu0 %v5084_v26  ;;  %3010 = vmatpush.bf16.msra.mxu2 %v5104_v13 }
  0xf0   : > { %v577_v18 = vadd.f32 %v5719_v57, %v464_v43  ;;  %v4570_v57 = vld [vmem:[%s5488_s10 + $0x68] sm:$0xf]  ;;  %v2357_v5 = vrot.slane %v2355_v7, 5  ;;  %v1949_v43 = vshrl.u32 %v4482_v54, 16  ;;  %v2460_v46 = vpack.c.b16 %v5817_v30, %v5813_v58  ;;  %v5083_v58 = vld [vmem:[#allocation2 + $0x340] sm:$0xff] }
  0xf1   : > { %v2366_v6 = vshrl.u32 %v4570_v57, 16  ;;  %v2369_v42 = vshll.u32 %v4570_v57, 16  ;;  %v2012_v4 = vrot.slane %v2011_v16, 4  ;;  %v2016_v9 = vrot.slane %v2014_v29, 5 }
  0xf2   : > { %v713_v33 = vadd.f32 %v5727_v35, %v577_v18  ;;  %v5827_v35 = vld [vmem:[%s5488_s10 + $0x130] sm:$0xf]  ;;  %v1952_v18 = vshll.u32 %v4482_v54, 16  ;;  %v2358_v21 = vor.u32 %v2357_v5, %v2354_v27  ;;  %v2361_v60 = vshll.u32 %v4569_v39, 16 }
  0xf3   : > { %v2368_v23 = vrot.slane %v2366_v6, 4  ;;  %v2371_v47 = vrot.slane %v2369_v42, 5  ;;  %v2375_v56 = vshll.u32 %v4571_v40, 16  ;;  %v1339_v57 = vunpack.c.l.b16 %v5827_v35  ;;  %2648 = vmatpush.bf16.msra.mxu0 %v5083_v58 }
  0xf4   : > { %v5822_v14 = vadd.f32 %v809_v63, %v713_v33  ;;  %v5836_v63 = vld [vmem:[%s5488_s10 + $0xa4] sm:$0x1]  ;;  %v2019_v38 = vshrl.u32 %v4492_v55, 16  ;;  %v2022_v16 = vshll.u32 %v4492_v55, 16  ;;  %v5851_v54 = vunpack.c.l.b16 %v1824_v25 }
  0xf5   : > { %v466_v22 = vpop.f32.mrf.mxu1  ;;  %v812_v24 = vpop.f32.mrf.mxu0  ;;  %v2372_v33 = vor.u32 %v2371_v47, %v2368_v23  ;;  %v1951_v7 = vrot.slane %v1949_v43, 4  ;;  %v1954_v6 = vrot.slane %v1952_v18, 5  ;;  %v2377_v42 = vrot.slane %v2375_v56, 5  ;;  %v5113_v18 = vld [vmem:[#allocation2 + $0x4b0] sm:$0xff] }
  0xf6   : > { %v5824_v15 = vpop.f32.mrf.mxu2  ;;  %v467_v41 = vadd.f32 %v466_v22, %v5655_v1  ;;  %v5842_v44 = vpop.f32.mrf.mxu3  ;;  %v5114_v1 = vld [vmem:[#allocation2 + $0x4b8] sm:$0xff]  ;;  %v2021_v26 = vrot.slane %v2019_v38, 4  ;;  %v2036_v39 = vshll.u32 %v4494_v10, 16  ;;  %v1343_v5 = vpack.c.b16 %v1339_v57, %v1227_v20 }
  0xf7   : > { %3133 = vmatpush.bf16.msra.mxu3 %v5114_v1  ;;  %v2373_v25 = vrot.slane %v2372_v33, 4  ;;  %v1843_v23 = vpack.c.b16 %v5851_v54, %v5767_v2  ;;  %v5103_v2 = vld [vmem:[#allocation2 + $0x220] sm:$0xff] }
  0xf8   : > { %v578_v11 = vadd.f32 %v5737_v37, %v467_v41  ;;  %1414 = vmatmul.bf16.gmra.mxu1 %v1342_v48  ;;  %1911 = vmatmul.bf16.gmra.mxu0 %v5765_v8  ;;  %v2003_v37 = vsel %vm5628_vm2, %v5829_v51, %v5819_v52  ;;  %v1958_v8 = vshll.u32 %v5836_v63, 16  ;;  %v2017_v48 = vsel %vm5628_vm2, %v2012_v4, %v2016_v9  ;;  %v4493_v41 = vld [vmem:[%s5488_s10 + $0xcc] sm:$0x1] }
  0xf9   : > { %v2359_v52 = vrot.slane %v2358_v21, 4  ;;  %v2363_v51 = vrot.slane %v2361_v60, 5  ;;  %v2024_v63 = vrot.slane %v2022_v16, 5  ;;  %v5871_v47 = vunpack.c.l.b16 %v2003_v37  ;;  %v4572_v21 = vld [vmem:[%s5488_s10 + $0x70] sm:$0xf]  ;;  %3011 = vmatpush.bf16.msra.mxu2 %v5103_v2 }
  0xfa   : > { %v714_v29 = vadd.f32 %v5742_v53, %v578_v11  ;;  %v2033_v53 = vshrl.u32 %v4494_v10, 16  ;;  %2524 = vmatmul.bf16.vlgmr.msrb.gmra.mxu3 %v2460_v46  ;;  %v1955_v46 = vor.u32 %v1954_v6, %v1951_v7  ;;  %v2038_v4 = vrot.slane %v2036_v39, 5  ;;  %v5097_v10 = vld [vmem:[#allocation2 + $0x5f0] sm:$0xff]  ;;  %v4574_v60 = vld [vmem:[%s5488_s10 + $0x78] sm:$0xf] }
  0xfb   : > { %2274 = vmatmul.bf16.vlgmr.msrb.gmra.mxu2 %v2210_v32  ;;  %v5878_v31 = vrot.slane %v1958_v8, 5  ;;  %v2364_v20 = vsel %vm5628_vm2, %v2359_v52, %v2363_v51  ;;  %v2378_v11 = vsel %vm5628_vm2, %v2373_v25, %v2377_v42  ;;  %v2025_v1 = vor.u32 %v2024_v63, %v2021_v26  ;;  %3134 = vmatpush.bf16.msra.mxu3 %v5113_v18  ;;  %v4575_v42 = vld [vmem:[%s5488_s10 + $0x7c] sm:$0x1] }
  0xfc   : > { %v5860_v35 = vadd.f32 %v812_v24, %v714_v29  ;;  %v4495_v24 = vld [vmem:[%s5488_s10 + $0xd4] sm:$0x1]  ;;  %v2035_v43 = vrot.slane %v2033_v53, 4  ;;  %v2028_v12 = vshll.u32 %v4493_v41, 16  ;;  %2761 = vmatpush.bf16.msrb.mxu1 %v5097_v10  ;;  %v2380_v57 = vshrl.u32 %v4572_v21, 16  ;;  %v5102_v18 = vld [vmem:[#allocation2 + $0x218] sm:$0xff] }
  0xfd   : > { %v468_v22 = vpop.f32.mrf.mxu1  ;;  %v814_v32 = vpop.f32.mrf.mxu0  ;;  %v2042_v13 = vshll.u32 %v4495_v24, 16  ;;  %v2383_v58 = vshll.u32 %v4572_v21, 16  ;;  %v1956_v33 = vrot.slane %v1955_v46, 4  ;;  %v5887_v38 = vunpack.c.l.b16 %v2364_v20  ;;  %v4496_v46 = vld [vmem:[%s5488_s10 + $0xd8] sm:$0xf]  ;;  %v5112_v20 = vld [vmem:[#allocation2 + $0x4a8] sm:$0xff]  ;;  %3012 = vmatpush.bf16.msra.mxu2 %v5102_v18 }
  0xfe   : > { %v5862_v27 = vpop.f32.mrf.mxu2  ;;  %v469_v40 = vadd.f32 %v468_v22, %v5665_v28  ;;  %v5873_v55 = vpop.f32.mrf.mxu3  ;;  %v5876_v28 = vunpack.c.l.b16 %v2017_v48  ;;  %v2039_v56 = vor.u32 %v2038_v4, %v2035_v43  ;;  %v2394_v16 = vshrl.u32 %v4574_v60, 16  ;;  %v4573_v48 = vld [vmem:[%s5488_s10 + $0x74] sm:$0x1] }
  0xff   : > { %v2397_v29 = vshll.u32 %v4574_v60, 16  ;;  %v5893_v8 = vunpack.c.l.b16 %v2378_v11  ;;  %v2385_v7 = vrot.slane %v2383_v58, 5  ;;  %v2030_v51 = vrot.slane %v2028_v12, 5  ;;  %v4498_v11 = vld [vmem:[%s5488_s10 + $0xe0] sm:$0xf]  ;;  %3135 = vmatpush.bf16.msra.mxu3 %v5112_v20 }
 0x100   : > { %v579_v9 = vadd.f32 %v5761_v45, %v469_v40  ;;  %v2211_v52 = vpack.c.b16 %v5876_v28, %v5871_v47  ;;  %v2396_v22 = vrot.slane %v2394_v16, 4  ;;  %v2026_v26 = vrot.slane %v2025_v1, 4  ;;  %v4578_v20 = vld [vmem:[%s5488_s10 + $0x88] sm:$0xf] }
 0x101   : > { %v2399_v25 = vrot.slane %v2397_v29, 5  ;;  %v2040_v63 = vrot.slane %v2039_v56, 4  ;;  %v2044_v39 = vrot.slane %v2042_v13, 5  ;;  %v2389_v24 = vshll.u32 %v4573_v48, 16 }
 0x102   : > { %v715_v45 = vadd.f32 %v5773_v59, %v579_v9  ;;  %v2382_v59 = vrot.slane %v2380_v57, 4  ;;  %v5906_v9 = vpack.c.b16 %v5893_v8, %v5887_v38  ;;  %v2403_v10 = vshll.u32 %v4575_v42, 16 }
 0x103   : > { %v2400_v43 = vor.u32 %v2399_v25, %v2396_v22  ;;  %v1961_v2 = vsel %vm5628_vm2, %v1956_v33, %v5878_v31  ;;  %v2391_v13 = vrot.slane %v2389_v24, 5  ;;  %v2050_v60 = vshll.u32 %v4496_v46, 16  ;;  %v5111_v25 = vld [vmem:[#allocation2 + $0x4a0] sm:$0xff] }
 0x104   : > { %v5889_v54 = vadd.f32 %v814_v32, %v715_v45  ;;  %v2386_v41 = vor.u32 %v2385_v7, %v2382_v59  ;;  %v2179_v56 = vshrl.u32 %v4498_v11, 16  ;;  %v2182_v57 = vshll.u32 %v4498_v11, 16  ;;  %v4497_v59 = vld [vmem:[%s5488_s10 + $0xdc] sm:$0x1]  ;;  %3136 = vmatpush.bf16.msra.mxu3 %v5111_v25 }
 0x105   : > { %v471_v6 = vpop.f32.mrf.mxu1  ;;  %v817_v53 = vpop.f32.mrf.mxu0  ;;  %v2401_v21 = vrot.slane %v2400_v43, 4  ;;  %v2077_v16 = vunpack.c.l.b16 %v1961_v2  ;;  %v2052_v42 = vrot.slane %v2050_v60, 5  ;;  %v2585_v24 = vpack.c.b16 %v5887_v38, %v5817_v30 }
 0x106   : > { %v5891_v37 = vpop.f32.mrf.mxu2  ;;  %v472_v32 = vadd.f32 %v471_v6, %v5691_v61  ;;  %v5900_v40 = vpop.f32.mrf.mxu3  ;;  %v5096_v61 = vld [vmem:[#allocation2 + $0x5e8] sm:$0xff]  ;;  %v2387_v12 = vrot.slane %v2386_v41, 4  ;;  %v2056_v43 = vshll.u32 %v4497_v59, 16  ;;  %v2425_v30 = vshll.u32 %v4578_v20, 16 }
 0x107   : > { %2762 = vmatpush.bf16.msrb.mxu1 %v5096_v61  ;;  %v2085_v41 = vpack.c.b16 %v5808_v62, %v2077_v16  ;;  %v2422_v62 = vshrl.u32 %v4578_v20, 16 }
 0x108   : > { %v580_v4 = vadd.f32 %v5788_v19, %v472_v32  ;;  %1419 = vmatmul.bf16.gmra.mxu1 %v1343_v5  ;;  %1916 = vmatmul.bf16.gmra.mxu0 %v1843_v23  ;;  %v2031_v19 = vsel %vm5628_vm2, %v2026_v26, %v2030_v51  ;;  %v2045_v5 = vsel %vm5628_vm2, %v2040_v63, %v2044_v39  ;;  %v2047_v23 = vshrl.u32 %v4496_v46, 16  ;;  %v5122_v32 = vld [vmem:[#allocation2 + $0x138] sm:$0xff]  ;;  %v5095_v39 = vld [vmem:[#allocation2 + $0x5e0] sm:$0xff]  ;;  %v5101_v46 = vld [vmem:[#allocation2 + $0x210] sm:$0xff] }
 0x109   : > { %v5923_v48 = vunpack.c.l.b16 %v2031_v19  ;;  %v5926_v7 = vunpack.c.l.b16 %v2045_v5  ;;  %v2181_v26 = vrot.slane %v2179_v56, 4  ;;  %v2184_v63 = vrot.slane %v2182_v57, 5  ;;  %3312 = vmatpush.bf16.msrb.mxu0 %v5122_v32  ;;  %3013 = vmatpush.bf16.msra.mxu2 %v5101_v46 }
 0x10a   : > { %v716_v1 = vadd.f32 %v5798_v3, %v580_v4  ;;  %2529 = vmatmul.bf16.gmra.mxu3 %v5906_v9  ;;  %v2405_v3 = vrot.slane %v2403_v10, 5  ;;  %v2049_v51 = vrot.slane %v2047_v23, 4  ;;  %v4576_v4 = vld [vmem:[%s5488_s10 + $0x80] sm:$0xf]  ;;  %v2427_v56 = vrot.slane %v2425_v30, 5 }
 0x10b   : > { %2279 = vmatmul.bf16.gmra.mxu2 %v2211_v52  ;;  %v4499_v52 = vld [vmem:[%s5488_s10 + $0xe4] sm:$0x1]  ;;  %v2408_v18 = vshrl.u32 %v4576_v4, 16  ;;  %v2411_v10 = vshll.u32 %v4576_v4, 16  ;;  %2763 = vmatpush.bf16.msrb.mxu1 %v5095_v39  ;;  %v2185_v19 = vor.u32 %v2184_v63, %v2181_v26  ;;  %v2058_v59 = vrot.slane %v2056_v43, 5 }
 0x10c   : > { %v5917_v31 = vadd.f32 %v817_v53, %v716_v1  ;;  %v2392_v53 = vsel %vm5628_vm2, %v2387_v12, %v2391_v13  ;;  %v2053_v11 = vor.u32 %v2052_v42, %v2049_v51  ;;  %v2188_v5 = vshll.u32 %v4499_v52, 16  ;;  %v4577_v13 = vld [vmem:[%s5488_s10 + $0x84] sm:$0x1]  ;;  %v4680_v39 = vld [vmem:[%s5488_s10 + $0xf0] sm:$0xf] }
 0x10d   : > { %v473_v58 = vpop.f32.mrf.mxu1  ;;  %v819_v33 = vpop.f32.mrf.mxu0  ;;  %v2413_v60 = vrot.slane %v2411_v10, 5  ;;  %v2186_v51 = vrot.slane %v2185_v19, 4  ;;  %v2417_v25 = vshll.u32 %v4577_v13, 16 }
 0x10e   : > { %v5919_v45 = vpop.f32.mrf.mxu2  ;;  %v474_v29 = vadd.f32 %v473_v58, %v5705_v17  ;;  %v5928_v6 = vpop.f32.mrf.mxu3  ;;  %v2406_v17 = vsel %vm5628_vm2, %v2401_v21, %v2405_v3  ;;  %v2410_v21 = vrot.slane %v2408_v18, 4  ;;  %v2424_v3 = vrot.slane %v2422_v62, 4  ;;  %v4579_v58 = vld [vmem:[%s5488_s10 + $0x8c] sm:$0x1] }
 0x10f   : > { %v5944_v2 = vunpack.c.l.b16 %v2406_v17  ;;  %v2190_v42 = vrot.slane %v2188_v5, 5  ;;  %v5094_v17 = vld [vmem:[#allocation2 + $0x5d8] sm:$0xff]  ;;  %v2431_v63 = vshll.u32 %v4579_v58, 16 }
 0x110   : > { %v581_v22 = vadd.f32 %v5824_v15, %v474_v29  ;;  %v5942_v15 = vunpack.c.l.b16 %v2392_v53  ;;  %v2054_v29 = vrot.slane %v2053_v11, 4  ;;  %v5100_v53 = vld [vmem:[#allocation2 + $0x208] sm:$0xff]  ;;  %v2414_v32 = vor.u32 %v2413_v60, %v2410_v21  ;;  %2764 = vmatpush.bf16.msrb.mxu1 %v5094_v17  ;;  %v4683_v17 = vld [vmem:[%s5488_s10 + $0xfc] sm:$0x1] }
 0x111   : > { %v2428_v26 = vor.u32 %v2427_v56, %v2424_v3  ;;  %3014 = vmatpush.bf16.msra.mxu2 %v5100_v53  ;;  %v2191_v20 = vsel %vm5628_vm2, %v2186_v51, %v2190_v42  ;;  %v2433_v30 = vrot.slane %v2431_v63, 5  ;;  %v5109_v3 = vld [vmem:[#allocation2 + $0x490] sm:$0xff]  ;;  %v5120_v56 = vld [vmem:[#allocation2 + $0x128] sm:$0xff]  ;;  %v4684_v53 = vld [vmem:[%s5488_s10 + $0x100] sm:$0xf] }
 0x112   : > { %v717_v61 = vadd.f32 %v5842_v44, %v581_v22  ;;  %v2212_v44 = vpack.c.b16 %v5926_v7, %v5923_v48  ;;  %v5110_v22 = vld [vmem:[#allocation2 + $0x498] sm:$0xff]  ;;  %v2415_v11 = vrot.slane %v2414_v32, 4  ;;  %v2209_v60 = vunpack.c.l.b16 %v2191_v20 }
 0x113   : > { %3137 = vmatpush.bf16.msra.mxu3 %v5110_v22  ;;  %v2429_v62 = vrot.slane %v2428_v26, 4  ;;  %v2086_v22 = vpack.c.b16 %v5871_v47, %v5811_v50  ;;  %v2847_v32 = vshll.u32 %v4684_v53, 16 }
 0x114   : > { %v5946_v38 = vadd.f32 %v819_v33, %v717_v61  ;;  %v5959_v33 = vpack.c.b16 %v5944_v2, %v5942_v15  ;;  %v2419_v61 = vrot.slane %v2417_v25, 5  ;;  %v2844_v25 = vshrl.u32 %v4684_v53, 16 }
 0x115   : > { %v939_v23 = vpop.f32.mrf.mxu1  ;;  %v1293_v12 = vpop.f32.mrf.mxu0 }
 0x116   : > { %v5948_v1 = vpop.f32.mrf.mxu2  ;;  %v959_v57 = vadd.f32 %v939_v23, %v5735_v34  ;;  %v5955_v16 = vpop.f32.mrf.mxu3  ;;  %v5121_v34 = vld [vmem:[#allocation2 + $0x130] sm:$0xff]  ;;  %v2420_v58 = vsel %vm5628_vm2, %v2415_v11, %v2419_v61 }
 0x117   : > { %3313 = vmatpush.bf16.msrb.mxu0 %v5121_v34  ;;  %3138 = vmatpush.bf16.msra.mxu3 %v5109_v3  ;;  %v2586_v34 = vpack.c.b16 %v5942_v15, %v5893_v8  ;;  %v5108_v15 = vld [vmem:[#allocation2 + $0x488] sm:$0xff]  ;;  %v4580_v11 = vld [vmem:[%s5488_s10 + $0x90] sm:$0xf] }
 0x118   : > { %v1071_v52 = vadd.f32 %v5862_v27, %v959_v57  ;;  %2149 = vmatmul.bf16.vlgmr.msra.gmra.mxu1 %v2085_v41  ;;  %2649 = vmatmul.bf16.vlgmr.msra.gmra.mxu0 %v2585_v24  ;;  %v2059_v27 = vsel %vm5628_vm2, %v2054_v29, %v2058_v59  ;;  %v5099_v41 = vld [vmem:[#allocation2 + $0x200] sm:$0xff]  ;;  %v4682_v24 = vld [vmem:[%s5488_s10 + $0xf8] sm:$0xf]  ;;  %v5093_v57 = vld [vmem:[#allocation2 + $0x5d0] sm:$0xff] }
 0x119   : > { %v2830_v5 = vshrl.u32 %v4682_v24, 16  ;;  %v2833_v23 = vshll.u32 %v4682_v24, 16  ;;  %3015 = vmatpush.bf16.msra.mxu2 %v5099_v41  ;;  %v5978_v21 = vunpack.c.l.b16 %v2059_v27  ;;  %2765 = vmatpush.bf16.msrb.mxu1 %v5093_v57  ;;  %v2846_v41 = vrot.slane %v2844_v25, 4 }
 0x11a   : > { %v1177_v46 = vadd.f32 %v5873_v55, %v1071_v52  ;;  %2534 = vmatmul.bf16.gmra.mxu3 %v5959_v33  ;;  %v2816_v55 = vshrl.u32 %v4680_v39, 16  ;;  %v2849_v24 = vrot.slane %v2847_v32, 5 }
 0x11b   : > { %2284 = vmatmul.bf16.gmra.mxu2 %v2212_v44  ;;  %v2819_v44 = vshll.u32 %v4680_v39, 16  ;;  %3314 = vmatpush.bf16.msrb.mxu0 %v5120_v56  ;;  %v2832_v51 = vrot.slane %v2830_v5, 4  ;;  %v2835_v42 = vrot.slane %v2833_v23, 5  ;;  %v5997_v39 = vunpack.c.l.b16 %v2420_v58  ;;  %v5138_v5 = vld [vmem:[#allocation2 + $0x638] sm:$0xff] }
 0x11c   : > { %v5967_v43 = vadd.f32 %v1293_v12, %v1177_v46  ;;  %v2818_v29 = vrot.slane %v2816_v55, 4  ;;  %v2839_v55 = vshll.u32 %v4683_v17, 16  ;;  %3139 = vmatpush.bf16.msra.mxu3 %v5108_v15  ;;  %v2554_v58 = vshrl.u32 %v4580_v11, 16 }
 0x11d   : > { %v941_v18 = vpop.f32.mrf.mxu1  ;;  %v1295_v10 = vpop.f32.mrf.mxu0  ;;  %v2821_v59 = vrot.slane %v2819_v44, 5  ;;  %v2836_v61 = vor.u32 %v2835_v42, %v2832_v51  ;;  %v5119_v44 = vld [vmem:[#allocation2 + $0x120] sm:$0xff]  ;;  %3540 = vmatpush.bf16.msrb.mxu2 %v5138_v5 }
 0x11e   : > { %v5969_v4 = vpop.f32.mrf.mxu2  ;;  %v960_v19 = vadd.f32 %v941_v18, %v5759_v0  ;;  %v5975_v12 = vpop.f32.mrf.mxu3  ;;  %v2434_v0 = vsel %vm5628_vm2, %v2429_v62, %v2433_v30  ;;  %v4685_v18 = vld [vmem:[%s5488_s10 + $0x104] sm:$0x1] }
 0x11f   : > { %v5999_v46 = vunpack.c.l.b16 %v2434_v0  ;;  %v2822_v27 = vor.u32 %v2821_v59, %v2818_v29  ;;  %v2853_v3 = vshll.u32 %v4685_v18, 16  ;;  %v2837_v57 = vrot.slane %v2836_v61, 4  ;;  %3315 = vmatpush.bf16.msrb.mxu0 %v5119_v44  ;;  %v4686_v29 = vld [vmem:[%s5488_s10 + $0x108] sm:$0xf]  ;;  %v4687_v44 = vld [vmem:[%s5488_s10 + $0x10c] sm:$0x1] }
 0x120   : > { %v1072_v13 = vadd.f32 %v5891_v37, %v960_v19  ;;  %v4681_v37 = vld [vmem:[%s5488_s10 + $0xf4] sm:$0x1]  ;;  %v5092_v19 = vld [vmem:[#allocation2 + $0x5c8] sm:$0xff]  ;;  %v2557_v0 = vshll.u32 %v4580_v11, 16  ;;  %v2858_v25 = vshrl.u32 %v4686_v29, 16  ;;  %v2861_v32 = vshll.u32 %v4686_v29, 16 }
 0x121   : > { %v2825_v8 = vshll.u32 %v4681_v37, 16  ;;  %v6009_v30 = vpack.c.b16 %v5999_v46, %v5997_v39  ;;  %2766 = vmatpush.bf16.msrb.mxu1 %v5092_v19  ;;  %v2855_v42 = vrot.slane %v2853_v3, 5  ;;  %v5267_v5 = vld [vmem:[%s5488_s10 + $0x4] sm:$0x1] }
 0x122   : > { %v1178_v52 = vadd.f32 %v5900_v40, %v1072_v13  ;;  %v2213_v40 = vpack.c.b16 %v2209_v60, %v5978_v21  ;;  %v5107_v13 = vld [vmem:[#allocation2 + $0x480] sm:$0xff]  ;;  %v2850_v60 = vor.u32 %v2849_v24, %v2846_v41  ;;  %v5137_v24 = vld [vmem:[#allocation2 + $0x630] sm:$0xff]  ;;  %v2860_v19 = vrot.slane %v2858_v25, 4 }
 0x123   : > { %v2827_v23 = vrot.slane %v2825_v8, 5  ;;  %3140 = vmatpush.bf16.msra.mxu3 %v5107_v13  ;;  %v5091_v41 = vld [vmem:[#allocation2 + $0x5c0] sm:$0xff]  ;;  %3541 = vmatpush.bf16.msrb.mxu2 %v5137_v24 }
 0x124   : > { %v5992_v26 = vadd.f32 %v1295_v10, %v1178_v52  ;;  %v2851_v51 = vrot.slane %v2850_v60, 4  ;;  %v5115_v24 = vld [vmem:[#allocation2 + $0x100] sm:$0xff] }
 0x125   : > { %v944_v50 = vpop.f32.mrf.mxu1  ;;  %v1298_v47 = vpop.f32.mrf.mxu0  ;;  %2767 = vmatpush.bf16.msrb.mxu1 %v5091_v41 }
 0x126   : > { %v5994_v63 = vpop.f32.mrf.mxu2  ;;  %v961_v20 = vadd.f32 %v944_v50, %v5786_v49  ;;  %v6003_v10 = vpop.f32.mrf.mxu3  ;;  %v2823_v49 = vrot.slane %v2822_v27, 4  ;;  %v4581_v50 = vld [vmem:[%s5488_s10 + $0x94] sm:$0x1]  ;;  %v2559_v27 = vrot.slane %v2557_v0, 5  ;;  %v2856_v61 = vsel %vm5628_vm2, %v2851_v51, %v2855_v42  ;;  %v5116_v51 = vld [vmem:[#allocation2 + $0x108] sm:$0xff] }
 0x127   : > { %v2563_v3 = vshll.u32 %v4581_v50, 16 }
 0x128   : > { %v1073_v62 = vadd.f32 %v5919_v45, %v961_v20  ;;  %2154 = vmatmul.bf16.gmra.mxu1 %v2086_v22  ;;  %2654 = vmatmul.bf16.gmra.mxu0 %v2586_v34  ;;  %v2841_v45 = vrot.slane %v2839_v55, 5  ;;  %v5118_v22 = vld [vmem:[#allocation2 + $0x118] sm:$0xff]  ;;  %v5117_v55 = vld [vmem:[#allocation2 + $0x110] sm:$0xff] }
 0x129   : > { %3316 = vmatpush.bf16.msrb.mxu0 %v5118_v22 }
 0x12a   : > { %v1179_v56 = vadd.f32 %v5928_v6, %v1073_v62  ;;  %2539 = vmatmul.bf16.gmra.mxu3 %v6009_v30  ;;  %v2828_v6 = vsel %vm5628_vm2, %v2823_v49, %v2827_v23  ;;  %v2842_v17 = vsel %vm5628_vm2, %v2837_v57, %v2841_v45  ;;  %v3201_v49 = vrot.slane %v5267_v5, 5  ;;  %v5268_v23 = vld [vmem:[%s5488_s10 + $0xc] sm:$0x1] }
 0x12b   : > { %2289 = vmatmul.bf16.gmra.mxu2 %v2213_v40  ;;  %v2944_v15 = vunpack.c.l.b16 %v2828_v6  ;;  %v6028_v20 = vunpack.c.l.b16 %v2842_v17  ;;  %v3205_v13 = vrot.slane %v5268_v23, 5  ;;  %v2587_v45 = vpack.c.b16 %v5997_v39, %v5944_v2  ;;  %v4689_v17 = vld [vmem:[%s5488_s10 + $0x114] sm:$0x1] }
 0x12c   : > { %v6013_v59 = vadd.f32 %v1298_v47, %v1179_v56  ;;  %v2556_v47 = vrot.slane %v2554_v58, 4  ;;  %v6044_v58 = vunpack.c.l.b16 %v2856_v61  ;;  %v2867_v6 = vshll.u32 %v4687_v44, 16 }
 0x12d   : > { %v946_v52 = vpop.f32.mrf.mxu1  ;;  %v1300_v37 = vpop.f32.mrf.mxu0  ;;  %3317 = vmatpush.bf16.msrb.mxu0 %v5117_v55  ;;  %v2565_v2 = vrot.slane %v2563_v3, 5  ;;  %v2881_v61 = vshll.u32 %v4689_v17, 16 }
 0x12e   : > { %v6015_v53 = vpop.f32.mrf.mxu2  ;;  %v962_v34 = vadd.f32 %v946_v52, %v5822_v14  ;;  %v6023_v40 = vpop.f32.mrf.mxu3  ;;  %v4688_v14 = vld [vmem:[%s5488_s10 + $0x110] sm:$0xf]  ;;  %v2560_v60 = vor.u32 %v2559_v27, %v2556_v47  ;;  %v2952_v52 = vpack.c.b16 %v6028_v20, %v2944_v15  ;;  %v3077_v50 = vpack.c.b16 %v6044_v58, %v6028_v20  ;;  %v5146_v47 = vld [vmem:[#allocation2 + $0x278] sm:$0xff]  ;;  %v5136_v27 = vld [vmem:[#allocation2 + $0x628] sm:$0xff] }
 0x12f   : > { %v2872_v18 = vshrl.u32 %v4688_v14, 16  ;;  %v2875_v11 = vshll.u32 %v4688_v14, 16  ;;  %v2869_v41 = vrot.slane %v2867_v6, 5  ;;  %3715 = vmatpush.bf16.msrb.mxu3 %v5146_v47  ;;  %3542 = vmatpush.bf16.msrb.mxu2 %v5136_v27  ;;  %v2088_v47 = vpack.c.b16 %v5978_v21, %v5926_v7 }
 0x130   : > { %v1074_v8 = vadd.f32 %v5948_v1, %v962_v34  ;;  %v2863_v1 = vrot.slane %v2861_v32, 5  ;;  %v2561_v32 = vrot.slane %v2560_v60, 4 }
 0x131   : > { %v2874_v42 = vrot.slane %v2872_v18, 4  ;;  %3318 = vmatpush.bf16.msrb.mxu0 %v5116_v51 }
 0x132   : > { %v1180_v62 = vadd.f32 %v5955_v16, %v1074_v8  ;;  %v2087_v16 = vpack.c.b16 %v5923_v48, %v5876_v28  ;;  %v2864_v34 = vor.u32 %v2863_v1, %v2860_v19  ;;  %v3170_v28 = vld [vmem:[%s5488_s10] sm:$0xe]  ;;  %v3171_v48 = vld [vmem:[%s5488_s10 + $0x8] sm:$0xe] }
 0x133   : > { %v4762_v8 = vrot.slane %v3170_v28, 9  ;;  %v4763_v15 = vrot.slane %v3171_v48, 9 }
 0x134   : > { %v6036_v56 = vadd.f32 %v1300_v37, %v1180_v62  ;;  %v2877_v37 = vrot.slane %v2875_v11, 5  ;;  %v2865_v20 = vrot.slane %v2864_v34, 4  ;;  %v4690_v62 = vld [vmem:[%s5488_s10 + $0x118] sm:$0xf] }
 0x135   : > { %v949_v0 = vpop.f32.mrf.mxu1  ;;  %v1303_v29 = vpop.f32.mrf.mxu0  ;;  %v3202_v18 = vsel %vm6058_vm5, %v4762_v8, %v3201_v49  ;;  %v6067_v11 = vsel %vm6058_vm5, %v4763_v15, %v3205_v13  ;;  %3319 = vmatpush.bf16.msrb.mxu0 %v5115_v24  ;;  %v2883_v13 = vrot.slane %v2881_v61, 5 }
 0x136   : > { %v6040_v57 = vpop.f32.mrf.mxu2  ;;  %v963_v22 = vadd.f32 %v949_v0, %v5860_v35  ;;  %v6051_v25 = vpop.f32.mrf.mxu3  ;;  %v5130_v35 = vld [vmem:[#allocation2 + $0x3b8] sm:$0xff]  ;;  %v2878_v14 = vor.u32 %v2877_v37, %v2874_v42  ;;  %v3248_v44 = vunpack.c.l.b16 %v3202_v18  ;;  %v3249_v19 = vunpack.c.l.b16 %v6067_v11  ;;  %v5145_v42 = vld [vmem:[#allocation2 + $0x270] sm:$0xff]  ;;  %v4693_v18 = vld [vmem:[%s5488_s10 + $0x124] sm:$0x1] }
 0x137   : > { %3429 = vmatpush.bf16.msra.mxu1 %v5130_v35  ;;  %v2870_v0 = vsel %vm5628_vm2, %v2865_v20, %v2869_v41  ;;  %v5129_v37 = vld [vmem:[#allocation2 + $0x3b0] sm:$0xff]  ;;  %3716 = vmatpush.bf16.msrb.mxu3 %v5145_v42  ;;  %v3178_v11 = vld [vmem:[%s5488_s10 + $0x40] sm:$0xe] }
 0x138   : > { %v1075_v39 = vadd.f32 %v5969_v4, %v963_v22  ;;  %2159 = vmatmul.bf16.gmra.mxu1 %v2087_v16  ;;  %2659 = vmatmul.bf16.gmra.mxu0 %v2587_v45  ;;  %v2879_v60 = vrot.slane %v2878_v14, 4  ;;  %v6079_v3 = vpack.c.b16 %v3249_v19, %v3248_v44  ;;  %v2886_v16 = vshrl.u32 %v4690_v62, 16  ;;  %v5135_v22 = vld [vmem:[#allocation2 + $0x620] sm:$0xff]  ;;  %v5128_v44 = vld [vmem:[#allocation2 + $0x3a8] sm:$0xff] }
 0x139   : > { %v2947_v34 = vunpack.c.l.b16 %v2870_v0  ;;  %3543 = vmatpush.bf16.msrb.mxu2 %v5135_v22 }
 0x13a   : > { %v1181_v55 = vadd.f32 %v5975_v12, %v1075_v39  ;;  %v2566_v12 = vsel %vm5628_vm2, %v2561_v32, %v2565_v2  ;;  %3141 = vmatmul.bf16.vlgmr.msra.gmra.mxu3 %v3077_v50  ;;  %v2884_v17 = vsel %vm5628_vm2, %v2879_v60, %v2883_v13  ;;  %v2888_v28 = vrot.slane %v2886_v16, 4  ;;  %v4694_v13 = vld [vmem:[%s5488_s10 + $0x128] sm:$0xf] }
 0x13b   : > { %3016 = vmatmul.bf16.vlgmr.msra.gmra.mxu2 %v2952_v52  ;;  %v6087_v51 = vunpack.c.l.b16 %v2566_v12  ;;  %3430 = vmatpush.bf16.msra.mxu1 %v5129_v37  ;;  %v6102_v8 = vunpack.c.l.b16 %v2884_v17  ;;  %v2953_v41 = vpack.c.b16 %v2947_v34, %v6044_v58  ;;  %v5134_v12 = vld [vmem:[#allocation2 + $0x618] sm:$0xff]  ;;  %v2914_v42 = vshrl.u32 %v4694_v13, 16 }
 0x13c   : > { %v6071_v1 = vadd.f32 %v1303_v29, %v1181_v55  ;;  %v2889_v29 = vshll.u32 %v4690_v62, 16  ;;  %v2917_v22 = vshll.u32 %v4694_v13, 16  ;;  %v5269_v13 = vld [vmem:[%s5488_s10 + $0x14] sm:$0x1] }
 0x13d   : > { %v951_v23 = vpop.f32.mrf.mxu1  ;;  %v1305_v49 = vpop.f32.mrf.mxu0  ;;  %v2588_v27 = vpack.c.b16 %v6087_v51, %v5999_v46  ;;  %v3078_v21 = vpack.c.b16 %v6102_v8, %v2947_v34  ;;  %v5144_v46 = vld [vmem:[#allocation2 + $0x268] sm:$0xff]  ;;  %3544 = vmatpush.bf16.msrb.mxu2 %v5134_v12 }
 0x13e   : > { %v6073_v5 = vpop.f32.mrf.mxu2  ;;  %v964_v45 = vadd.f32 %v951_v23, %v5889_v54  ;;  %v6084_v52 = vpop.f32.mrf.mxu3  ;;  %v4692_v54 = vld [vmem:[%s5488_s10 + $0x120] sm:$0xf]  ;;  %v2891_v32 = vrot.slane %v2889_v29, 5  ;;  %v2909_v23 = vshll.u32 %v4693_v18, 16  ;;  %3717 = vmatpush.bf16.msrb.mxu3 %v5144_v46  ;;  %v3173_v46 = vld [vmem:[%s5488_s10 + $0x18] sm:$0xe] }
 0x13f   : > { %v2900_v2 = vshrl.u32 %v4692_v54, 16  ;;  %v2903_v39 = vshll.u32 %v4692_v54, 16  ;;  %3431 = vmatpush.bf16.msra.mxu1 %v5128_v44  ;;  %v6123_v54 = vld [vmem:[#allocation2 + $0x4f8] sm:$0xff] }
 0x140   : > { %v1076_v6 = vadd.f32 %v5994_v63, %v964_v45  ;;  %v4691_v63 = vld [vmem:[%s5488_s10 + $0x11c] sm:$0x1]  ;;  %v2892_v55 = vor.u32 %v2891_v32, %v2888_v28  ;;  %v5143_v28 = vld [vmem:[#allocation2 + $0x260] sm:$0xff]  ;;  %3832 = vmatpush.bf16.msra.mxu0 %v6123_v54 }
 0x141   : > { %v2902_v24 = vrot.slane %v2900_v2, 4  ;;  %v2905_v14 = vrot.slane %v2903_v39, 5  ;;  %v2895_v20 = vshll.u32 %v4691_v63, 16  ;;  %v2916_v39 = vrot.slane %v2914_v42, 4  ;;  %v5133_v63 = vld [vmem:[#allocation2 + $0x610] sm:$0xff] }
 0x142   : > { %v1182_v48 = vadd.f32 %v6003_v10, %v1076_v6  ;;  %v2911_v6 = vrot.slane %v2909_v23, 5  ;;  %3718 = vmatpush.bf16.msrb.mxu3 %v5143_v28  ;;  %3545 = vmatpush.bf16.msrb.mxu2 %v5133_v63  ;;  %v5270_v42 = vld [vmem:[%s5488_s10 + $0x1c] sm:$0x1] }
 0x143   : > { %v2906_v58 = vor.u32 %v2905_v14, %v2902_v24  ;;  %v2897_v60 = vrot.slane %v2895_v20, 5  ;;  %v3172_v20 = vld [vmem:[%s5488_s10 + $0x10] sm:$0xe] }
 0x144   : > { %v6094_v50 = vadd.f32 %v1305_v49, %v1182_v48  ;;  %v2893_v49 = vrot.slane %v2892_v55, 4  ;;  %v5127_v48 = vld [vmem:[#allocation2 + $0x3a0] sm:$0xff] }
 0x145   : > { %v954_v10 = vpop.f32.mrf.mxu1  ;;  %v1308_v15 = vpop.f32.mrf.mxu0  ;;  %v2907_v29 = vrot.slane %v2906_v58, 4  ;;  %3432 = vmatpush.bf16.msra.mxu1 %v5127_v48  ;;  %v4697_v58 = vld [vmem:[%s5488_s10 + $0x134] sm:$0x1] }
 0x146   : > { %v6098_v35 = vpop.f32.mrf.mxu2  ;;  %v965_v61 = vadd.f32 %v954_v10, %v5917_v31  ;;  %v6107_v62 = vpop.f32.mrf.mxu3 }
 0x147   : > { %v2912_v2 = vsel %vm5628_vm2, %v2907_v29, %v2911_v6  ;;  %v5126_v29 = vld [vmem:[#allocation2 + $0x398] sm:$0xff]  ;;  %v4765_v6 = vrot.slane %v3173_v46, 9 }
 0x148   : > { %v1077_v7 = vadd.f32 %v6015_v53, %v965_v61  ;;  %2164 = vmatmul.bf16.gmra.mxu1 %v2088_v47  ;;  %2664 = vmatmul.bf16.gmra.mxu0 %v2588_v27  ;;  %v2919_v27 = vrot.slane %v2917_v22, 5  ;;  %v6135_v14 = vunpack.c.l.b16 %v2912_v2  ;;  %v3055_v22 = vshll.u32 %v4697_v58, 16 }
 0x149   : > { %3433 = vmatpush.bf16.msra.mxu1 %v5126_v29 }
 0x14a   : > { %v1183_v31 = vadd.f32 %v6023_v40, %v1077_v7  ;;  %3146 = vmatmul.bf16.gmra.mxu3 %v3078_v21  ;;  %v2898_v40 = vsel %vm5628_vm2, %v2893_v49, %v2897_v60  ;;  %v2920_v44 = vor.u32 %v2919_v27, %v2916_v39  ;;  %v4764_v60 = vrot.slane %v3172_v20, 9  ;;  %v5125_v20 = vld [vmem:[#allocation2 + $0x390] sm:$0xff] }
 0x14b   : > { %3021 = vmatmul.bf16.gmra.mxu2 %v2953_v41  ;;  %v2949_v32 = vunpack.c.l.b16 %v2898_v40 }
 0x14c   : > { %v6113_v16 = vadd.f32 %v1308_v15, %v1183_v31  ;;  %v4695_v15 = vld [vmem:[%s5488_s10 + $0x12c] sm:$0x1] }
 0x14d   : > { %v956_v45 = vpop.f32.mrf.mxu1  ;;  %v1310_v0 = vpop.f32.mrf.mxu0  ;;  %v2923_v12 = vshll.u32 %v4695_v15, 16  ;;  %v5132_v31 = vld [vmem:[#allocation2 + $0x608] sm:$0xff]  ;;  %3434 = vmatpush.bf16.msra.mxu1 %v5125_v20 }
 0x14e   : > { %v6115_v53 = vpop.f32.mrf.mxu2  ;;  %v966_v37 = vadd.f32 %v956_v45, %v5946_v38  ;;  %v6120_v34 = vpop.f32.mrf.mxu3  ;;  %v4696_v38 = vld [vmem:[%s5488_s10 + $0x130] sm:$0xf]  ;;  %v3209_v45 = vrot.slane %v5269_v13, 5  ;;  %3546 = vmatpush.bf16.msrb.mxu2 %v5132_v31  ;;  %v3175_v31 = vld [vmem:[%s5488_s10 + $0x28] sm:$0xe] }
 0x14f   : > { %v3049_v10 = vshll.u32 %v4696_v38, 16 }
 0x150   : > { %v1078_v17 = vadd.f32 %v6040_v57, %v966_v37  ;;  %v3046_v57 = vshrl.u32 %v4696_v38, 16  ;;  %v3213_v37 = vrot.slane %v5270_v42, 5  ;;  %v6157_v39 = vsel %vm6058_vm5, %v4764_v60, %v3209_v45  ;;  %v5271_v45 = vld [vmem:[%s5488_s10 + $0x24] sm:$0x1] }
 0x151   : > { %v3051_v7 = vrot.slane %v3049_v10, 5  ;;  %v3057_v38 = vrot.slane %v3055_v22, 5  ;;  %v3250_v15 = vunpack.c.l.b16 %v6157_v39  ;;  %v5139_v22 = vld [vmem:[#allocation2 + $0x240] sm:$0xff]  ;;  %v3179_v39 = vld [vmem:[%s5488_s10 + $0x48] sm:$0xe] }
 0x152   : > { %v1184_v47 = vadd.f32 %v6051_v25, %v1078_v17  ;;  %v2954_v25 = vpack.c.b16 %v2949_v32, %v6102_v8  ;;  %v3048_v18 = vrot.slane %v3046_v57, 4  ;;  %v3079_v8 = vpack.c.b16 %v6135_v14, %v2949_v32 }
 0x153   : > { %v2921_v17 = vrot.slane %v2920_v44, 4  ;;  %v3174_v44 = vld [vmem:[%s5488_s10 + $0x20] sm:$0xe] }
 0x154   : > { %v6131_v41 = vadd.f32 %v1310_v0, %v1184_v47  ;;  %v5153_v0 = vld [vmem:[#allocation2 + $0x4f0] sm:$0xff]  ;;  %v3052_v40 = vor.u32 %v3051_v7, %v3048_v18  ;;  %v4766_v13 = vrot.slane %v3174_v44, 9 }
 0x155   : > { %v1405_v61 = vpop.f32.mrf.mxu1  ;;  %v1902_v55 = vpop.f32.mrf.mxu0  ;;  %3833 = vmatpush.bf16.msra.mxu0 %v5153_v0 }
 0x156   : > { %v6133_v24 = vpop.f32.mrf.mxu2  ;;  %v1425_v21 = vadd.f32 %v1405_v61, %v5967_v43  ;;  %v6142_v23 = vpop.f32.mrf.mxu3  ;;  %v5142_v43 = vld [vmem:[#allocation2 + $0x258] sm:$0xff]  ;;  %v3053_v63 = vrot.slane %v3052_v40, 4  ;;  %v5124_v40 = vld [vmem:[#allocation2 + $0x388] sm:$0xff] }
 0x157   : > { %3719 = vmatpush.bf16.msrb.mxu3 %v5142_v43  ;;  %v3217_v43 = vrot.slane %v5271_v45, 5  ;;  %3435 = vmatpush.bf16.msra.mxu1 %v5124_v40  ;;  %v3177_v40 = vld [vmem:[%s5488_s10 + $0x38] sm:$0xe] }
 0x158   : > { %v1678_v49 = vadd.f32 %v6073_v5, %v1425_v21  ;;  %2768 = vmatmul.bf16.vlgmr.msrb.gmra.mxu1 %v5906_v9  ;;  %3320 = vmatmul.bf16.vlgmr.msrb.gmra.mxu0 %v6079_v3  ;;  %v2925_v9 = vrot.slane %v2923_v12, 5  ;;  %v5131_v3 = vld [vmem:[#allocation2 + $0x600] sm:$0xff]  ;;  %v3058_v18 = vsel %vm5628_vm2, %v3053_v63, %v3057_v38 }
 0x159   : > { %3547 = vmatpush.bf16.msrb.mxu2 %v5131_v3  ;;  %v3076_v46 = vunpack.c.l.b16 %v3058_v18 }
 0x15a   : > { %v1803_v5 = vadd.f32 %v6084_v52, %v1678_v49  ;;  %3151 = vmatmul.bf16.gmra.mxu3 %v3079_v8  ;;  %v6161_v52 = vsel %vm6058_vm5, %v4765_v6, %v3213_v37  ;;  %v2926_v27 = vsel %vm5628_vm2, %v2921_v17, %v2925_v9  ;;  %v5140_v49 = vld [vmem:[#allocation2 + $0x248] sm:$0xff]  ;;  %v5151_v37 = vld [vmem:[#allocation2 + $0x4e0] sm:$0xff] }
 0x15b   : > { %3026 = vmatmul.bf16.gmra.mxu2 %v2954_v25  ;;  %v3251_v61 = vunpack.c.l.b16 %v6161_v52  ;;  %v5152_v25 = vld [vmem:[#allocation2 + $0x4e8] sm:$0xff] }
 0x15c   : > { %v6151_v28 = vadd.f32 %v1902_v55, %v1803_v5  ;;  %v5141_v55 = vld [vmem:[#allocation2 + $0x250] sm:$0xff]  ;;  %3834 = vmatpush.bf16.msra.mxu0 %v5152_v25  ;;  %v5272_v6 = vld [vmem:[%s5488_s10 + $0x2c] sm:$0x1]  ;;  %v4869_v17 = vld [vmem:[%s5488_s10 + $0xa8] sm:$0xe] }
 0x15d   : > { %v1407_v32 = vpop.f32.mrf.mxu1  ;;  %v1904_v2 = vpop.f32.mrf.mxu0  ;;  %5187 = vmatpush.bf16.msra.mxu2 %v6123_v54  ;;  %3720 = vmatpush.bf16.msrb.mxu3 %v5141_v55  ;;  %v6183_v54 = vpack.c.b16 %v3251_v61, %v3250_v15  ;;  %v3221_v42 = vrot.slane %v5272_v6, 5  ;;  %v4878_v55 = vrot.slane %v4869_v17, 9  ;;  %v3176_v6 = vld [vmem:[%s5488_s10 + $0x30] sm:$0xe] }
 0x15e   : > { %v6153_v48 = vpop.f32.mrf.mxu2  ;;  %v1426_v47 = vadd.f32 %v1407_v32, %v5992_v26  ;;  %v6166_v57 = vpop.f32.mrf.mxu3  ;;  %v2951_v26 = vunpack.c.l.b16 %v2926_v27  ;;  %v5273_v27 = vld [vmem:[%s5488_s10 + $0xa4] sm:$0x1] }
 0x160   : > { %v1679_v10 = vadd.f32 %v6098_v35, %v1426_v47  ;;  %v2955_v58 = vpack.c.b16 %v2951_v26, %v6135_v14  ;;  %v3080_v14 = vpack.c.b16 %v3076_v46, %v2951_v26  ;;  %3835 = vmatpush.bf16.msra.mxu0 %v5151_v37  ;;  %v5150_v26 = vld [vmem:[#allocation2 + $0x4d8] sm:$0xff] }
 0x161   : > { %5188 = vmatpush.bf16.msra.mxu2 %v5153_v0  ;;  %3721 = vmatpush.bf16.msrb.mxu3 %v5140_v49  ;;  %v4767_v0 = vrot.slane %v3175_v31, 9  ;;  %v4583_v31 = vld [vmem:[%s5488_s10 + $0x9c] sm:$0x1]  ;;  %v5123_v49 = vld [vmem:[#allocation2 + $0x380] sm:$0xff] }
 0x162   : > { %v1804_v7 = vadd.f32 %v6107_v62, %v1679_v10  ;;  %v3604_v10 = vrot.slane %v5273_v27, 5  ;;  %3436 = vmatpush.bf16.msra.mxu1 %v5123_v49  ;;  %v4769_v27 = vrot.slane %v3177_v40, 9  ;;  %v5277_v49 = vld [vmem:[%s5488_s10 + $0xb4] sm:$0x1] }
 0x164   : > { %v6175_v35 = vadd.f32 %v1904_v2, %v1804_v7  ;;  %v6206_v2 = vsel %vm6058_vm5, %v4766_v13, %v3217_v43  ;;  %3836 = vmatpush.bf16.msra.mxu0 %v5150_v26  ;;  %v5149_v13 = vld [vmem:[#allocation2 + $0x4d0] sm:$0xff]  ;;  %v2688_v43 = vshll.u32 %v4583_v31, 16 }
 0x165   : > { %v1410_v12 = vpop.f32.mrf.mxu1  ;;  %v1907_v62 = vpop.f32.mrf.mxu0  ;;  %3722 = vmatpush.bf16.msrb.mxu3 %v5139_v22  ;;  %5189 = vmatpush.bf16.msra.mxu2 %v5152_v25  ;;  %v5274_v25 = vld [vmem:[%s5488_s10 + $0xac] sm:$0x1] }
 0x166   : > { %v6177_v21 = vpop.f32.mrf.mxu2  ;;  %v1427_v8 = vadd.f32 %v1410_v12, %v6013_v59  ;;  %v6189_v60 = vpop.f32.mrf.mxu3  ;;  %v4582_v59 = vld [vmem:[%s5488_s10 + $0x98] sm:$0xf]  ;;  %v3608_v20 = vrot.slane %v5274_v25, 5  ;;  %v5148_v22 = vld [vmem:[#allocation2 + $0x4c8] sm:$0xff]  ;;  %v2690_v17 = vrot.slane %v2688_v43, 5  ;;  %v5147_v25 = vld [vmem:[#allocation2 + $0x4c0] sm:$0xff] }
 0x167   : > { %v2682_v9 = vshll.u32 %v4582_v59, 16 }
 0x168   : > { %v1680_v29 = vadd.f32 %v6115_v53, %v1427_v8  ;;  %2773 = vmatmul.bf16.gmra.mxu1 %v5959_v33  ;;  %3325 = vmatmul.bf16.gmra.mxu0 %v6183_v54  ;;  %v4868_v53 = vld [vmem:[%s5488_s10 + $0xa0] sm:$0xe]  ;;  %v2679_v33 = vshrl.u32 %v4582_v59, 16 }
 0x169   : > { %v4877_v47 = vrot.slane %v4868_v53, 9  ;;  %v2684_v44 = vrot.slane %v2682_v9, 5  ;;  %5190 = vmatpush.bf16.msra.mxu2 %v5151_v37  ;;  %3837 = vmatpush.bf16.msra.mxu0 %v5149_v13  ;;  %v4768_v9 = vrot.slane %v3176_v6, 9 }
 0x16a   : > { %v1805_v5 = vadd.f32 %v6120_v34, %v1680_v29  ;;  %3156 = vmatmul.bf16.gmra.mxu3 %v3080_v14  ;;  %v6210_v34 = vsel %vm6058_vm5, %v4767_v0, %v3221_v42  ;;  %v2681_v46 = vrot.slane %v2679_v33, 4 }
 0x16b   : > { %3031 = vmatmul.bf16.gmra.mxu2 %v2955_v58  ;;  %v3253_v58 = vunpack.c.l.b16 %v6210_v34  ;;  %v3605_v8 = vsel %vm6058_vm5, %v4877_v47, %v3604_v10  ;;  %v5276_v10 = vld [vmem:[%s5488_s10 + $0x3c] sm:$0x1] }
 0x16c   : > { %v6200_v3 = vadd.f32 %v1907_v62, %v1805_v5  ;;  %v3252_v62 = vunpack.c.l.b16 %v6206_v2  ;;  %v3651_v42 = vunpack.c.l.b16 %v3605_v8  ;;  %v3612_v8 = vrot.slane %v5277_v49, 5  ;;  %v5285_v2 = vld [vmem:[%s5488_s10 + $0xe4] sm:$0x1] }
 0x16d   : > { %v1412_v63 = vpop.f32.mrf.mxu1  ;;  %v1909_v38 = vpop.f32.mrf.mxu0  ;;  %5191 = vmatpush.bf16.msra.mxu2 %v5150_v26  ;;  %3838 = vmatpush.bf16.msra.mxu0 %v5148_v22  ;;  %v4870_v26 = vld [vmem:[%s5488_s10 + $0xb0] sm:$0xe] }
 0x16e   : > { %v6202_v32 = vpop.f32.mrf.mxu2  ;;  %v1428_v18 = vadd.f32 %v1412_v63, %v6036_v56  ;;  %v6215_v7 = vpop.f32.mrf.mxu3  ;;  %v6225_v56 = vsel %vm6058_vm5, %v4878_v55, %v3608_v20  ;;  %v6236_v0 = vpack.c.b16 %v3253_v58, %v3252_v62  ;;  %v5275_v63 = vld [vmem:[%s5488_s10 + $0x34] sm:$0x1]  ;;  %v4879_v31 = vrot.slane %v4870_v26, 9 }
 0x170   : > { %v1681_v12 = vadd.f32 %v6133_v24, %v1428_v18  ;;  %v2685_v24 = vor.u32 %v2684_v44, %v2681_v46  ;;  %v4871_v18 = vld [vmem:[%s5488_s10 + $0xb8] sm:$0xe]  ;;  %v3613_v40 = vsel %vm6058_vm5, %v4879_v31, %v3612_v8  ;;  %v5280_v31 = vld [vmem:[%s5488_s10 + $0xcc] sm:$0x1] }
 0x171   : > { %5192 = vmatpush.bf16.msra.mxu2 %v5149_v13  ;;  %3839 = vmatpush.bf16.msra.mxu0 %v5147_v25  ;;  %v4880_v13 = vrot.slane %v4871_v18, 9  ;;  %v3624_v49 = vrot.slane %v5280_v31, 5 }
 0x172   : > { %v1806_v45 = vadd.f32 %v6142_v23, %v1681_v12  ;;  %v3652_v23 = vunpack.c.l.b16 %v6225_v56  ;;  %v2686_v53 = vrot.slane %v2685_v24, 4 }
 0x174   : > { %v6228_v29 = vadd.f32 %v1909_v38, %v1806_v45  ;;  %v3225_v38 = vrot.slane %v5275_v63, 5  ;;  %v3659_v55 = vpack.c.b16 %v3652_v23, %v3651_v42  ;;  %v2691_v46 = vsel %vm5628_vm2, %v2686_v53, %v2690_v17  ;;  %v5278_v45 = vld [vmem:[%s5488_s10 + $0xbc] sm:$0x1] }
 0x175   : > { %v1415_v37 = vpop.f32.mrf.mxu1  ;;  %v1912_v59 = vpop.f32.mrf.mxu0  ;;  %5193 = vmatpush.bf16.msra.mxu2 %v5148_v22  ;;  %v3616_v24 = vrot.slane %v5278_v45, 5  ;;  %v2709_v43 = vunpack.c.l.b16 %v2691_v46  ;;  %v5279_v46 = vld [vmem:[%s5488_s10 + $0xc4] sm:$0x1] }
 0x176   : > { %v6230_v14 = vpop.f32.mrf.mxu2  ;;  %v1429_v5 = vadd.f32 %v1415_v37, %v6071_v1  ;;  %v6242_v33 = vpop.f32.mrf.mxu3  ;;  %v3229_v1 = vrot.slane %v5276_v10, 5  ;;  %v6263_v44 = vsel %vm6058_vm5, %v4768_v9, %v3225_v38  ;;  %v3653_v9 = vunpack.c.l.b16 %v3613_v40 }
 0x177   : > { %v3254_v37 = vunpack.c.l.b16 %v6263_v44  ;;  %v6281_v22 = vsel %vm6058_vm5, %v4880_v13, %v3616_v24 }
 0x178   : > { %v1682_v47 = vadd.f32 %v6153_v48, %v1429_v5  ;;  %2778 = vmatmul.bf16.gmra.mxu1 %v6009_v30  ;;  %3330 = vmatmul.bf16.gmra.mxu0 %v6236_v0  ;;  %v3654_v63 = vunpack.c.l.b16 %v6281_v22 }
 0x179   : > { %5194 = vmatpush.bf16.msra.mxu2 %v5147_v25  ;;  %v4873_v25 = vld [vmem:[%s5488_s10 + $0xc8] sm:$0xe] }
 0x17a   : > { %v1807_v20 = vadd.f32 %v6166_v57, %v1682_v47  ;;  %3723 = vmatmul.bf16.vlgmr.msrb.gmra.mxu3 %v3659_v55  ;;  %v3660_v10 = vpack.c.b16 %v3654_v63, %v3653_v9  ;;  %v4872_v55 = vld [vmem:[%s5488_s10 + $0xc0] sm:$0xe] }
 0x17b   : > { %3548 = vmatmul.bf16.vlgmr.msrb.gmra.mxu2 %v6183_v54  ;;  %v6267_v54 = vsel %vm6058_vm5, %v4769_v27, %v3229_v1 }
 0x17c   : > { %v6255_v30 = vadd.f32 %v1912_v59, %v1807_v20  ;;  %v3255_v59 = vunpack.c.l.b16 %v6267_v54 }
 0x17d   : > { %v1417_v57 = vpop.f32.mrf.mxu1  ;;  %v1914_v12 = vpop.f32.mrf.mxu0 }
 0x17e   : > { %v6257_v48 = vpop.f32.mrf.mxu2  ;;  %v1430_v36 = vadd.f32 %v1417_v57, %v6094_v50  ;;  %v6272_v6 = vpop.f32.mrf.mxu3  ;;  %v2710_v50 = vpack.c.b16 %v2709_v43, %v6087_v51  ;;  %v3259_v17 = vpack.c.b16 %v3255_v59, %v3254_v37  ;;  %v3620_v57 = vrot.slane %v5279_v46, 5 }
 0x180   : > { %v1683_v42 = vadd.f32 %v6177_v21, %v1430_v36  ;;  %v3373_v36 = vpack.c.b16 %v3250_v15, %v3249_v19 }
 0x182   : > { %v1808_v5 = vadd.f32 %v6189_v60, %v1683_v42 }
 0x184   : > { %v6285_v53 = vadd.f32 %v1914_v12, %v1808_v5  ;;  %v4882_v12 = vrot.slane %v4873_v25, 9 }
 0x185   : > { %v1420_v38 = vpop.f32.mrf.mxu1  ;;  %v1917_v47 = vpop.f32.mrf.mxu0 }
 0x186   : > { %v6287_v21 = vpop.f32.mrf.mxu2  ;;  %v1431_v60 = vadd.f32 %v1420_v38, %v6113_v16  ;;  %v6295_v51 = vpop.f32.mrf.mxu3  ;;  %v6318_v45 = vsel %vm6058_vm5, %v4882_v12, %v3624_v49 }
 0x187   : > { %v3656_v40 = vunpack.c.l.b16 %v6318_v45 }
 0x188   : > { %v1684_v27 = vadd.f32 %v6202_v32, %v1431_v60  ;;  %2783 = vmatmul.bf16.gmra.mxu1 %v2710_v50  ;;  %3335 = vmatmul.bf16.gmra.mxu0 %v3259_v17  ;;  %v4881_v32 = vrot.slane %v4872_v55, 9  ;;  %v5282_v60 = vld [vmem:[%s5488_s10 + $0x4c] sm:$0x1] }
 0x18a   : > { %v1809_v1 = vadd.f32 %v6215_v7, %v1684_v27  ;;  %3728 = vmatmul.bf16.gmra.mxu3 %v3660_v10  ;;  %v3621_v13 = vsel %vm6058_vm5, %v4881_v32, %v3620_v57  ;;  %v3470_v27 = vrot.slane %v5282_v60, 5  ;;  %v4874_v10 = vld [vmem:[%s5488_s10 + $0xd0] sm:$0xe]  ;;  %v5284_v57 = vld [vmem:[%s5488_s10 + $0xdc] sm:$0x1] }
 0x18b   : > { %3553 = vmatmul.bf16.gmra.mxu2 %v6236_v0  ;;  %v3655_v42 = vunpack.c.l.b16 %v3621_v13  ;;  %v3632_v12 = vrot.slane %v5284_v57, 5 }
 0x18c   : > { %v6304_v20 = vadd.f32 %v1917_v47, %v1809_v1  ;;  %v4835_v47 = vrot.slane %v3179_v39, 9  ;;  %v4875_v1 = vld [vmem:[%s5488_s10 + $0xd8] sm:$0xe] }
 0x18d   : > { %v1422_v26 = vpop.f32.mrf.mxu1  ;;  %v1919_v18 = vpop.f32.mrf.mxu0  ;;  %v3661_v56 = vpack.c.b16 %v3656_v40, %v3655_v42  ;;  %v4884_v46 = vrot.slane %v4875_v1, 9 }
 0x18e   : > { %v6306_v16 = vpop.f32.mrf.mxu2  ;;  %v1432_v0 = vadd.f32 %v1422_v26, %v6131_v41  ;;  %v6311_v8 = vpop.f32.mrf.mxu3  ;;  %v3471_v49 = vsel %vm6058_vm5, %v4835_v47, %v3470_v27 }
 0x190   : > { %v1685_v7 = vadd.f32 %v6230_v14, %v1432_v0  ;;  %v3776_v14 = vpack.c.b16 %v3653_v9, %v3652_v23  ;;  %v4802_v23 = vrot.slane %v3178_v11, 9  ;;  %v5281_v9 = vld [vmem:[%s5488_s10 + $0x44] sm:$0x1] }
 0x191   : > { %v3353_v38 = vrot.slane %v5281_v9, 5 }
 0x192   : > { %v1810_v24 = vadd.f32 %v6242_v33, %v1685_v7 }
 0x194   : > { %v6325_v41 = vadd.f32 %v1919_v18, %v1810_v24  ;;  %v4883_v18 = vrot.slane %v4874_v10, 9  ;;  %v3489_v24 = vunpack.c.l.b16 %v3471_v49 }
 0x195   : > { %v2150_v5 = vpop.f32.mrf.mxu1  ;;  %v2650_v50 = vpop.f32.mrf.mxu0 }
 0x196   : > { %v6327_v43 = vpop.f32.mrf.mxu2  ;;  %v2170_v33 = vadd.f32 %v2150_v5, %v6151_v28  ;;  %v6334_v19 = vpop.f32.mrf.mxu3  ;;  %v3374_v5 = vpack.c.b16 %v3252_v62, %v3251_v61  ;;  %v3756_v62 = vrot.slane %v5285_v2, 5 }
 0x198   : > { %v2295_v15 = vadd.f32 %v6257_v48, %v2170_v33  ;;  %3437 = vmatmul.bf16.vlgmr.msra.gmra.mxu1 %v3373_v36  ;;  %3840 = vmatmul.bf16.vlgmr.msra.gmra.mxu0 %v3776_v14  ;;  %v3777_v33 = vpack.c.b16 %v3655_v42, %v3654_v63 }
 0x19a   : > { %v2545_v28 = vadd.f32 %v6272_v6, %v2295_v15  ;;  %3733 = vmatmul.bf16.gmra.mxu3 %v3661_v56  ;;  %v6352_v6 = vsel %vm6058_vm5, %v4802_v23, %v3353_v38  ;;  %v4876_v38 = vld [vmem:[%s5488_s10 + $0xe0] sm:$0xe] }
 0x19b   : > { %3558 = vmatmul.bf16.gmra.mxu2 %v3259_v17  ;;  %v5283_v17 = vld [vmem:[%s5488_s10 + $0xd4] sm:$0x1]  ;;  %v3372_v13 = vunpack.c.l.b16 %v6352_v6  ;;  %v4917_v63 = vrot.slane %v4876_v38, 9 }
 0x19c   : > { %v6345_v55 = vadd.f32 %v2650_v50, %v2545_v28  ;;  %v3628_v32 = vrot.slane %v5283_v17, 5 }
 0x19d   : > { %v2152_v25 = vpop.f32.mrf.mxu1  ;;  %v2652_v26 = vpop.f32.mrf.mxu0  ;;  %v3490_v23 = vpack.c.b16 %v3489_v24, %v3372_v13  ;;  %v3376_v49 = vpack.c.b16 %v3372_v13, %v3255_v59 }
 0x19e   : > { %v2285_v48 = vpop.f32.mrf.mxu2  ;;  %v2171_v31 = vadd.f32 %v2152_v25, %v6175_v35  ;;  %v2535_v0 = vpop.f32.mrf.mxu3  ;;  %v3629_v36 = vsel %vm6058_vm5, %v4883_v18, %v3628_v32  ;;  %v3633_v35 = vsel %vm6058_vm5, %v4884_v46, %v3632_v12 }
 0x19f   : > { %v3657_v11 = vunpack.c.l.b16 %v3629_v36  ;;  %v3658_v39 = vunpack.c.l.b16 %v3633_v35 }
 0x1a0   : > { %v2296_v7 = vadd.f32 %v6287_v21, %v2171_v31 }
 0x1a1   : > { %v3662_v61 = vpack.c.b16 %v3658_v39, %v3657_v11 }
 0x1a2   : > { %v2546_v14 = vadd.f32 %v6295_v51, %v2296_v7 }
 0x1a4   : > { %v6367_v50 = vadd.f32 %v2652_v26, %v2546_v14 }
 0x1a5   : > { %v2155_v15 = vpop.f32.mrf.mxu1  ;;  %v2655_v56 = vpop.f32.mrf.mxu0 }
 0x1a6   : > { %v2287_v21 = vpop.f32.mrf.mxu2  ;;  %v2172_v9 = vadd.f32 %v2155_v15, %v6200_v3  ;;  %v2537_v51 = vpop.f32.mrf.mxu3 }
 0x1a8   : > { %v2297_v52 = vadd.f32 %v6306_v16, %v2172_v9  ;;  %3442 = vmatmul.bf16.gmra.mxu1 %v3374_v5  ;;  %3845 = vmatmul.bf16.gmra.mxu0 %v3777_v33  ;;  %v3757_v16 = vsel %vm6058_vm5, %v4917_v63, %v3756_v62 }
 0x1a9   : > { %v3775_v1 = vunpack.c.l.b16 %v3757_v16 }
 0x1aa   : > { %v2547_v22 = vadd.f32 %v6311_v8, %v2297_v52  ;;  %3738 = vmatmul.bf16.gmra.mxu3 %v3662_v61  ;;  %v3375_v8 = vpack.c.b16 %v3254_v37, %v3253_v58 }
 0x1ab   : > { %3563 = vmatmul.bf16.gmra.mxu2 %v3490_v23  ;;  %v3779_v32 = vpack.c.b16 %v3775_v1, %v3658_v39 }
 0x1ac   : > { %v6376_v42 = vadd.f32 %v2655_v56, %v2547_v22 }
 0x1ad   : > { %v2157_v47 = vpop.f32.mrf.mxu1  ;;  %v2657_v60 = vpop.f32.mrf.mxu0 }
 0x1ae   : > { %v2290_v28 = vpop.f32.mrf.mxu2  ;;  %v2173_v3 = vadd.f32 %v2157_v47, %v6228_v29  ;;  %v2540_v27 = vpop.f32.mrf.mxu3  ;;  %v3778_v29 = vpack.c.b16 %v3657_v11, %v3656_v40 }
 0x1b0   : > { %v2298_v10 = vadd.f32 %v6327_v43, %v2173_v3 }
 0x1b2   : > { %v2548_v25 = vadd.f32 %v6334_v19, %v2298_v10 }
 0x1b4   : > { %v6383_v26 = vadd.f32 %v2657_v60, %v2548_v25 }
 0x1b5   : > { %v2160_v17 = vpop.f32.mrf.mxu1  ;;  %v2660_v4 = vpop.f32.mrf.mxu0 }
 0x1b6   : > { %v2292_v18 = vpop.f32.mrf.mxu2  ;;  %v2174_v46 = vadd.f32 %v2160_v17, %v6255_v30  ;;  %v2542_v43 = vpop.f32.mrf.mxu3 }
 0x1b8   : > { %v2299_v57 = vadd.f32 %v2285_v48, %v2174_v46  ;;  %3447 = vmatmul.bf16.gmra.mxu1 %v3375_v8  ;;  %3850 = vmatmul.bf16.gmra.mxu0 %v3778_v29 }
 0x1ba   : > { %v2549_v19 = vadd.f32 %v2535_v0, %v2299_v57 }
 0x1bb   : > { %3855 = vmatmul.bf16.vlgmr.msra.gmra.mxu2 %v3779_v32 }
 0x1bc   : > { %v2674_v12 = vadd.f32 %v2660_v4, %v2549_v19 }
 0x1bd   : > { %v2162_v31 = vpop.f32.mrf.mxu1  ;;  %v2662_v44 = vpop.f32.mrf.mxu0 }
 0x1be   : > { %v3017_v34 = vpop.f32.mrf.mxu2  ;;  %v2175_v58 = vadd.f32 %v2162_v31, %v6285_v53  ;;  %v3142_v37 = vpop.f32.mrf.mxu3 }
 0x1c0   : > { %v2300_v45 = vadd.f32 %v2287_v21, %v2175_v58 }
 0x1c2   : > { %v2550_v40 = vadd.f32 %v2537_v51, %v2300_v45 }
 0x1c4   : > { %v2675_v6 = vadd.f32 %v2662_v44, %v2550_v40 }
 0x1c5   : > { %v2165_v7 = vpop.f32.mrf.mxu1  ;;  %v2665_v48 = vpop.f32.mrf.mxu0 }
 0x1c6   : > { %v3019_v30 = vpop.f32.mrf.mxu2  ;;  %v2176_v24 = vadd.f32 %v2165_v7, %v6304_v20  ;;  %v6396_v36 = vpop.f32.mrf.mxu3 }
 0x1c8   : > { %v2301_v0 = vadd.f32 %v2290_v28, %v2176_v24  ;;  %3452 = vmatmul.bf16.gmra.mxu1 %v3376_v49 }
 0x1ca   : > { %v2551_v35 = vadd.f32 %v2540_v27, %v2301_v0 }
 0x1cc   : > { %v2676_v14 = vadd.f32 %v2665_v48, %v2551_v35 }
 0x1cd   : > { %v2167_v53 = vpop.f32.mrf.mxu1  ;;  %v2667_v33 = vpop.f32.mrf.mxu0 }
 0x1ce   : > { %v3022_v5 = vpop.f32.mrf.mxu2  ;;  %v2177_v21 = vadd.f32 %v2167_v53, %v6325_v41  ;;  %v3147_v11 = vpop.f32.mrf.mxu3 }
 0x1d0   : > { %v2302_v39 = vadd.f32 %v2292_v18, %v2177_v21 }
 0x1d2   : > { %v2552_v54 = vadd.f32 %v2542_v43, %v2302_v39 }
 0x1d4   : > { %v2677_v59 = vadd.f32 %v2667_v33, %v2552_v54 }
 0x1d5   : > { %v2769_v15 = vpop.f32.mrf.mxu1  ;;  %v3321_v56 = vpop.f32.mrf.mxu0 }
 0x1d6   : > { %v3024_v13 = vpop.f32.mrf.mxu2  ;;  %v2789_v20 = vadd.f32 %v2769_v15, %v6345_v55  ;;  %v6400_v9 = vpop.f32.mrf.mxu3 }
 0x1d8   : > { %v3037_v23 = vadd.f32 %v3017_v34, %v2789_v20 }
 0x1da   : > { %v3162_v51 = vadd.f32 %v3142_v37, %v3037_v23 }
 0x1dc   : > { %v3341_v38 = vadd.f32 %v3321_v56, %v3162_v51 }
 0x1dd   : > { %v2771_v61 = vpop.f32.mrf.mxu1  ;;  %v3323_v2 = vpop.f32.mrf.mxu0 }
 0x1de   : > { %v3027_v52 = vpop.f32.mrf.mxu2  ;;  %v2790_v62 = vadd.f32 %v2771_v61, %v6367_v50  ;;  %v3152_v22 = vpop.f32.mrf.mxu3  ;;  %v6428_v61 = vld [vmem:[%s6497_s2] ss:$0 sm:$0xff] }
 0x1e0   : > { %v3038_v41 = vadd.f32 %v3019_v30, %v2790_v62 }
 0x1e5   : > { %v2774_v28 = vpop.f32.mrf.mxu1  ;;  %v3326_v47 = vpop.f32.mrf.mxu0 }
 0x1e6   : > { %v3029_v63 = vpop.f32.mrf.mxu2  ;;  %v2791_v60 = vadd.f32 %v2774_v28, %v6376_v42  ;;  %v6404_v10 = vpop.f32.mrf.mxu3 }
 0x1e8   : > { %v3039_v3 = vadd.f32 %v3022_v5, %v2791_v60 }
 0x1ea   : > { %v3164_v16 = vadd.f32 %v3147_v11, %v3039_v3 }
 0x1ec   : > { %v3343_v55 = vadd.f32 %v3326_v47, %v3164_v16 }
 0x1ed   : > { %v2776_v1 = vpop.f32.mrf.mxu1  ;;  %v6406_v25 = vpop.f32.mrf.mxu0 }
 0x1ee   : > { %v3032_v27 = vpop.f32.mrf.mxu2  ;;  %v2792_v8 = vadd.f32 %v2776_v1, %v6383_v26  ;;  %v3157_v32 = vpop.f32.mrf.mxu3 }
 0x1f0   : > { %v3040_v18 = vadd.f32 %v3024_v13, %v2792_v8 }
 0x1f2   : > { %v3165_v28 = vadd.f32 %v6400_v9, %v3040_v18 }
 0x1f5   : > { %v2779_v29 = vpop.f32.mrf.mxu1  ;;  %v3331_v17 = vpop.f32.mrf.mxu0 }
 0x1f6   : > { %v3034_v50 = vpop.f32.mrf.mxu2  ;;  %v2793_v4 = vadd.f32 %v2779_v29, %v2674_v12  ;;  %v6415_v58 = vpop.f32.mrf.mxu3 }
 0x1f8   : > { %v3041_v46 = vadd.f32 %v3027_v52, %v2793_v4 }
 0x1fa   : > { %v3166_v43 = vadd.f32 %v3152_v22, %v3041_v46 }
 0x1fc   : > { %v6409_v42 = vadd.f32 %v3331_v17, %v3166_v43 }
 0x1fd   : > { %v2781_v19 = vpop.f32.mrf.mxu1  ;;  %v6411_v34 = vpop.f32.mrf.mxu0 }
 0x1fe   : > { %v3549_v57 = vpop.f32.mrf.mxu2  ;;  %v2794_v31 = vadd.f32 %v2781_v19, %v2675_v6  ;;  %v3724_v30 = vpop.f32.mrf.mxu3 }
 0x200   : > { %v6413_v44 = vadd.f32 %v3029_v63, %v2794_v31 }
 0x205   : > { %v2784_v37 = vpop.f32.mrf.mxu1  ;;  %v3336_v45 = vpop.f32.mrf.mxu0 }
 0x206   : > { %v3551_v26 = vpop.f32.mrf.mxu2  ;;  %v2795_v40 = vadd.f32 %v2784_v37, %v2676_v14  ;;  %v3726_v6 = vpop.f32.mrf.mxu3  ;;  %v3163_v14 = vadd.f32 %v6396_v36, %v3038_v41 }
 0x208   : > { %v3043_v49 = vadd.f32 %v3032_v27, %v2795_v40  ;;  %v3342_v54 = vadd.f32 %v3323_v2, %v3163_v14  ;;  %v3344_v27 = vadd.f32 %v6406_v25, %v3165_v28  ;;  %v3167_v25 = vadd.f32 %v6404_v10, %v6413_v44 }
 0x20a   : > { %v3168_v12 = vadd.f32 %v3157_v32, %v3043_v49 }
 0x20c   : > { %v6417_v7 = vadd.f32 %v3336_v45, %v3168_v12  ;;  %v3346_v45 = vadd.f32 %v6411_v34, %v3167_v25 }
 0x20d   : > { %v2786_v24 = vpop.f32.mrf.mxu1  ;;  %v6419_v0 = vpop.f32.mrf.mxu0 }
 0x20e   : > { %v3554_v48 = vpop.f32.mrf.mxu2  ;;  %v2796_v35 = vadd.f32 %v2786_v24, %v2677_v59  ;;  %v3729_v23 = vpop.f32.mrf.mxu3 }
 0x210   : > { %v6421_v5 = vadd.f32 %v3034_v50, %v2796_v35 }
 0x215   : > { %v3438_v53 = vpop.f32.mrf.mxu1  ;;  %v3841_v33 = vpop.f32.mrf.mxu0 }
 0x216   : > { %v3458_v21 = vadd.f32 %v3438_v53, %v3341_v38  ;;  %v3556_v11 = vpop.f32.mrf.mxu2  ;;  %v3731_v60 = vpop.f32.mrf.mxu3 }
 0x218   : > { %v3569_v39 = vadd.f32 %v3549_v57, %v3458_v21 }
 0x21a   : > { %v3744_v56 = vadd.f32 %v3724_v30, %v3569_v39 }
 0x21c   : > { %v3861_v52 = vadd.f32 %v3841_v33, %v3744_v56 }
 0x21d   : > { %v3440_v13 = vpop.f32.mrf.mxu1  ;;  %v3843_v15 = vpop.f32.mrf.mxu0 }
 0x21e   : > { %v3459_v20 = vadd.f32 %v3440_v13, %v3342_v54  ;;  %v3559_v59 = vpop.f32.mrf.mxu2  ;;  %v3873_v41 = vadd.f32 %v6428_v61, %v3861_v52  ;;  %v3734_v32 = vpop.f32.mrf.mxu3 }
 0x220   : > { %v3570_v51 = vadd.f32 %v3551_v26, %v3459_v20 }
 0x222   : > { %v3745_v38 = vadd.f32 %v3726_v6, %v3570_v51 }
 0x224   : > { %v3862_v36 = vadd.f32 %v3843_v15, %v3745_v38 }
 0x225   : > { %v3443_v62 = vpop.f32.mrf.mxu1  ;;  %v3846_v2 = vpop.f32.mrf.mxu0 }
 0x226   : > { %v3874_v22 = vadd.f32 %v6428_v61, %v3862_v36  ;;  %v3460_v63 = vadd.f32 %v3443_v62, %v3343_v55  ;;  %v3561_v16 = vpop.f32.mrf.mxu2  ;;  %v3736_v40 = vpop.f32.mrf.mxu3 }
 0x228   : > { %v5159_v47 = vpack.c.bf16 %v3874_v22, %v3873_v41  ;;  %v3571_v3 = vadd.f32 %v3554_v48, %v3460_v63 }
 0x22a   : > { %5160 = vst [vmem:[%s6435_s23] sm:$0xff] %v5159_v47   ;;  %v3746_v50 = vadd.f32 %v3729_v23, %v3571_v3 }
 0x22c   : > { %v3863_v4 = vadd.f32 %v3846_v2, %v3746_v50 }
 0x22d   : > { %v3445_v1 = vpop.f32.mrf.mxu1  ;;  %v3848_v8 = vpop.f32.mrf.mxu0 }
 0x22e   : > { %v3461_v29 = vadd.f32 %v3445_v1, %v3344_v27  ;;  %v3564_v18 = vpop.f32.mrf.mxu2  ;;  %v3875_v43 = vadd.f32 %v6428_v61, %v3863_v4  ;;  %v3739_v34 = vpop.f32.mrf.mxu3 }
 0x230   : > { %v3572_v17 = vadd.f32 %v3556_v11, %v3461_v29  ;;  %v3169_v11 = vadd.f32 %v6415_v58, %v6421_v5 }
 0x232   : > { %v3747_v55 = vadd.f32 %v3731_v60, %v3572_v17  ;;  %v3348_v13 = vadd.f32 %v6419_v0, %v3169_v11 }
 0x234   : > { %v3864_v9 = vadd.f32 %v3848_v8, %v3747_v55 }
 0x235   : > { %v3448_v46 = vpop.f32.mrf.mxu1  ;;  %v3851_v31 = vpop.f32.mrf.mxu0 }
 0x236   : > { %v3876_v57 = vadd.f32 %v6428_v61, %v3864_v9  ;;  %v3462_v19 = vadd.f32 %v3448_v46, %v6409_v42  ;;  %v3566_v48 = vpop.f32.mrf.mxu2  ;;  %v3741_v51 = vpop.f32.mrf.mxu3 }
 0x238   : > { %v5164_v26 = vpack.c.bf16 %v3876_v57, %v3875_v43  ;;  %v3573_v37 = vadd.f32 %v3559_v59, %v3462_v19 }
 0x23a   : > { %5176 = vst [vmem:[%s6435_s23 + $0x8] sm:$0xff] %v5164_v26   ;;  %v3748_v12 = vadd.f32 %v3734_v32, %v3573_v37 }
 0x23c   : > { %v3865_v6 = vadd.f32 %v3851_v31, %v3748_v12 }
 0x23d   : > { %v3450_v49 = vpop.f32.mrf.mxu1  ;;  %v3853_v35 = vpop.f32.mrf.mxu0 }
 0x23e   : > { %v3463_v30 = vadd.f32 %v3450_v49, %v3346_v45  ;;  %v3877_v10 = vadd.f32 %v6428_v61, %v3865_v6  ;;  %v3856_v39 = vpop.f32.mrf.mxu2 }
 0x240   : > { %v3574_v24 = vadd.f32 %v3561_v16, %v3463_v30 }
 0x242   : > { %v3749_v53 = vadd.f32 %v3736_v40, %v3574_v24 }
 0x244   : > { %v3866_v42 = vadd.f32 %v3853_v35, %v3749_v53 }
 0x245   : > { %v3453_v33 = vpop.f32.mrf.mxu1 }
 0x246   : > { %v3878_v44 = vadd.f32 %v6428_v61, %v3866_v42  ;;  %v3464_v21 = vadd.f32 %v3453_v33, %v6417_v7  ;;  %v3858_v5 = vpop.f32.mrf.mxu2 }
 0x248   : > { %v5169_v14 = vpack.c.bf16 %v3878_v44, %v3877_v10  ;;  %v3575_v54 = vadd.f32 %v3564_v18, %v3464_v21 }
 0x24a   : > { %5177 = vst [vmem:[%s6435_s23 + $0x10] sm:$0xff] %v5169_v14   ;;  %v3750_v56 = vadd.f32 %v3739_v34, %v3575_v54 }
 0x24c   : > { %v3867_v58 = vadd.f32 %v3856_v39, %v3750_v56 }
 0x24d   : > { %v3455_v15 = vpop.f32.mrf.mxu1 }
 0x24e   : > { %v3465_v20 = vadd.f32 %v3455_v15, %v3348_v13  ;;  %v3879_v0 = vadd.f32 %v6428_v61, %v3867_v58 }
 0x250   : > { %v3576_v23 = vadd.f32 %v3566_v48, %v3465_v20 }
 0x252   : > { %v3751_v7 = vadd.f32 %v3741_v51, %v3576_v23 }
 0x254   : > { %v3868_v59 = vadd.f32 %v3858_v5, %v3751_v7 }
 0x256   : > { %v3880_v52 = vadd.f32 %v6428_v61, %v3868_v59 }
 0x258   : > { %v5174_v38 = vpack.c.bf16 %v3880_v52, %v3879_v0 }
 0x25a   : > { %5178 = vst [vmem:[%s6435_s23 + $0x18] sm:$0xff] %v5174_v38  }
 0x25b   : > { %5343 = shalt.err (!%p5340_p9)
}
 0x25c   : > { %s5403_s11 = smov 64   ;;  %s5404_s19 = smov 4  }
 0x25d   : > { %5200 = dma.vmem_to_hbm [thread:$0]  (%p5465_p4), %s3914_s30, 512, %s3916_s4, %s3898_s15, %s5403_s11, %s5403_s11, %s5404_s19  }
 0x25e PF: > { %p5212_p10 = scmp.ge.s32.totalorder %s5398_s17, 2  ;;  %s3930_s21 = sand.u32 1, %s5378_s12  }
 0x25f   : > { %s3931_s23 = scalar_lea.sflag [#allocation4], %s3930_s21 }
 0x260   : > { %p5207_p11 = pnand %p5212_p10, %p5472_p8 }
 0x262   : > { %p5208_p12 = pneg %p5207_p11 }
 0x264   : > { %5373 = dma.done.wait (%p5208_p12), %s3931_s23, 512  }
 0x265   : > { %5375 = vsyncadd (%p5208_p12), %s3931_s23, 4294966784  ;;  %s17_s17 = sadd.s32 1, %s5398_s17   ;;  %s6505_s12 = smov %s5382_s13 }
 0x266   : > { %p14_p13 = scmp.ge.s32.totalorder %s17_s17, 4   ;;  %s6506_s13 = smov %s5386_s14 }
 0x267   : > { %s6507_s14 = smov %s5478_s25  ;;  %s6508_s15 = smov %s5394_s16 }
 0x268   : > { %s6509_s16 = smov %s6511_s20  ;;  %16 = sbr.rel (!%p14_p13) target bundleno = 5 (0x5), region = 103 }
 0x26d   :  { %3937 = vsyncpa [#allocation3], 1 }
 0x26e   :  { %3939 = vsyncpa [#allocation3 + $0x1], 1 }
 0x26f   :  { %3940 = vsyncpa [#allocation4], 1 }
 0x270   :  { %3942 = vsyncpa [#allocation4 + $0x1], 1 }

</bundles_post_ra>
